<compile_context>
chip_gen: v5e
topology: v5e:2x2
jax: 0.10.0
libtpu: 0.0.40
codegen_flags: <defaults>
</compile_context>

<pallas_src>
import functools
import math

import jax
import jax.numpy as jnp
from jax.experimental import pallas as pl
from jax.experimental.pallas import tpu as pltpu


# ----------------------------------------------------------------------------
# Fused decoder-stack kernel: grid = (batch, layer)
# ----------------------------------------------------------------------------

def _decoder_block_kernel(
        x_ref, e_ref, ms_ref, mc_ref, fnorm_ref,
        wqkv_ref, bqkv_ref, wo1_ref, bo1_ref,
        wqc_ref, bqc_ref, wkvc_ref, bkvc_ref, wo2_ref, bo2_ref,
        w1_ref, b1_ref, w2_ref, b2_ref,
        o_ref,
        x_state, y_scr, q_scr, k_scr, v_scr,
        *, n_heads):
    H = n_heads
    T = x_ref.shape[1]
    S = e_ref.shape[1]
    D = x_ref.shape[2]
    dh = D // H
    Tb = T // H
    Sb = S // H
    scale = 1.0 / math.sqrt(dh)
    layer = pl.program_id(1)

    @pl.when(layer == 0)
    def _():
        x_state[...] = x_ref[0]            # carried activation lives in VMEM

    x = x_state[...]

    def mm(a, b):                          # bf16 MXU operands, f32 accumulate
        return jax.lax.dot_general(
            a.astype(jnp.bfloat16), b.astype(jnp.bfloat16),
            (((1,), (0,)), ((), ())), preferred_element_type=jnp.float32)

    def mm_nt(a, b):                       # a @ b.T
        return jax.lax.dot_general(
            a.astype(jnp.bfloat16), b.astype(jnp.bfloat16),
            (((1,), (1,)), ((), ())), preferred_element_type=jnp.float32)

    def ln_norm(v):
        # torch LayerNorm core: (v - mean) / (std_unbiased + 1e-7); the affine
        # is folded into the following projection (final norm applies it below).
        mean = jnp.mean(v, axis=-1, keepdims=True)
        vc = v - mean
        var = jnp.sum(vc * vc, axis=-1, keepdims=True) / (v.shape[-1] - 1)
        return vc * pl.reciprocal(jnp.sqrt(var) + 1e-7, approx=True)

    def attend(n_kv, add_mask):
        # q_scr/k_scr/v_scr hold one (batch, head) in chunk-major row order;
        # add_mask is the matching permuted additive table (-5e4 mask + g).
        s = mm_nt(q_scr[...], k_scr[0:n_kv, :]) * scale + add_mask
        m = jnp.max(s, axis=-1, keepdims=True)
        p = jnp.exp(s - m)
        p = p / jnp.sum(p, axis=-1, keepdims=True)     # exact softmax denom
        return mm(p, v_scr[0:n_kv, :])                 # [T, dh]

    def split_q(src, h, off):
        r0 = h * Tb
        for c in range(H):
            q_scr[c * Tb:(c + 1) * Tb, :] = (
                src[r0:r0 + Tb, off + c * dh:off + (c + 1) * dh])

    def split_kv(src, h, nb, koff, voff):
        s0 = h * nb
        for c in range(H):
            k_scr[c * nb:(c + 1) * nb, :] = (
                src[s0:s0 + nb, koff + c * dh:koff + (c + 1) * dh])
            v_scr[c * nb:(c + 1) * nb, :] = (
                src[s0:s0 + nb, voff + c * dh:voff + (c + 1) * dh])

    def merge_head(o, h):
        r0 = h * Tb
        for c in range(H):
            y_scr[r0:r0 + Tb, c * dh:(c + 1) * dh] = o[c * Tb:(c + 1) * Tb, :]

    # ---- self attention (LN1 affine folded into fused QKV weights) ----------
    x1 = ln_norm(x)
    qkv = mm(x1, wqkv_ref[...]) + bqkv_ref[...]          # [T, 3D]
    add_self = ms_ref[0]                                 # [T, T]
    for h in range(H):
        split_q(qkv, h, 0)
        split_kv(qkv, h, Tb, D, 2 * D)
        merge_head(attend(T, add_self), h)
    x = x + mm(y_scr[...], wo1_ref[...]) + bo1_ref[...]

    # ---- cross attention (LN2 folded into Q; K/V from e_out, no g-mask) -----
    x1 = ln_norm(x)
    qc = mm(x1, wqc_ref[...]) + bqc_ref[...]             # [T, D]
    kvc = mm(e_ref[0], wkvc_ref[...]) + bkvc_ref[...]    # [S, 2D]
    add_cross = mc_ref[0]                                # [1, S] broadcast
    for h in range(H):
        split_q(qc, h, 0)
        split_kv(kvc, h, Sb, 0, D)
        merge_head(attend(S, add_cross), h)
    x = x + mm(y_scr[...], wo2_ref[...]) + bo2_ref[...]

    # ---- feed forward (LN3 folded into fc1) ----------------------------------
    x1 = ln_norm(x)
    hidden = jnp.maximum(mm(x1, w1_ref[...]) + b1_ref[...], 0.0)
    x = x + mm(hidden, w2_ref[...]) + b2_ref[...]

    x_state[...] = x

    @pl.when(layer == pl.num_programs(1) - 1)
    def _():
        # Final LayerNorm of the block (with affine), fused into the last step.
        o_ref[0] = ln_norm(x) * fnorm_ref[0:1, :] + fnorm_ref[1:2, :]


# ----------------------------------------------------------------------------
# Glue: masks, LN-affine folding, bf16 weight prep, pallas_call wrapper
# ----------------------------------------------------------------------------

def decoder_block_forward(params, trg, e_out, src_mask, trg_mask, g_mask2,
                          *, d_model, n_heads, num_layers):
    B, T = trg.shape
    S = e_out.shape[1]
    H = n_heads
    D = d_model
    dh = D // H
    L = num_layers
    st = params["stack"]
    F = st["w1"].shape[-1]
    assert D % H == 0 and T % H == 0 and S % H == 0
    Tb, Sb = T // H, S // H

    # TODO(synk): embedding gather + positional encoding stay in XLA glue.
    x3d = (params["embed"][trg] + params["pe"][:T][None]).astype(jnp.float32)
    e3d = e_out.astype(jnp.bfloat16)          # pure MXU operand -> bf16

    # Chunk-major permutation of the module's flat head-row order; used by the
    # in-kernel static-slice head assembly and by the mask tables below.
    def head_perm(n, nb):
        r = jnp.arange(n)
        return (r % nb) * H + r // nb

    pT = head_perm(T, Tb)
    pS = head_perm(S, Sb)

    # Tiny per-batch additive mask tables (mask sentinel and g-mask merged).
    trg_m = jnp.broadcast_to(trg_mask, (B, T, T)).astype(jnp.float32)
    add_self = (jnp.where(trg_m == 0, -50000.0, 0.0)
                + g_mask2.astype(jnp.float32)[None])
    add_self = add_self[:, pT][:, :, pT]                        # [B, T, T]
    src_m = src_mask.reshape(B, 1, S).astype(jnp.float32)
    add_cross = jnp.where(src_m == 0, -50000.0, 0.0)[:, :, pS]  # [B, 1, S]

    # Fold each LayerNorm affine into the projection that consumes it; cast
    # every MXU weight operand to bf16 (biases stay f32).
    ln = st["ln"].astype(jnp.float32)                           # [L, 6, D]

    def fold(alpha, beta, w, b):
        wf = (alpha[:, :, None] * w).astype(jnp.bfloat16)
        bf = (jnp.einsum("ld,ldn->ln", beta, w)[:, None, :] + b
              ).astype(jnp.float32)
        return wf, bf

    wqkv, bqkv = fold(ln[:, 0], ln[:, 1], st["wqkv"], st["bqkv"])
    wqc, bqc = fold(ln[:, 2], ln[:, 3], st["wqc"], st["bqc"])
    w1, b1 = fold(ln[:, 4], ln[:, 5], st["w1"], st["b1"])
    wo1 = st["wo1"].astype(jnp.bfloat16)
    wkvc = st["wkvc"].astype(jnp.bfloat16)
    wo2 = st["wo2"].astype(jnp.bfloat16)
    w2 = st["w2"].astype(jnp.bfloat16)
    bo1 = st["bo1"].astype(jnp.float32)
    bkvc = st["bkvc"].astype(jnp.float32)
    bo2 = st["bo2"].astype(jnp.float32)
    b2 = st["b2"].astype(jnp.float32)
    fnorm = params["norm"].astype(jnp.float32)

    def bspec(d1, d2):                     # per-batch activation / mask block
        return pl.BlockSpec((1, d1, d2), lambda b, l: (b, 0, 0))

    def wspec(d1, d2):                     # per-layer stacked weight block
        return pl.BlockSpec((None, d1, d2), lambda b, l: (l, 0, 0))

    in_specs = [
        bspec(T, D),                       # x (embedding + pos-encoding)
        bspec(S, D),                       # e_out (bf16)
        bspec(T, T),                       # additive self mask (+ g_mask)
        bspec(1, S),                       # additive cross mask (one row)
        pl.BlockSpec((2, D), lambda b, l: (0, 0)),   # final norm (alpha, beta)
        wspec(D, 3 * D), wspec(1, 3 * D),  # fused self QKV (LN1 folded)
        wspec(D, D), wspec(1, D),          # self out-proj
        wspec(D, D), wspec(1, D),          # cross Q (LN2 folded)
        wspec(D, 2 * D), wspec(1, 2 * D),  # fused cross KV
        wspec(D, D), wspec(1, D),          # cross out-proj
        wspec(D, F), wspec(1, F),          # FF fc1 (LN3 folded)
        wspec(F, D), wspec(1, D),          # FF fc2
    ]

    flops = B * L * (2 * T * D * 3 * D + 6 * T * D * D + 4 * S * D * D
                     + 4 * T * T * D + 4 * T * S * D + 4 * T * D * F)
    w_bytes = 2 * L * D * (3 * D + 3 * D + 2 * D + 2 * F)
    bytes_accessed = (B * w_bytes + 8 * B * T * D + 2 * B * S * D
                      + 4 * B * (T * T + S))
    cost = pl.CostEstimate(flops=int(flops),
                           transcendentals=int(B * L * (T * T + T * S)),
                           bytes_accessed=int(bytes_accessed))

    out = pl.pallas_call(
        functools.partial(_decoder_block_kernel, n_heads=H),
        out_shape=jax.ShapeDtypeStruct((B, T, D), jnp.float32),
        grid_spec=pltpu.PrefetchScalarGridSpec(
            num_scalar_prefetch=0,
            grid=(B, L),
            in_specs=in_specs,
            out_specs=pl.BlockSpec((1, T, D), lambda b, l: (b, 0, 0)),
            scratch_shapes=[
                pltpu.VMEM((T, D), jnp.float32),            # carried x
                pltpu.VMEM((T, D), jnp.float32),            # merged heads
                pltpu.VMEM((T, dh), jnp.float32),           # per-head q
                pltpu.VMEM((max(T, S), dh), jnp.float32),   # per-head k
                pltpu.VMEM((max(T, S), dh), jnp.float32),   # per-head v
            ],
        ),
        compiler_params=pltpu.CompilerParams(
            dimension_semantics=("parallel", "arbitrary"),
            vmem_limit_bytes=32 * 1024 * 1024),
        cost_estimate=cost,
    )(x3d, e3d, add_self, add_cross, fnorm,
      wqkv, bqkv, wo1, bo1, wqc, bqc, wkvc, bkvc, wo2, bo2, w1, b1, w2, b2)
    return out


# ----------------------------------------------------------------------------
# Deterministic parameter init (stacked per-layer layout) + pos encoding
# ----------------------------------------------------------------------------

def make_pos_encoding(d_model, max_len):
    pos = jnp.arange(max_len, dtype=jnp.float32)[:, None]
    i = jnp.arange(d_model, dtype=jnp.float32)[None, :]
    angle = pos / jnp.power(10000.0, 2.0 * i / d_model)
    return jnp.where(i < d_model / 2.0, jnp.sin(angle), jnp.cos(angle))


def init_params(key, vocab_size, d_model, ff_dim, num_layers, max_len):
    D, F, L = d_model, ff_dim, num_layers
    ks = jax.random.split(key, 20)

    def w(k, *shape, scale=0.25):
        return scale * jax.random.normal(k, shape, jnp.float32)

    alphas = 1.0 + 0.1 * jax.random.normal(ks[15], (L, 3, D), jnp.float32)
    betas = 0.1 * jax.random.normal(ks[16], (L, 3, D), jnp.float32)
    ln = jnp.stack([alphas[:, 0], betas[:, 0], alphas[:, 1], betas[:, 1],
                    alphas[:, 2], betas[:, 2]], axis=1)          # [L, 6, D]
    stack = {
        "ln": ln,
        "wqkv": w(ks[1], L, D, 3 * D), "bqkv": w(ks[2], L, 1, 3 * D, scale=0.1),
        "wo1": w(ks[3], L, D, D), "bo1": w(ks[4], L, 1, D, scale=0.1),
        "wqc": w(ks[5], L, D, D), "bqc": w(ks[6], L, 1, D, scale=0.1),
        "wkvc": w(ks[7], L, D, 2 * D), "bkvc": w(ks[8], L, 1, 2 * D, scale=0.1),
        "wo2": w(ks[9], L, D, D), "bo2": w(ks[10], L, 1, D, scale=0.1),
        "w1": w(ks[11], L, D, F), "b1": w(ks[12], L, 1, F, scale=0.1),
        "w2": w(ks[13], L, F, D), "b2": w(ks[14], L, 1, D, scale=0.1),
    }
    norm = jnp.stack(
        [1.0 + 0.1 * jax.random.normal(ks[17], (D,), jnp.float32),
         0.1 * jax.random.normal(ks[18], (D,), jnp.float32)], axis=0)
    return {
        "embed": jax.random.normal(ks[0], (vocab_size, D), jnp.float32),
        "pe": make_pos_encoding(D, max_len),
        "norm": norm,
        "stack": stack,
    }


# ----------------------------------------------------------------------------
# Pure-JAX reference of the torch module (for in-script self-check)
# ----------------------------------------------------------------------------

def reference_forward(params, trg, e_out, src_mask, trg_mask, g_mask2,
                      *, d_model, n_heads, num_layers):
    B, T = trg.shape
    H = n_heads
    dh = d_model // H
    st = params["stack"]

    def ln(x, a, b):
        mean = x.mean(-1, keepdims=True)
        xc = x - mean
        std = jnp.sqrt((xc * xc).sum(-1, keepdims=True) / (x.shape[-1] - 1))
        return a * xc / (std + 1e-7) + b

    def mha(xq, xkv, wq, bq, wk, bk, wv, bv, wo, bo, mask, g):
        q = (xq @ wq + bq).reshape(B, H, -1, dh)
        k = (xkv @ wk + bk).reshape(B, H, -1, dh)
        v = (xkv @ wv + bv).reshape(B, H, -1, dh)
        s = jnp.einsum("bhqd,bhkd->bhqk", q, k) / math.sqrt(dh)
        s = jnp.where(mask[:, None] == 0, -50000.0, s)
        if g is not None:
            s = s + g
        p = jax.nn.softmax(s, axis=-1)
        o = jnp.einsum("bhqk,bhkd->bhqd", p, v).reshape(B, -1, d_model)
        return o @ wo + bo

    x = params["embed"][trg] + params["pe"][:T][None]
    for l in range(num_layers):
        lnp = st["ln"][l]
        wqkv, bqkv = st["wqkv"][l], st["bqkv"][l][0]
        x1 = ln(x, lnp[0], lnp[1])
        x = x + mha(x1, x1,
                    wqkv[:, :d_model], bqkv[:d_model],
                    wqkv[:, d_model:2 * d_model], bqkv[d_model:2 * d_model],
                    wqkv[:, 2 * d_model:], bqkv[2 * d_model:],
                    st["wo1"][l], st["bo1"][l][0], trg_mask, g_mask2)
        x1 = ln(x, lnp[2], lnp[3])
        wkv, bkv = st["wkvc"][l], st["bkvc"][l][0]
        x = x + mha(x1, e_out,
                    st["wqc"][l], st["bqc"][l][0],
                    wkv[:, :d_model], bkv[:d_model],
                    wkv[:, d_model:], bkv[d_model:],
                    st["wo2"][l], st["bo2"][l][0], src_mask, None)
        x1 = ln(x, lnp[4], lnp[5])
        hidden = jnp.maximum(x1 @ st["w1"][l] + st["b1"][l][0], 0.0)
        x = x + hidden @ st["w2"][l] + st["b2"][l][0]
    return ln(x, params["norm"][0], params["norm"][1])


# ----------------------------------------------------------------------------
# Main
# ----------------------------------------------------------------------------

if __name__ == "__main__":
    B, T, S = 2, 8, 12
    vocab_size, d_model, ff_dim, n_heads, num_layers, max_len = 50, 32, 64, 4, 2, 16

    key = jax.random.PRNGKey(0)
    k_p, k_trg, k_e, k_g = jax.random.split(key, 4)

    params = init_params(k_p, vocab_size, d_model, ff_dim, num_layers, max_len)

    trg = jax.random.randint(k_trg, (B, T), 0, vocab_size)
    e_out = jax.random.normal(k_e, (B, S, d_model), jnp.float32)
    trg_mask = jnp.broadcast_to(jnp.tril(jnp.ones((T, T), jnp.int32))[None],
                                (B, T, T))
    src_mask = jnp.concatenate(
        [jnp.ones((B, 1, S - 2), jnp.int32), jnp.zeros((B, 1, 2), jnp.int32)],
        axis=-1)
    g_mask2 = 0.1 * jax.random.normal(k_g, (T, T), jnp.float32)

    fwd = jax.jit(functools.partial(decoder_block_forward, d_model=d_model,
                                    n_heads=n_heads, num_layers=num_layers))
    out = fwd(params, trg, e_out, src_mask, trg_mask, g_mask2)
    jax.block_until_ready(out)

    # Self-check against a plain-JAX f32 implementation of the torch module.
    # The kernel uses bf16 MXU operands (per perf review), so the check is a
    # relative-L2 / loose max-abs bound: catches layout/mask/fold bugs while
    # tolerating bf16 + approx-reciprocal rounding.
    with jax.default_matmul_precision("float32"):
        ref = reference_forward(params, trg, e_out, src_mask, trg_mask, g_mask2,
                                d_model=d_model, n_heads=n_heads,
                                num_layers=num_layers)

    assert out.shape == (B, T, d_model)
    assert bool(jnp.all(jnp.isfinite(out)))
    rel_l2 = float(jnp.linalg.norm(out - ref) / jnp.linalg.norm(ref))
    max_abs = float(jnp.max(jnp.abs(out - ref)))
    assert rel_l2 < 0.10, (rel_l2, max_abs)
    assert max_abs < 0.35, (rel_l2, max_abs)
    print("KERNEL_OK")
</pallas_src>

<mosaic_0001>
module attributes {stable_mosaic.version = 11 : i64} {
  func.func @_decoder_block_kernel(%arg0: i32, %arg1: i32, %arg2: memref<1x8x32xf32, #tpu.memory_space<vmem>>, %arg3: memref<1x12x32xbf16, #tpu.memory_space<vmem>>, %arg4: memref<1x8x8xf32, #tpu.memory_space<vmem>>, %arg5: memref<1x1x12xf32, #tpu.memory_space<vmem>>, %arg6: memref<2x32xf32, #tpu.memory_space<vmem>>, %arg7: memref<1x32x96xbf16, #tpu.memory_space<vmem>>, %arg8: memref<1x1x96xf32, #tpu.memory_space<vmem>>, %arg9: memref<1x32x32xbf16, #tpu.memory_space<vmem>>, %arg10: memref<1x1x32xf32, #tpu.memory_space<vmem>>, %arg11: memref<1x32x32xbf16, #tpu.memory_space<vmem>>, %arg12: memref<1x1x32xf32, #tpu.memory_space<vmem>>, %arg13: memref<1x32x64xbf16, #tpu.memory_space<vmem>>, %arg14: memref<1x1x64xf32, #tpu.memory_space<vmem>>, %arg15: memref<1x32x32xbf16, #tpu.memory_space<vmem>>, %arg16: memref<1x1x32xf32, #tpu.memory_space<vmem>>, %arg17: memref<1x32x64xbf16, #tpu.memory_space<vmem>>, %arg18: memref<1x1x64xf32, #tpu.memory_space<vmem>>, %arg19: memref<1x64x32xbf16, #tpu.memory_space<vmem>>, %arg20: memref<1x1x32xf32, #tpu.memory_space<vmem>>, %arg21: memref<1x8x32xf32, #tpu.memory_space<vmem>>, %arg22: memref<8x32xf32, #tpu.memory_space<vmem>>, %arg23: memref<8x32xf32, #tpu.memory_space<vmem>>, %arg24: memref<8x8xf32, #tpu.memory_space<vmem>>, %arg25: memref<12x8xf32, #tpu.memory_space<vmem>>, %arg26: memref<12x8xf32, #tpu.memory_space<vmem>>) attributes {dimension_semantics = [#tpu.dimension_semantics<parallel>, #tpu.dimension_semantics<arbitrary>], iteration_bounds = array<i64: 2, 2>, scalar_prefetch = 0 : i64, scratch_operands = 5 : i64, tpu.core_type = #tpu.core_type<tc>, window_params = [{transform_indices = @transform_0, window_bounds = array<i64: 1, 8, 32>}, {transform_indices = @transform_1, window_bounds = array<i64: 1, 12, 32>}, {transform_indices = @transform_2, window_bounds = array<i64: 1, 8, 8>}, {transform_indices = @transform_3, window_bounds = array<i64: 1, 1, 12>}, {pipeline_mode = #tpu.pipeline_mode<synchronous>, transform_indices = @transform_4, window_bounds = array<i64: 2, 32>}, {transform_indices = @transform_5, window_bounds = array<i64: 1, 32, 96>}, {transform_indices = @transform_6, window_bounds = array<i64: 1, 1, 96>}, {transform_indices = @transform_7, window_bounds = array<i64: 1, 32, 32>}, {transform_indices = @transform_8, window_bounds = array<i64: 1, 1, 32>}, {transform_indices = @transform_9, window_bounds = array<i64: 1, 32, 32>}, {transform_indices = @transform_10, window_bounds = array<i64: 1, 1, 32>}, {transform_indices = @transform_11, window_bounds = array<i64: 1, 32, 64>}, {transform_indices = @transform_12, window_bounds = array<i64: 1, 1, 64>}, {transform_indices = @transform_13, window_bounds = array<i64: 1, 32, 32>}, {transform_indices = @transform_14, window_bounds = array<i64: 1, 1, 32>}, {transform_indices = @transform_15, window_bounds = array<i64: 1, 32, 64>}, {transform_indices = @transform_16, window_bounds = array<i64: 1, 1, 64>}, {transform_indices = @transform_17, window_bounds = array<i64: 1, 64, 32>}, {transform_indices = @transform_18, window_bounds = array<i64: 1, 1, 32>}, {transform_indices = @transform_19, window_bounds = array<i64: 1, 8, 32>}]} {
    %c0_i32 = arith.constant 0 : i32
    %0 = arith.cmpi eq, %arg1, %c0_i32 : i32
    %1 = arith.extui %0 : i1 to i32
    %c0_i32_0 = arith.constant 0 : i32
    %2 = arith.cmpi ne, %1, %c0_i32_0 : i32
    scf.if %2 {
      %c0_418 = arith.constant 0 : index
      %c0_419 = arith.constant 0 : index
      %c0_420 = arith.constant 0 : index
      %555 = vector.load %arg2[%c0_418, %c0_419, %c0_420] : memref<1x8x32xf32, #tpu.memory_space<vmem>>, vector<1x8x32xf32>
      %556 = vector.shape_cast %555 : vector<1x8x32xf32> to vector<8x32xf32>
      %c0_421 = arith.constant 0 : index
      %c0_422 = arith.constant 0 : index
      %557 = vector.load %arg22[%c0_421, %c0_422] : memref<8x32xf32, #tpu.memory_space<vmem>>, vector<8x32xf32>
      tpu.vector_store %arg22[%c0_421, %c0_422], %556 {strides = array<i32>} : memref<8x32xf32, #tpu.memory_space<vmem>>, vector<8x32xf32>,
    } else {
    }
    %c0 = arith.constant 0 : index
    %c0_1 = arith.constant 0 : index
    %3 = vector.load %arg22[%c0, %c0_1] : memref<8x32xf32, #tpu.memory_space<vmem>>, vector<8x32xf32>
    %cst = arith.constant dense<0.000000e+00> : vector<8xf32>
    %4 = vector.multi_reduction <add>, %3, %cst [1] : vector<8x32xf32> to vector<8xf32>
    %5 = vector.shape_cast %4 : vector<8xf32> to vector<8x1xf32>
    %cst_2 = arith.constant 3.200000e+01 : f32
    %6 = vector.broadcast %cst_2 : f32 to vector<8x1xf32>
    %7 = arith.divf %5, %6 : vector<8x1xf32>
    %8 = vector.broadcast %7 : vector<8x1xf32> to vector<8x32xf32>
    %9 = arith.subf %3, %8 : vector<8x32xf32>
    %10 = arith.mulf %9, %9 : vector<8x32xf32>
    %cst_3 = arith.constant dense<0.000000e+00> : vector<8xf32>
    %11 = vector.multi_reduction <add>, %10, %cst_3 [1] : vector<8x32xf32> to vector<8xf32>
    %12 = vector.shape_cast %11 : vector<8xf32> to vector<8x1xf32>
    %cst_4 = arith.constant 3.100000e+01 : f32
    %13 = vector.broadcast %cst_4 : f32 to vector<8x1xf32>
    %14 = arith.divf %12, %13 : vector<8x1xf32>
    %15 = math.sqrt %14 : vector<8x1xf32>
    %cst_5 = arith.constant 1.000000e-07 : f32
    %16 = vector.broadcast %cst_5 : f32 to vector<8x1xf32>
    %17 = arith.addf %15, %16 : vector<8x1xf32>
    %18 = tpu.reciprocal %17 {approx = true} : vector<8x1xf32> -> vector<8x1xf32>
    %19 = vector.broadcast %18 : vector<8x1xf32> to vector<8x32xf32>
    %20 = arith.mulf %9, %19 : vector<8x32xf32>
    %c0_6 = arith.constant 0 : index
    %c0_7 = arith.constant 0 : index
    %c0_8 = arith.constant 0 : index
    %21 = vector.load %arg7[%c0_6, %c0_7, %c0_8] : memref<1x32x96xbf16, #tpu.memory_space<vmem>>, vector<1x32x96xbf16>
    %22 = vector.shape_cast %21 : vector<1x32x96xbf16> to vector<32x96xbf16>
    %23 = arith.truncf %20 : vector<8x32xf32> to vector<8x32xbf16>
    %cst_9 = arith.constant dense<0.000000e+00> : vector<8x96xf32>
    %24 = tpu.matmul %23, %22, %cst_9 {dimension_numbers = #tpu.dot_dimension_numbers<[1], [0], [0], [1], [0, 0, 1, 1], [], []>} : vector<8x32xbf16>, vector<32x96xbf16>, vector<8x96xf32> -> vector<8x96xf32>
    %c0_10 = arith.constant 0 : index
    %c0_11 = arith.constant 0 : index
    %c0_12 = arith.constant 0 : index
    %25 = vector.load %arg8[%c0_10, %c0_11, %c0_12] : memref<1x1x96xf32, #tpu.memory_space<vmem>>, vector<1x1x96xf32>
    %26 = vector.shape_cast %25 : vector<1x1x96xf32> to vector<1x96xf32>
    %27 = vector.broadcast %26 : vector<1x96xf32> to vector<8x96xf32>
    %28 = arith.addf %24, %27 : vector<8x96xf32>
    %c0_13 = arith.constant 0 : index
    %c0_14 = arith.constant 0 : index
    %c0_15 = arith.constant 0 : index
    %29 = vector.load %arg4[%c0_13, %c0_14, %c0_15] : memref<1x8x8xf32, #tpu.memory_space<vmem>>, vector<1x8x8xf32>
    %30 = vector.shape_cast %29 : vector<1x8x8xf32> to vector<8x8xf32>
    %31 = vector.extract_strided_slice %28 {offsets = [0, 0], sizes = [2, 8], strides = [1, 1]} : vector<8x96xf32> to vector<2x8xf32>
    %c0_16 = arith.constant 0 : index
    %c0_17 = arith.constant 0 : index
    %32 = vector.load %arg24[%c0_16, %c0_17] : memref<8x8xf32, #tpu.memory_space<vmem>>, vector<2x8xf32>
    tpu.vector_store %arg24[%c0_16, %c0_17], %31 {strides = array<i32>} : memref<8x8xf32, #tpu.memory_space<vmem>>, vector<2x8xf32>,
    %33 = vector.extract_strided_slice %28 {offsets = [0, 8], sizes = [2, 8], strides = [1, 1]} : vector<8x96xf32> to vector<2x8xf32>
    %c2 = arith.constant 2 : index
    %c0_18 = arith.constant 0 : index
    %34 = vector.load %arg24[%c2, %c0_18] : memref<8x8xf32, #tpu.memory_space<vmem>>, vector<2x8xf32>
    tpu.vector_store %arg24[%c2, %c0_18], %33 {strides = array<i32>} : memref<8x8xf32, #tpu.memory_space<vmem>>, vector<2x8xf32>,
    %35 = vector.extract_strided_slice %28 {offsets = [0, 16], sizes = [2, 8], strides = [1, 1]} : vector<8x96xf32> to vector<2x8xf32>
    %c4 = arith.constant 4 : index
    %c0_19 = arith.constant 0 : index
    %36 = vector.load %arg24[%c4, %c0_19] : memref<8x8xf32, #tpu.memory_space<vmem>>, vector<2x8xf32>
    tpu.vector_store %arg24[%c4, %c0_19], %35 {strides = array<i32>} : memref<8x8xf32, #tpu.memory_space<vmem>>, vector<2x8xf32>,
    %37 = vector.extract_strided_slice %28 {offsets = [0, 24], sizes = [2, 8], strides = [1, 1]} : vector<8x96xf32> to vector<2x8xf32>
    %c6 = arith.constant 6 : index
    %c0_20 = arith.constant 0 : index
    %38 = vector.load %arg24[%c6, %c0_20] : memref<8x8xf32, #tpu.memory_space<vmem>>, vector<2x8xf32>
    tpu.vector_store %arg24[%c6, %c0_20], %37 {strides = array<i32>} : memref<8x8xf32, #tpu.memory_space<vmem>>, vector<2x8xf32>,
    %39 = vector.extract_strided_slice %28 {offsets = [0, 32], sizes = [2, 8], strides = [1, 1]} : vector<8x96xf32> to vector<2x8xf32>
    %c0_21 = arith.constant 0 : index
    %c0_22 = arith.constant 0 : index
    %40 = vector.load %arg25[%c0_21, %c0_22] : memref<12x8xf32, #tpu.memory_space<vmem>>, vector<2x8xf32>
    tpu.vector_store %arg25[%c0_21, %c0_22], %39 {strides = array<i32>} : memref<12x8xf32, #tpu.memory_space<vmem>>, vector<2x8xf32>,
    %41 = vector.extract_strided_slice %28 {offsets = [0, 64], sizes = [2, 8], strides = [1, 1]} : vector<8x96xf32> to vector<2x8xf32>
    %c0_23 = arith.constant 0 : index
    %c0_24 = arith.constant 0 : index
    %42 = vector.load %arg26[%c0_23, %c0_24] : memref<12x8xf32, #tpu.memory_space<vmem>>, vector<2x8xf32>
    tpu.vector_store %arg26[%c0_23, %c0_24], %41 {strides = array<i32>} : memref<12x8xf32, #tpu.memory_space<vmem>>, vector<2x8xf32>,
    %43 = vector.extract_strided_slice %28 {offsets = [0, 40], sizes = [2, 8], strides = [1, 1]} : vector<8x96xf32> to vector<2x8xf32>
    %c2_25 = arith.constant 2 : index
    %c0_26 = arith.constant 0 : index
    %44 = vector.load %arg25[%c2_25, %c0_26] : memref<12x8xf32, #tpu.memory_space<vmem>>, vector<2x8xf32>
    tpu.vector_store %arg25[%c2_25, %c0_26], %43 {strides = array<i32>} : memref<12x8xf32, #tpu.memory_space<vmem>>, vector<2x8xf32>,
    %45 = vector.extract_strided_slice %28 {offsets = [0, 72], sizes = [2, 8], strides = [1, 1]} : vector<8x96xf32> to vector<2x8xf32>
    %c2_27 = arith.constant 2 : index
    %c0_28 = arith.constant 0 : index
    %46 = vector.load %arg26[%c2_27, %c0_28] : memref<12x8xf32, #tpu.memory_space<vmem>>, vector<2x8xf32>
    tpu.vector_store %arg26[%c2_27, %c0_28], %45 {strides = array<i32>} : memref<12x8xf32, #tpu.memory_space<vmem>>, vector<2x8xf32>,
    %47 = vector.extract_strided_slice %28 {offsets = [0, 48], sizes = [2, 8], strides = [1, 1]} : vector<8x96xf32> to vector<2x8xf32>
    %c4_29 = arith.constant 4 : index
    %c0_30 = arith.constant 0 : index
    %48 = vector.load %arg25[%c4_29, %c0_30] : memref<12x8xf32, #tpu.memory_space<vmem>>, vector<2x8xf32>
    tpu.vector_store %arg25[%c4_29, %c0_30], %47 {strides = array<i32>} : memref<12x8xf32, #tpu.memory_space<vmem>>, vector<2x8xf32>,
    %49 = vector.extract_strided_slice %28 {offsets = [0, 80], sizes = [2, 8], strides = [1, 1]} : vector<8x96xf32> to vector<2x8xf32>
    %c4_31 = arith.constant 4 : index
    %c0_32 = arith.constant 0 : index
    %50 = vector.load %arg26[%c4_31, %c0_32] : memref<12x8xf32, #tpu.memory_space<vmem>>, vector<2x8xf32>
    tpu.vector_store %arg26[%c4_31, %c0_32], %49 {strides = array<i32>} : memref<12x8xf32, #tpu.memory_space<vmem>>, vector<2x8xf32>,
    %51 = vector.extract_strided_slice %28 {offsets = [0, 56], sizes = [2, 8], strides = [1, 1]} : vector<8x96xf32> to vector<2x8xf32>
    %c6_33 = arith.constant 6 : index
    %c0_34 = arith.constant 0 : index
    %52 = vector.load %arg25[%c6_33, %c0_34] : memref<12x8xf32, #tpu.memory_space<vmem>>, vector<2x8xf32>
    tpu.vector_store %arg25[%c6_33, %c0_34], %51 {strides = array<i32>} : memref<12x8xf32, #tpu.memory_space<vmem>>, vector<2x8xf32>,
    %53 = vector.extract_strided_slice %28 {offsets = [0, 88], sizes = [2, 8], strides = [1, 1]} : vector<8x96xf32> to vector<2x8xf32>
    %c6_35 = arith.constant 6 : index
    %c0_36 = arith.constant 0 : index
    %54 = vector.load %arg26[%c6_35, %c0_36] : memref<12x8xf32, #tpu.memory_space<vmem>>, vector<2x8xf32>
    tpu.vector_store %arg26[%c6_35, %c0_36], %53 {strides = array<i32>} : memref<12x8xf32, #tpu.memory_space<vmem>>, vector<2x8xf32>,
    %c0_37 = arith.constant 0 : index
    %c0_38 = arith.constant 0 : index
    %55 = vector.load %arg24[%c0_37, %c0_38] : memref<8x8xf32, #tpu.memory_space<vmem>>, vector<8x8xf32>
    %c0_39 = arith.constant 0 : index
    %c0_40 = arith.constant 0 : index
    %56 = vector.load %arg25[%c0_39, %c0_40] : memref<12x8xf32, #tpu.memory_space<vmem>>, vector<8x8xf32>
    %57 = arith.truncf %55 : vector<8x8xf32> to vector<8x8xbf16>
    %58 = arith.truncf %56 : vector<8x8xf32> to vector<8x8xbf16>
    %cst_41 = arith.constant dense<0.000000e+00> : vector<8x8xf32>
    %59 = tpu.matmul %57, %58, %cst_41 {dimension_numbers = #tpu.dot_dimension_numbers<[1], [1], [0], [0], [0, 0, 1, 0], [], []>} : vector<8x8xbf16>, vector<8x8xbf16>, vector<8x8xf32> -> vector<8x8xf32>
    %cst_42 = arith.constant 0.353553385 : f32
    %60 = vector.broadcast %cst_42 : f32 to vector<8x8xf32>
    %61 = arith.mulf %59, %60 : vector<8x8xf32>
    %62 = arith.addf %61, %30 : vector<8x8xf32>
    %cst_43 = arith.constant dense<0xFF800000> : vector<8xf32>
    %63 = vector.multi_reduction <maximumf>, %62, %cst_43 [1] : vector<8x8xf32> to vector<8xf32>
    %64 = vector.shape_cast %63 : vector<8xf32> to vector<8x1xf32>
    %65 = vector.broadcast %64 : vector<8x1xf32> to vector<8x8xf32>
    %66 = arith.subf %62, %65 : vector<8x8xf32>
    %67 = math.exp %66 : vector<8x8xf32>
    %cst_44 = arith.constant dense<0.000000e+00> : vector<8xf32>
    %68 = vector.multi_reduction <add>, %67, %cst_44 [1] : vector<8x8xf32> to vector<8xf32>
    %69 = vector.shape_cast %68 : vector<8xf32> to vector<8x1xf32>
    %70 = vector.broadcast %69 : vector<8x1xf32> to vector<8x8xf32>
    %71 = arith.divf %67, %70 : vector<8x8xf32>
    %c0_45 = arith.constant 0 : index
    %c0_46 = arith.constant 0 : index
    %72 = vector.load %arg26[%c0_45, %c0_46] : memref<12x8xf32, #tpu.memory_space<vmem>>, vector<8x8xf32>
    %73 = arith.truncf %71 : vector<8x8xf32> to vector<8x8xbf16>
    %74 = arith.truncf %72 : vector<8x8xf32> to vector<8x8xbf16>
    %cst_47 = arith.constant dense<0.000000e+00> : vector<8x8xf32>
    %75 = tpu.matmul %73, %74, %cst_47 {dimension_numbers = #tpu.dot_dimension_numbers<[1], [0], [0], [1], [0, 0, 1, 1], [], []>} : vector<8x8xbf16>, vector<8x8xbf16>, vector<8x8xf32> -> vector<8x8xf32>
    %76 = vector.extract_strided_slice %75 {offsets = [0, 0], sizes = [2, 8], strides = [1, 1]} : vector<8x8xf32> to vector<2x8xf32>
    %c0_48 = arith.constant 0 : index
    %c0_49 = arith.constant 0 : index
    %77 = vector.load %arg23[%c0_48, %c0_49] : memref<8x32xf32, #tpu.memory_space<vmem>>, vector<2x8xf32>
    tpu.vector_store %arg23[%c0_48, %c0_49], %76 {strides = array<i32>} : memref<8x32xf32, #tpu.memory_space<vmem>>, vector<2x8xf32>,
    %78 = vector.extract_strided_slice %75 {offsets = [2, 0], sizes = [2, 8], strides = [1, 1]} : vector<8x8xf32> to vector<2x8xf32>
    %c0_50 = arith.constant 0 : index
    %c8 = arith.constant 8 : index
    %79 = vector.load %arg23[%c0_50, %c8] : memref<8x32xf32, #tpu.memory_space<vmem>>, vector<2x8xf32>
    tpu.vector_store %arg23[%c0_50, %c8], %78 {strides = array<i32>} : memref<8x32xf32, #tpu.memory_space<vmem>>, vector<2x8xf32>,
    %80 = vector.extract_strided_slice %75 {offsets = [4, 0], sizes = [2, 8], strides = [1, 1]} : vector<8x8xf32> to vector<2x8xf32>
    %c0_51 = arith.constant 0 : index
    %c16 = arith.constant 16 : index
    %81 = vector.load %arg23[%c0_51, %c16] : memref<8x32xf32, #tpu.memory_space<vmem>>, vector<2x8xf32>
    tpu.vector_store %arg23[%c0_51, %c16], %80 {strides = array<i32>} : memref<8x32xf32, #tpu.memory_space<vmem>>, vector<2x8xf32>,
    %82 = vector.extract_strided_slice %75 {offsets = [6, 0], sizes = [2, 8], strides = [1, 1]} : vector<8x8xf32> to vector<2x8xf32>
    %c0_52 = arith.constant 0 : index
    %c24 = arith.constant 24 : index
    %83 = vector.load %arg23[%c0_52, %c24] : memref<8x32xf32, #tpu.memory_space<vmem>>, vector<2x8xf32>
    tpu.vector_store %arg23[%c0_52, %c24], %82 {strides = array<i32>} : memref<8x32xf32, #tpu.memory_space<vmem>>, vector<2x8xf32>,
    %84 = vector.extract_strided_slice %28 {offsets = [2, 0], sizes = [2, 8], strides = [1, 1]} : vector<8x96xf32> to vector<2x8xf32>
    %c0_53 = arith.constant 0 : index
    %c0_54 = arith.constant 0 : index
    %85 = vector.load %arg24[%c0_53, %c0_54] : memref<8x8xf32, #tpu.memory_space<vmem>>, vector<2x8xf32>
    tpu.vector_store %arg24[%c0_53, %c0_54], %84 {strides = array<i32>} : memref<8x8xf32, #tpu.memory_space<vmem>>, vector<2x8xf32>,
    %86 = vector.extract_strided_slice %28 {offsets = [2, 8], sizes = [2, 8], strides = [1, 1]} : vector<8x96xf32> to vector<2x8xf32>
    %c2_55 = arith.constant 2 : index
    %c0_56 = arith.constant 0 : index
    %87 = vector.load %arg24[%c2_55, %c0_56] : memref<8x8xf32, #tpu.memory_space<vmem>>, vector<2x8xf32>
    tpu.vector_store %arg24[%c2_55, %c0_56], %86 {strides = array<i32>} : memref<8x8xf32, #tpu.memory_space<vmem>>, vector<2x8xf32>,
    %88 = vector.extract_strided_slice %28 {offsets = [2, 16], sizes = [2, 8], strides = [1, 1]} : vector<8x96xf32> to vector<2x8xf32>
    %c4_57 = arith.constant 4 : index
    %c0_58 = arith.constant 0 : index
    %89 = vector.load %arg24[%c4_57, %c0_58] : memref<8x8xf32, #tpu.memory_space<vmem>>, vector<2x8xf32>
    tpu.vector_store %arg24[%c4_57, %c0_58], %88 {strides = array<i32>} : memref<8x8xf32, #tpu.memory_space<vmem>>, vector<2x8xf32>,
    %90 = vector.extract_strided_slice %28 {offsets = [2, 24], sizes = [2, 8], strides = [1, 1]} : vector<8x96xf32> to vector<2x8xf32>
    %c6_59 = arith.constant 6 : index
    %c0_60 = arith.constant 0 : index
    %91 = vector.load %arg24[%c6_59, %c0_60] : memref<8x8xf32, #tpu.memory_space<vmem>>, vector<2x8xf32>
    tpu.vector_store %arg24[%c6_59, %c0_60], %90 {strides = array<i32>} : memref<8x8xf32, #tpu.memory_space<vmem>>, vector<2x8xf32>,
    %92 = vector.extract_strided_slice %28 {offsets = [2, 32], sizes = [2, 8], strides = [1, 1]} : vector<8x96xf32> to vector<2x8xf32>
    %c0_61 = arith.constant 0 : index
    %c0_62 = arith.constant 0 : index
    %93 = vector.load %arg25[%c0_61, %c0_62] : memref<12x8xf32, #tpu.memory_space<vmem>>, vector<2x8xf32>
    tpu.vector_store %arg25[%c0_61, %c0_62], %92 {strides = array<i32>} : memref<12x8xf32, #tpu.memory_space<vmem>>, vector<2x8xf32>,
    %94 = vector.extract_strided_slice %28 {offsets = [2, 64], sizes = [2, 8], strides = [1, 1]} : vector<8x96xf32> to vector<2x8xf32>
    %c0_63 = arith.constant 0 : index
    %c0_64 = arith.constant 0 : index
    %95 = vector.load %arg26[%c0_63, %c0_64] : memref<12x8xf32, #tpu.memory_space<vmem>>, vector<2x8xf32>
    tpu.vector_store %arg26[%c0_63, %c0_64], %94 {strides = array<i32>} : memref<12x8xf32, #tpu.memory_space<vmem>>, vector<2x8xf32>,
    %96 = vector.extract_strided_slice %28 {offsets = [2, 40], sizes = [2, 8], strides = [1, 1]} : vector<8x96xf32> to vector<2x8xf32>
    %c2_65 = arith.constant 2 : index
    %c0_66 = arith.constant 0 : index
    %97 = vector.load %arg25[%c2_65, %c0_66] : memref<12x8xf32, #tpu.memory_space<vmem>>, vector<2x8xf32>
    tpu.vector_store %arg25[%c2_65, %c0_66], %96 {strides = array<i32>} : memref<12x8xf32, #tpu.memory_space<vmem>>, vector<2x8xf32>,
    %98 = vector.extract_strided_slice %28 {offsets = [2, 72], sizes = [2, 8], strides = [1, 1]} : vector<8x96xf32> to vector<2x8xf32>
    %c2_67 = arith.constant 2 : index
    %c0_68 = arith.constant 0 : index
    %99 = vector.load %arg26[%c2_67, %c0_68] : memref<12x8xf32, #tpu.memory_space<vmem>>, vector<2x8xf32>
    tpu.vector_store %arg26[%c2_67, %c0_68], %98 {strides = array<i32>} : memref<12x8xf32, #tpu.memory_space<vmem>>, vector<2x8xf32>,
    %100 = vector.extract_strided_slice %28 {offsets = [2, 48], sizes = [2, 8], strides = [1, 1]} : vector<8x96xf32> to vector<2x8xf32>
    %c4_69 = arith.constant 4 : index
    %c0_70 = arith.constant 0 : index
    %101 = vector.load %arg25[%c4_69, %c0_70] : memref<12x8xf32, #tpu.memory_space<vmem>>, vector<2x8xf32>
    tpu.vector_store %arg25[%c4_69, %c0_70], %100 {strides = array<i32>} : memref<12x8xf32, #tpu.memory_space<vmem>>, vector<2x8xf32>,
    %102 = vector.extract_strided_slice %28 {offsets = [2, 80], sizes = [2, 8], strides = [1, 1]} : vector<8x96xf32> to vector<2x8xf32>
    %c4_71 = arith.constant 4 : index
    %c0_72 = arith.constant 0 : index
    %103 = vector.load %arg26[%c4_71, %c0_72] : memref<12x8xf32, #tpu.memory_space<vmem>>, vector<2x8xf32>
    tpu.vector_store %arg26[%c4_71, %c0_72], %102 {strides = array<i32>} : memref<12x8xf32, #tpu.memory_space<vmem>>, vector<2x8xf32>,
    %104 = vector.extract_strided_slice %28 {offsets = [2, 56], sizes = [2, 8], strides = [1, 1]} : vector<8x96xf32> to vector<2x8xf32>
    %c6_73 = arith.constant 6 : index
    %c0_74 = arith.constant 0 : index
    %105 = vector.load %arg25[%c6_73, %c0_74] : memref<12x8xf32, #tpu.memory_space<vmem>>, vector<2x8xf32>
    tpu.vector_store %arg25[%c6_73, %c0_74], %104 {strides = array<i32>} : memref<12x8xf32, #tpu.memory_space<vmem>>, vector<2x8xf32>,
    %106 = vector.extract_strided_slice %28 {offsets = [2, 88], sizes = [2, 8], strides = [1, 1]} : vector<8x96xf32> to vector<2x8xf32>
    %c6_75 = arith.constant 6 : index
    %c0_76 = arith.constant 0 : index
    %107 = vector.load %arg26[%c6_75, %c0_76] : memref<12x8xf32, #tpu.memory_space<vmem>>, vector<2x8xf32>
    tpu.vector_store %arg26[%c6_75, %c0_76], %106 {strides = array<i32>} : memref<12x8xf32, #tpu.memory_space<vmem>>, vector<2x8xf32>,
    %c0_77 = arith.constant 0 : index
    %c0_78 = arith.constant 0 : index
    %108 = vector.load %arg24[%c0_77, %c0_78] : memref<8x8xf32, #tpu.memory_space<vmem>>, vector<8x8xf32>
    %c0_79 = arith.constant 0 : index
    %c0_80 = arith.constant 0 : index
    %109 = vector.load %arg25[%c0_79, %c0_80] : memref<12x8xf32, #tpu.memory_space<vmem>>, vector<8x8xf32>
    %110 = arith.truncf %108 : vector<8x8xf32> to vector<8x8xbf16>
    %111 = arith.truncf %109 : vector<8x8xf32> to vector<8x8xbf16>
    %cst_81 = arith.constant dense<0.000000e+00> : vector<8x8xf32>
    %112 = tpu.matmul %110, %111, %cst_81 {dimension_numbers = #tpu.dot_dimension_numbers<[1], [1], [0], [0], [0, 0, 1, 0], [], []>} : vector<8x8xbf16>, vector<8x8xbf16>, vector<8x8xf32> -> vector<8x8xf32>
    %cst_82 = arith.constant 0.353553385 : f32
    %113 = vector.broadcast %cst_82 : f32 to vector<8x8xf32>
    %114 = arith.mulf %112, %113 : vector<8x8xf32>
    %115 = arith.addf %114, %30 : vector<8x8xf32>
    %cst_83 = arith.constant dense<0xFF800000> : vector<8xf32>
    %116 = vector.multi_reduction <maximumf>, %115, %cst_83 [1] : vector<8x8xf32> to vector<8xf32>
    %117 = vector.shape_cast %116 : vector<8xf32> to vector<8x1xf32>
    %118 = vector.broadcast %117 : vector<8x1xf32> to vector<8x8xf32>
    %119 = arith.subf %115, %118 : vector<8x8xf32>
    %120 = math.exp %119 : vector<8x8xf32>
    %cst_84 = arith.constant dense<0.000000e+00> : vector<8xf32>
    %121 = vector.multi_reduction <add>, %120, %cst_84 [1] : vector<8x8xf32> to vector<8xf32>
    %122 = vector.shape_cast %121 : vector<8xf32> to vector<8x1xf32>
    %123 = vector.broadcast %122 : vector<8x1xf32> to vector<8x8xf32>
    %124 = arith.divf %120, %123 : vector<8x8xf32>
    %c0_85 = arith.constant 0 : index
    %c0_86 = arith.constant 0 : index
    %125 = vector.load %arg26[%c0_85, %c0_86] : memref<12x8xf32, #tpu.memory_space<vmem>>, vector<8x8xf32>
    %126 = arith.truncf %124 : vector<8x8xf32> to vector<8x8xbf16>
    %127 = arith.truncf %125 : vector<8x8xf32> to vector<8x8xbf16>
    %cst_87 = arith.constant dense<0.000000e+00> : vector<8x8xf32>
    %128 = tpu.matmul %126, %127, %cst_87 {dimension_numbers = #tpu.dot_dimension_numbers<[1], [0], [0], [1], [0, 0, 1, 1], [], []>} : vector<8x8xbf16>, vector<8x8xbf16>, vector<8x8xf32> -> vector<8x8xf32>
    %129 = vector.extract_strided_slice %128 {offsets = [0, 0], sizes = [2, 8], strides = [1, 1]} : vector<8x8xf32> to vector<2x8xf32>
    %c2_88 = arith.constant 2 : index
    %c0_89 = arith.constant 0 : index
    %130 = vector.load %arg23[%c2_88, %c0_89] : memref<8x32xf32, #tpu.memory_space<vmem>>, vector<2x8xf32>
    tpu.vector_store %arg23[%c2_88, %c0_89], %129 {strides = array<i32>} : memref<8x32xf32, #tpu.memory_space<vmem>>, vector<2x8xf32>,
    %131 = vector.extract_strided_slice %128 {offsets = [2, 0], sizes = [2, 8], strides = [1, 1]} : vector<8x8xf32> to vector<2x8xf32>
    %c2_90 = arith.constant 2 : index
    %c8_91 = arith.constant 8 : index
    %132 = vector.load %arg23[%c2_90, %c8_91] : memref<8x32xf32, #tpu.memory_space<vmem>>, vector<2x8xf32>
    tpu.vector_store %arg23[%c2_90, %c8_91], %131 {strides = array<i32>} : memref<8x32xf32, #tpu.memory_space<vmem>>, vector<2x8xf32>,
    %133 = vector.extract_strided_slice %128 {offsets = [4, 0], sizes = [2, 8], strides = [1, 1]} : vector<8x8xf32> to vector<2x8xf32>
    %c2_92 = arith.constant 2 : index
    %c16_93 = arith.constant 16 : index
    %134 = vector.load %arg23[%c2_92, %c16_93] : memref<8x32xf32, #tpu.memory_space<vmem>>, vector<2x8xf32>
    tpu.vector_store %arg23[%c2_92, %c16_93], %133 {strides = array<i32>} : memref<8x32xf32, #tpu.memory_space<vmem>>, vector<2x8xf32>,
    %135 = vector.extract_strided_slice %128 {offsets = [6, 0], sizes = [2, 8], strides = [1, 1]} : vector<8x8xf32> to vector<2x8xf32>
    %c2_94 = arith.constant 2 : index
    %c24_95 = arith.constant 24 : index
    %136 = vector.load %arg23[%c2_94, %c24_95] : memref<8x32xf32, #tpu.memory_space<vmem>>, vector<2x8xf32>
    tpu.vector_store %arg23[%c2_94, %c24_95], %135 {strides = array<i32>} : memref<8x32xf32, #tpu.memory_space<vmem>>, vector<2x8xf32>,
    %137 = vector.extract_strided_slice %28 {offsets = [4, 0], sizes = [2, 8], strides = [1, 1]} : vector<8x96xf32> to vector<2x8xf32>
    %c0_96 = arith.constant 0 : index
    %c0_97 = arith.constant 0 : index
    %138 = vector.load %arg24[%c0_96, %c0_97] : memref<8x8xf32, #tpu.memory_space<vmem>>, vector<2x8xf32>
    tpu.vector_store %arg24[%c0_96, %c0_97], %137 {strides = array<i32>} : memref<8x8xf32, #tpu.memory_space<vmem>>, vector<2x8xf32>,
    %139 = vector.extract_strided_slice %28 {offsets = [4, 8], sizes = [2, 8], strides = [1, 1]} : vector<8x96xf32> to vector<2x8xf32>
    %c2_98 = arith.constant 2 : index
    %c0_99 = arith.constant 0 : index
    %140 = vector.load %arg24[%c2_98, %c0_99] : memref<8x8xf32, #tpu.memory_space<vmem>>, vector<2x8xf32>
    tpu.vector_store %arg24[%c2_98, %c0_99], %139 {strides = array<i32>} : memref<8x8xf32, #tpu.memory_space<vmem>>, vector<2x8xf32>,
    %141 = vector.extract_strided_slice %28 {offsets = [4, 16], sizes = [2, 8], strides = [1, 1]} : vector<8x96xf32> to vector<2x8xf32>
    %c4_100 = arith.constant 4 : index
    %c0_101 = arith.constant 0 : index
    %142 = vector.load %arg24[%c4_100, %c0_101] : memref<8x8xf32, #tpu.memory_space<vmem>>, vector<2x8xf32>
    tpu.vector_store %arg24[%c4_100, %c0_101], %141 {strides = array<i32>} : memref<8x8xf32, #tpu.memory_space<vmem>>, vector<2x8xf32>,
    %143 = vector.extract_strided_slice %28 {offsets = [4, 24], sizes = [2, 8], strides = [1, 1]} : vector<8x96xf32> to vector<2x8xf32>
    %c6_102 = arith.constant 6 : index
    %c0_103 = arith.constant 0 : index
    %144 = vector.load %arg24[%c6_102, %c0_103] : memref<8x8xf32, #tpu.memory_space<vmem>>, vector<2x8xf32>
    tpu.vector_store %arg24[%c6_102, %c0_103], %143 {strides = array<i32>} : memref<8x8xf32, #tpu.memory_space<vmem>>, vector<2x8xf32>,
    %145 = vector.extract_strided_slice %28 {offsets = [4, 32], sizes = [2, 8], strides = [1, 1]} : vector<8x96xf32> to vector<2x8xf32>
    %c0_104 = arith.constant 0 : index
    %c0_105 = arith.constant 0 : index
    %146 = vector.load %arg25[%c0_104, %c0_105] : memref<12x8xf32, #tpu.memory_space<vmem>>, vector<2x8xf32>
    tpu.vector_store %arg25[%c0_104, %c0_105], %145 {strides = array<i32>} : memref<12x8xf32, #tpu.memory_space<vmem>>, vector<2x8xf32>,
    %147 = vector.extract_strided_slice %28 {offsets = [4, 64], sizes = [2, 8], strides = [1, 1]} : vector<8x96xf32> to vector<2x8xf32>
    %c0_106 = arith.constant 0 : index
    %c0_107 = arith.constant 0 : index
    %148 = vector.load %arg26[%c0_106, %c0_107] : memref<12x8xf32, #tpu.memory_space<vmem>>, vector<2x8xf32>
    tpu.vector_store %arg26[%c0_106, %c0_107], %147 {strides = array<i32>} : memref<12x8xf32, #tpu.memory_space<vmem>>, vector<2x8xf32>,
    %149 = vector.extract_strided_slice %28 {offsets = [4, 40], sizes = [2, 8], strides = [1, 1]} : vector<8x96xf32> to vector<2x8xf32>
    %c2_108 = arith.constant 2 : index
    %c0_109 = arith.constant 0 : index
    %150 = vector.load %arg25[%c2_108, %c0_109] : memref<12x8xf32, #tpu.memory_space<vmem>>, vector<2x8xf32>
    tpu.vector_store %arg25[%c2_108, %c0_109], %149 {strides = array<i32>} : memref<12x8xf32, #tpu.memory_space<vmem>>, vector<2x8xf32>,
    %151 = vector.extract_strided_slice %28 {offsets = [4, 72], sizes = [2, 8], strides = [1, 1]} : vector<8x96xf32> to vector<2x8xf32>
    %c2_110 = arith.constant 2 : index
    %c0_111 = arith.constant 0 : index
    %152 = vector.load %arg26[%c2_110, %c0_111] : memref<12x8xf32, #tpu.memory_space<vmem>>, vector<2x8xf32>
    tpu.vector_store %arg26[%c2_110, %c0_111], %151 {strides = array<i32>} : memref<12x8xf32, #tpu.memory_space<vmem>>, vector<2x8xf32>,
    %153 = vector.extract_strided_slice %28 {offsets = [4, 48], sizes = [2, 8], strides = [1, 1]} : vector<8x96xf32> to vector<2x8xf32>
    %c4_112 = arith.constant 4 : index
    %c0_113 = arith.constant 0 : index
    %154 = vector.load %arg25[%c4_112, %c0_113] : memref<12x8xf32, #tpu.memory_space<vmem>>, vector<2x8xf32>
    tpu.vector_store %arg25[%c4_112, %c0_113], %153 {strides = array<i32>} : memref<12x8xf32, #tpu.memory_space<vmem>>, vector<2x8xf32>,
    %155 = vector.extract_strided_slice %28 {offsets = [4, 80], sizes = [2, 8], strides = [1, 1]} : vector<8x96xf32> to vector<2x8xf32>
    %c4_114 = arith.constant 4 : index
    %c0_115 = arith.constant 0 : index
    %156 = vector.load %arg26[%c4_114, %c0_115] : memref<12x8xf32, #tpu.memory_space<vmem>>, vector<2x8xf32>
    tpu.vector_store %arg26[%c4_114, %c0_115], %155 {strides = array<i32>} : memref<12x8xf32, #tpu.memory_space<vmem>>, vector<2x8xf32>,
    %157 = vector.extract_strided_slice %28 {offsets = [4, 56], sizes = [2, 8], strides = [1, 1]} : vector<8x96xf32> to vector<2x8xf32>
    %c6_116 = arith.constant 6 : index
    %c0_117 = arith.constant 0 : index
    %158 = vector.load %arg25[%c6_116, %c0_117] : memref<12x8xf32, #tpu.memory_space<vmem>>, vector<2x8xf32>
    tpu.vector_store %arg25[%c6_116, %c0_117], %157 {strides = array<i32>} : memref<12x8xf32, #tpu.memory_space<vmem>>, vector<2x8xf32>,
    %159 = vector.extract_strided_slice %28 {offsets = [4, 88], sizes = [2, 8], strides = [1, 1]} : vector<8x96xf32> to vector<2x8xf32>
    %c6_118 = arith.constant 6 : index
    %c0_119 = arith.constant 0 : index
    %160 = vector.load %arg26[%c6_118, %c0_119] : memref<12x8xf32, #tpu.memory_space<vmem>>, vector<2x8xf32>
    tpu.vector_store %arg26[%c6_118, %c0_119], %159 {strides = array<i32>} : memref<12x8xf32, #tpu.memory_space<vmem>>, vector<2x8xf32>,
    %c0_120 = arith.constant 0 : index
    %c0_121 = arith.constant 0 : index
    %161 = vector.load %arg24[%c0_120, %c0_121] : memref<8x8xf32, #tpu.memory_space<vmem>>, vector<8x8xf32>
    %c0_122 = arith.constant 0 : index
    %c0_123 = arith.constant 0 : index
    %162 = vector.load %arg25[%c0_122, %c0_123] : memref<12x8xf32, #tpu.memory_space<vmem>>, vector<8x8xf32>
    %163 = arith.truncf %161 : vector<8x8xf32> to vector<8x8xbf16>
    %164 = arith.truncf %162 : vector<8x8xf32> to vector<8x8xbf16>
    %cst_124 = arith.constant dense<0.000000e+00> : vector<8x8xf32>
    %165 = tpu.matmul %163, %164, %cst_124 {dimension_numbers = #tpu.dot_dimension_numbers<[1], [1], [0], [0], [0, 0, 1, 0], [], []>} : vector<8x8xbf16>, vector<8x8xbf16>, vector<8x8xf32> -> vector<8x8xf32>
    %cst_125 = arith.constant 0.353553385 : f32
    %166 = vector.broadcast %cst_125 : f32 to vector<8x8xf32>
    %167 = arith.mulf %165, %166 : vector<8x8xf32>
    %168 = arith.addf %167, %30 : vector<8x8xf32>
    %cst_126 = arith.constant dense<0xFF800000> : vector<8xf32>
    %169 = vector.multi_reduction <maximumf>, %168, %cst_126 [1] : vector<8x8xf32> to vector<8xf32>
    %170 = vector.shape_cast %169 : vector<8xf32> to vector<8x1xf32>
    %171 = vector.broadcast %170 : vector<8x1xf32> to vector<8x8xf32>
    %172 = arith.subf %168, %171 : vector<8x8xf32>
    %173 = math.exp %172 : vector<8x8xf32>
    %cst_127 = arith.constant dense<0.000000e+00> : vector<8xf32>
    %174 = vector.multi_reduction <add>, %173, %cst_127 [1] : vector<8x8xf32> to vector<8xf32>
    %175 = vector.shape_cast %174 : vector<8xf32> to vector<8x1xf32>
    %176 = vector.broadcast %175 : vector<8x1xf32> to vector<8x8xf32>
    %177 = arith.divf %173, %176 : vector<8x8xf32>
    %c0_128 = arith.constant 0 : index
    %c0_129 = arith.constant 0 : index
    %178 = vector.load %arg26[%c0_128, %c0_129] : memref<12x8xf32, #tpu.memory_space<vmem>>, vector<8x8xf32>
    %179 = arith.truncf %177 : vector<8x8xf32> to vector<8x8xbf16>
    %180 = arith.truncf %178 : vector<8x8xf32> to vector<8x8xbf16>
    %cst_130 = arith.constant dense<0.000000e+00> : vector<8x8xf32>
    %181 = tpu.matmul %179, %180, %cst_130 {dimension_numbers = #tpu.dot_dimension_numbers<[1], [0], [0], [1], [0, 0, 1, 1], [], []>} : vector<8x8xbf16>, vector<8x8xbf16>, vector<8x8xf32> -> vector<8x8xf32>
    %182 = vector.extract_strided_slice %181 {offsets = [0, 0], sizes = [2, 8], strides = [1, 1]} : vector<8x8xf32> to vector<2x8xf32>
    %c4_131 = arith.constant 4 : index
    %c0_132 = arith.constant 0 : index
    %183 = vector.load %arg23[%c4_131, %c0_132] : memref<8x32xf32, #tpu.memory_space<vmem>>, vector<2x8xf32>
    tpu.vector_store %arg23[%c4_131, %c0_132], %182 {strides = array<i32>} : memref<8x32xf32, #tpu.memory_space<vmem>>, vector<2x8xf32>,
    %184 = vector.extract_strided_slice %181 {offsets = [2, 0], sizes = [2, 8], strides = [1, 1]} : vector<8x8xf32> to vector<2x8xf32>
    %c4_133 = arith.constant 4 : index
    %c8_134 = arith.constant 8 : index
    %185 = vector.load %arg23[%c4_133, %c8_134] : memref<8x32xf32, #tpu.memory_space<vmem>>, vector<2x8xf32>
    tpu.vector_store %arg23[%c4_133, %c8_134], %184 {strides = array<i32>} : memref<8x32xf32, #tpu.memory_space<vmem>>, vector<2x8xf32>,
    %186 = vector.extract_strided_slice %181 {offsets = [4, 0], sizes = [2, 8], strides = [1, 1]} : vector<8x8xf32> to vector<2x8xf32>
    %c4_135 = arith.constant 4 : index
    %c16_136 = arith.constant 16 : index
    %187 = vector.load %arg23[%c4_135, %c16_136] : memref<8x32xf32, #tpu.memory_space<vmem>>, vector<2x8xf32>
    tpu.vector_store %arg23[%c4_135, %c16_136], %186 {strides = array<i32>} : memref<8x32xf32, #tpu.memory_space<vmem>>, vector<2x8xf32>,
    %188 = vector.extract_strided_slice %181 {offsets = [6, 0], sizes = [2, 8], strides = [1, 1]} : vector<8x8xf32> to vector<2x8xf32>
    %c4_137 = arith.constant 4 : index
    %c24_138 = arith.constant 24 : index
    %189 = vector.load %arg23[%c4_137, %c24_138] : memref<8x32xf32, #tpu.memory_space<vmem>>, vector<2x8xf32>
    tpu.vector_store %arg23[%c4_137, %c24_138], %188 {strides = array<i32>} : memref<8x32xf32, #tpu.memory_space<vmem>>, vector<2x8xf32>,
    %190 = vector.extract_strided_slice %28 {offsets = [6, 0], sizes = [2, 8], strides = [1, 1]} : vector<8x96xf32> to vector<2x8xf32>
    %c0_139 = arith.constant 0 : index
    %c0_140 = arith.constant 0 : index
    %191 = vector.load %arg24[%c0_139, %c0_140] : memref<8x8xf32, #tpu.memory_space<vmem>>, vector<2x8xf32>
    tpu.vector_store %arg24[%c0_139, %c0_140], %190 {strides = array<i32>} : memref<8x8xf32, #tpu.memory_space<vmem>>, vector<2x8xf32>,
    %192 = vector.extract_strided_slice %28 {offsets = [6, 8], sizes = [2, 8], strides = [1, 1]} : vector<8x96xf32> to vector<2x8xf32>
    %c2_141 = arith.constant 2 : index
    %c0_142 = arith.constant 0 : index
    %193 = vector.load %arg24[%c2_141, %c0_142] : memref<8x8xf32, #tpu.memory_space<vmem>>, vector<2x8xf32>
    tpu.vector_store %arg24[%c2_141, %c0_142], %192 {strides = array<i32>} : memref<8x8xf32, #tpu.memory_space<vmem>>, vector<2x8xf32>,
    %194 = vector.extract_strided_slice %28 {offsets = [6, 16], sizes = [2, 8], strides = [1, 1]} : vector<8x96xf32> to vector<2x8xf32>
    %c4_143 = arith.constant 4 : index
    %c0_144 = arith.constant 0 : index
    %195 = vector.load %arg24[%c4_143, %c0_144] : memref<8x8xf32, #tpu.memory_space<vmem>>, vector<2x8xf32>
    tpu.vector_store %arg24[%c4_143, %c0_144], %194 {strides = array<i32>} : memref<8x8xf32, #tpu.memory_space<vmem>>, vector<2x8xf32>,
    %196 = vector.extract_strided_slice %28 {offsets = [6, 24], sizes = [2, 8], strides = [1, 1]} : vector<8x96xf32> to vector<2x8xf32>
    %c6_145 = arith.constant 6 : index
    %c0_146 = arith.constant 0 : index
    %197 = vector.load %arg24[%c6_145, %c0_146] : memref<8x8xf32, #tpu.memory_space<vmem>>, vector<2x8xf32>
    tpu.vector_store %arg24[%c6_145, %c0_146], %196 {strides = array<i32>} : memref<8x8xf32, #tpu.memory_space<vmem>>, vector<2x8xf32>,
    %198 = vector.extract_strided_slice %28 {offsets = [6, 32], sizes = [2, 8], strides = [1, 1]} : vector<8x96xf32> to vector<2x8xf32>
    %c0_147 = arith.constant 0 : index
    %c0_148 = arith.constant 0 : index
    %199 = vector.load %arg25[%c0_147, %c0_148] : memref<12x8xf32, #tpu.memory_space<vmem>>, vector<2x8xf32>
    tpu.vector_store %arg25[%c0_147, %c0_148], %198 {strides = array<i32>} : memref<12x8xf32, #tpu.memory_space<vmem>>, vector<2x8xf32>,
    %200 = vector.extract_strided_slice %28 {offsets = [6, 64], sizes = [2, 8], strides = [1, 1]} : vector<8x96xf32> to vector<2x8xf32>
    %c0_149 = arith.constant 0 : index
    %c0_150 = arith.constant 0 : index
    %201 = vector.load %arg26[%c0_149, %c0_150] : memref<12x8xf32, #tpu.memory_space<vmem>>, vector<2x8xf32>
    tpu.vector_store %arg26[%c0_149, %c0_150], %200 {strides = array<i32>} : memref<12x8xf32, #tpu.memory_space<vmem>>, vector<2x8xf32>,
    %202 = vector.extract_strided_slice %28 {offsets = [6, 40], sizes = [2, 8], strides = [1, 1]} : vector<8x96xf32> to vector<2x8xf32>
    %c2_151 = arith.constant 2 : index
    %c0_152 = arith.constant 0 : index
    %203 = vector.load %arg25[%c2_151, %c0_152] : memref<12x8xf32, #tpu.memory_space<vmem>>, vector<2x8xf32>
    tpu.vector_store %arg25[%c2_151, %c0_152], %202 {strides = array<i32>} : memref<12x8xf32, #tpu.memory_space<vmem>>, vector<2x8xf32>,
    %204 = vector.extract_strided_slice %28 {offsets = [6, 72], sizes = [2, 8], strides = [1, 1]} : vector<8x96xf32> to vector<2x8xf32>
    %c2_153 = arith.constant 2 : index
    %c0_154 = arith.constant 0 : index
    %205 = vector.load %arg26[%c2_153, %c0_154] : memref<12x8xf32, #tpu.memory_space<vmem>>, vector<2x8xf32>
    tpu.vector_store %arg26[%c2_153, %c0_154], %204 {strides = array<i32>} : memref<12x8xf32, #tpu.memory_space<vmem>>, vector<2x8xf32>,
    %206 = vector.extract_strided_slice %28 {offsets = [6, 48], sizes = [2, 8], strides = [1, 1]} : vector<8x96xf32> to vector<2x8xf32>
    %c4_155 = arith.constant 4 : index
    %c0_156 = arith.constant 0 : index
    %207 = vector.load %arg25[%c4_155, %c0_156] : memref<12x8xf32, #tpu.memory_space<vmem>>, vector<2x8xf32>
    tpu.vector_store %arg25[%c4_155, %c0_156], %206 {strides = array<i32>} : memref<12x8xf32, #tpu.memory_space<vmem>>, vector<2x8xf32>,
    %208 = vector.extract_strided_slice %28 {offsets = [6, 80], sizes = [2, 8], strides = [1, 1]} : vector<8x96xf32> to vector<2x8xf32>
    %c4_157 = arith.constant 4 : index
    %c0_158 = arith.constant 0 : index
    %209 = vector.load %arg26[%c4_157, %c0_158] : memref<12x8xf32, #tpu.memory_space<vmem>>, vector<2x8xf32>
    tpu.vector_store %arg26[%c4_157, %c0_158], %208 {strides = array<i32>} : memref<12x8xf32, #tpu.memory_space<vmem>>, vector<2x8xf32>,
    %210 = vector.extract_strided_slice %28 {offsets = [6, 56], sizes = [2, 8], strides = [1, 1]} : vector<8x96xf32> to vector<2x8xf32>
    %c6_159 = arith.constant 6 : index
    %c0_160 = arith.constant 0 : index
    %211 = vector.load %arg25[%c6_159, %c0_160] : memref<12x8xf32, #tpu.memory_space<vmem>>, vector<2x8xf32>
    tpu.vector_store %arg25[%c6_159, %c0_160], %210 {strides = array<i32>} : memref<12x8xf32, #tpu.memory_space<vmem>>, vector<2x8xf32>,
    %212 = vector.extract_strided_slice %28 {offsets = [6, 88], sizes = [2, 8], strides = [1, 1]} : vector<8x96xf32> to vector<2x8xf32>
    %c6_161 = arith.constant 6 : index
    %c0_162 = arith.constant 0 : index
    %213 = vector.load %arg26[%c6_161, %c0_162] : memref<12x8xf32, #tpu.memory_space<vmem>>, vector<2x8xf32>
    tpu.vector_store %arg26[%c6_161, %c0_162], %212 {strides = array<i32>} : memref<12x8xf32, #tpu.memory_space<vmem>>, vector<2x8xf32>,
    %c0_163 = arith.constant 0 : index
    %c0_164 = arith.constant 0 : index
    %214 = vector.load %arg24[%c0_163, %c0_164] : memref<8x8xf32, #tpu.memory_space<vmem>>, vector<8x8xf32>
    %c0_165 = arith.constant 0 : index
    %c0_166 = arith.constant 0 : index
    %215 = vector.load %arg25[%c0_165, %c0_166] : memref<12x8xf32, #tpu.memory_space<vmem>>, vector<8x8xf32>
    %216 = arith.truncf %214 : vector<8x8xf32> to vector<8x8xbf16>
    %217 = arith.truncf %215 : vector<8x8xf32> to vector<8x8xbf16>
    %cst_167 = arith.constant dense<0.000000e+00> : vector<8x8xf32>
    %218 = tpu.matmul %216, %217, %cst_167 {dimension_numbers = #tpu.dot_dimension_numbers<[1], [1], [0], [0], [0, 0, 1, 0], [], []>} : vector<8x8xbf16>, vector<8x8xbf16>, vector<8x8xf32> -> vector<8x8xf32>
    %cst_168 = arith.constant 0.353553385 : f32
    %219 = vector.broadcast %cst_168 : f32 to vector<8x8xf32>
    %220 = arith.mulf %218, %219 : vector<8x8xf32>
    %221 = arith.addf %220, %30 : vector<8x8xf32>
    %cst_169 = arith.constant dense<0xFF800000> : vector<8xf32>
    %222 = vector.multi_reduction <maximumf>, %221, %cst_169 [1] : vector<8x8xf32> to vector<8xf32>
    %223 = vector.shape_cast %222 : vector<8xf32> to vector<8x1xf32>
    %224 = vector.broadcast %223 : vector<8x1xf32> to vector<8x8xf32>
    %225 = arith.subf %221, %224 : vector<8x8xf32>
    %226 = math.exp %225 : vector<8x8xf32>
    %cst_170 = arith.constant dense<0.000000e+00> : vector<8xf32>
    %227 = vector.multi_reduction <add>, %226, %cst_170 [1] : vector<8x8xf32> to vector<8xf32>
    %228 = vector.shape_cast %227 : vector<8xf32> to vector<8x1xf32>
    %229 = vector.broadcast %228 : vector<8x1xf32> to vector<8x8xf32>
    %230 = arith.divf %226, %229 : vector<8x8xf32>
    %c0_171 = arith.constant 0 : index
    %c0_172 = arith.constant 0 : index
    %231 = vector.load %arg26[%c0_171, %c0_172] : memref<12x8xf32, #tpu.memory_space<vmem>>, vector<8x8xf32>
    %232 = arith.truncf %230 : vector<8x8xf32> to vector<8x8xbf16>
    %233 = arith.truncf %231 : vector<8x8xf32> to vector<8x8xbf16>
    %cst_173 = arith.constant dense<0.000000e+00> : vector<8x8xf32>
    %234 = tpu.matmul %232, %233, %cst_173 {dimension_numbers = #tpu.dot_dimension_numbers<[1], [0], [0], [1], [0, 0, 1, 1], [], []>} : vector<8x8xbf16>, vector<8x8xbf16>, vector<8x8xf32> -> vector<8x8xf32>
    %235 = vector.extract_strided_slice %234 {offsets = [0, 0], sizes = [2, 8], strides = [1, 1]} : vector<8x8xf32> to vector<2x8xf32>
    %c6_174 = arith.constant 6 : index
    %c0_175 = arith.constant 0 : index
    %236 = vector.load %arg23[%c6_174, %c0_175] : memref<8x32xf32, #tpu.memory_space<vmem>>, vector<2x8xf32>
    tpu.vector_store %arg23[%c6_174, %c0_175], %235 {strides = array<i32>} : memref<8x32xf32, #tpu.memory_space<vmem>>, vector<2x8xf32>,
    %237 = vector.extract_strided_slice %234 {offsets = [2, 0], sizes = [2, 8], strides = [1, 1]} : vector<8x8xf32> to vector<2x8xf32>
    %c6_176 = arith.constant 6 : index
    %c8_177 = arith.constant 8 : index
    %238 = vector.load %arg23[%c6_176, %c8_177] : memref<8x32xf32, #tpu.memory_space<vmem>>, vector<2x8xf32>
    tpu.vector_store %arg23[%c6_176, %c8_177], %237 {strides = array<i32>} : memref<8x32xf32, #tpu.memory_space<vmem>>, vector<2x8xf32>,
    %239 = vector.extract_strided_slice %234 {offsets = [4, 0], sizes = [2, 8], strides = [1, 1]} : vector<8x8xf32> to vector<2x8xf32>
    %c6_178 = arith.constant 6 : index
    %c16_179 = arith.constant 16 : index
    %240 = vector.load %arg23[%c6_178, %c16_179] : memref<8x32xf32, #tpu.memory_space<vmem>>, vector<2x8xf32>
    tpu.vector_store %arg23[%c6_178, %c16_179], %239 {strides = array<i32>} : memref<8x32xf32, #tpu.memory_space<vmem>>, vector<2x8xf32>,
    %241 = vector.extract_strided_slice %234 {offsets = [6, 0], sizes = [2, 8], strides = [1, 1]} : vector<8x8xf32> to vector<2x8xf32>
    %c6_180 = arith.constant 6 : index
    %c24_181 = arith.constant 24 : index
    %242 = vector.load %arg23[%c6_180, %c24_181] : memref<8x32xf32, #tpu.memory_space<vmem>>, vector<2x8xf32>
    tpu.vector_store %arg23[%c6_180, %c24_181], %241 {strides = array<i32>} : memref<8x32xf32, #tpu.memory_space<vmem>>, vector<2x8xf32>,
    %c0_182 = arith.constant 0 : index
    %c0_183 = arith.constant 0 : index
    %243 = vector.load %arg23[%c0_182, %c0_183] : memref<8x32xf32, #tpu.memory_space<vmem>>, vector<8x32xf32>
    %c0_184 = arith.constant 0 : index
    %c0_185 = arith.constant 0 : index
    %c0_186 = arith.constant 0 : index
    %244 = vector.load %arg9[%c0_184, %c0_185, %c0_186] : memref<1x32x32xbf16, #tpu.memory_space<vmem>>, vector<1x32x32xbf16>
    %245 = vector.shape_cast %244 : vector<1x32x32xbf16> to vector<32x32xbf16>
    %246 = arith.truncf %243 : vector<8x32xf32> to vector<8x32xbf16>
    %cst_187 = arith.constant dense<0.000000e+00> : vector<8x32xf32>
    %247 = tpu.matmul %246, %245, %cst_187 {dimension_numbers = #tpu.dot_dimension_numbers<[1], [0], [0], [1], [0, 0, 1, 1], [], []>} : vector<8x32xbf16>, vector<32x32xbf16>, vector<8x32xf32> -> vector<8x32xf32>
    %248 = arith.addf %3, %247 : vector<8x32xf32>
    %c0_188 = arith.constant 0 : index
    %c0_189 = arith.constant 0 : index
    %c0_190 = arith.constant 0 : index
    %249 = vector.load %arg10[%c0_188, %c0_189, %c0_190] : memref<1x1x32xf32, #tpu.memory_space<vmem>>, vector<1x1x32xf32>
    %250 = vector.shape_cast %249 : vector<1x1x32xf32> to vector<1x32xf32>
    %251 = vector.broadcast %250 : vector<1x32xf32> to vector<8x32xf32>
    %252 = arith.addf %248, %251 : vector<8x32xf32>
    %cst_191 = arith.constant dense<0.000000e+00> : vector<8xf32>
    %253 = vector.multi_reduction <add>, %252, %cst_191 [1] : vector<8x32xf32> to vector<8xf32>
    %254 = vector.shape_cast %253 : vector<8xf32> to vector<8x1xf32>
    %cst_192 = arith.constant 3.200000e+01 : f32
    %255 = vector.broadcast %cst_192 : f32 to vector<8x1xf32>
    %256 = arith.divf %254, %255 : vector<8x1xf32>
    %257 = vector.broadcast %256 : vector<8x1xf32> to vector<8x32xf32>
    %258 = arith.subf %252, %257 : vector<8x32xf32>
    %259 = arith.mulf %258, %258 : vector<8x32xf32>
    %cst_193 = arith.constant dense<0.000000e+00> : vector<8xf32>
    %260 = vector.multi_reduction <add>, %259, %cst_193 [1] : vector<8x32xf32> to vector<8xf32>
    %261 = vector.shape_cast %260 : vector<8xf32> to vector<8x1xf32>
    %cst_194 = arith.constant 3.100000e+01 : f32
    %262 = vector.broadcast %cst_194 : f32 to vector<8x1xf32>
    %263 = arith.divf %261, %262 : vector<8x1xf32>
    %264 = math.sqrt %263 : vector<8x1xf32>
    %cst_195 = arith.constant 1.000000e-07 : f32
    %265 = vector.broadcast %cst_195 : f32 to vector<8x1xf32>
    %266 = arith.addf %264, %265 : vector<8x1xf32>
    %267 = tpu.reciprocal %266 {approx = true} : vector<8x1xf32> -> vector<8x1xf32>
    %268 = vector.broadcast %267 : vector<8x1xf32> to vector<8x32xf32>
    %269 = arith.mulf %258, %268 : vector<8x32xf32>
    %c0_196 = arith.constant 0 : index
    %c0_197 = arith.constant 0 : index
    %c0_198 = arith.constant 0 : index
    %270 = vector.load %arg11[%c0_196, %c0_197, %c0_198] : memref<1x32x32xbf16, #tpu.memory_space<vmem>>, vector<1x32x32xbf16>
    %271 = vector.shape_cast %270 : vector<1x32x32xbf16> to vector<32x32xbf16>
    %272 = arith.truncf %269 : vector<8x32xf32> to vector<8x32xbf16>
    %cst_199 = arith.constant dense<0.000000e+00> : vector<8x32xf32>
    %273 = tpu.matmul %272, %271, %cst_199 {dimension_numbers = #tpu.dot_dimension_numbers<[1], [0], [0], [1], [0, 0, 1, 1], [], []>} : vector<8x32xbf16>, vector<32x32xbf16>, vector<8x32xf32> -> vector<8x32xf32>
    %c0_200 = arith.constant 0 : index
    %c0_201 = arith.constant 0 : index
    %c0_202 = arith.constant 0 : index
    %274 = vector.load %arg12[%c0_200, %c0_201, %c0_202] : memref<1x1x32xf32, #tpu.memory_space<vmem>>, vector<1x1x32xf32>
    %275 = vector.shape_cast %274 : vector<1x1x32xf32> to vector<1x32xf32>
    %276 = vector.broadcast %275 : vector<1x32xf32> to vector<8x32xf32>
    %277 = arith.addf %273, %276 : vector<8x32xf32>
    %c0_203 = arith.constant 0 : index
    %c0_204 = arith.constant 0 : index
    %c0_205 = arith.constant 0 : index
    %278 = vector.load %arg3[%c0_203, %c0_204, %c0_205] : memref<1x12x32xbf16, #tpu.memory_space<vmem>>, vector<1x12x32xbf16>
    %279 = vector.shape_cast %278 : vector<1x12x32xbf16> to vector<12x32xbf16>
    %c0_206 = arith.constant 0 : index
    %c0_207 = arith.constant 0 : index
    %c0_208 = arith.constant 0 : index
    %280 = vector.load %arg13[%c0_206, %c0_207, %c0_208] : memref<1x32x64xbf16, #tpu.memory_space<vmem>>, vector<1x32x64xbf16>
    %281 = vector.shape_cast %280 : vector<1x32x64xbf16> to vector<32x64xbf16>
    %cst_209 = arith.constant dense<0.000000e+00> : vector<12x64xf32>
    %282 = tpu.matmul %279, %281, %cst_209 {dimension_numbers = #tpu.dot_dimension_numbers<[1], [0], [0], [1], [0, 0, 1, 1], [], []>} : vector<12x32xbf16>, vector<32x64xbf16>, vector<12x64xf32> -> vector<12x64xf32>
    %c0_210 = arith.constant 0 : index
    %c0_211 = arith.constant 0 : index
    %c0_212 = arith.constant 0 : index
    %283 = vector.load %arg14[%c0_210, %c0_211, %c0_212] : memref<1x1x64xf32, #tpu.memory_space<vmem>>, vector<1x1x64xf32>
    %284 = vector.shape_cast %283 : vector<1x1x64xf32> to vector<1x64xf32>
    %285 = vector.broadcast %284 : vector<1x64xf32> to vector<12x64xf32>
    %286 = arith.addf %282, %285 : vector<12x64xf32>
    %c0_213 = arith.constant 0 : index
    %c0_214 = arith.constant 0 : index
    %c0_215 = arith.constant 0 : index
    %287 = vector.load %arg5[%c0_213, %c0_214, %c0_215] : memref<1x1x12xf32, #tpu.memory_space<vmem>>, vector<1x1x12xf32>
    %288 = vector.shape_cast %287 : vector<1x1x12xf32> to vector<1x12xf32>
    %289 = vector.extract_strided_slice %277 {offsets = [0, 0], sizes = [2, 8], strides = [1, 1]} : vector<8x32xf32> to vector<2x8xf32>
    %c0_216 = arith.constant 0 : index
    %c0_217 = arith.constant 0 : index
    %290 = vector.load %arg24[%c0_216, %c0_217] : memref<8x8xf32, #tpu.memory_space<vmem>>, vector<2x8xf32>
    tpu.vector_store %arg24[%c0_216, %c0_217], %289 {strides = array<i32>} : memref<8x8xf32, #tpu.memory_space<vmem>>, vector<2x8xf32>,
    %291 = vector.extract_strided_slice %277 {offsets = [0, 8], sizes = [2, 8], strides = [1, 1]} : vector<8x32xf32> to vector<2x8xf32>
    %c2_218 = arith.constant 2 : index
    %c0_219 = arith.constant 0 : index
    %292 = vector.load %arg24[%c2_218, %c0_219] : memref<8x8xf32, #tpu.memory_space<vmem>>, vector<2x8xf32>
    tpu.vector_store %arg24[%c2_218, %c0_219], %291 {strides = array<i32>} : memref<8x8xf32, #tpu.memory_space<vmem>>, vector<2x8xf32>,
    %293 = vector.extract_strided_slice %277 {offsets = [0, 16], sizes = [2, 8], strides = [1, 1]} : vector<8x32xf32> to vector<2x8xf32>
    %c4_220 = arith.constant 4 : index
    %c0_221 = arith.constant 0 : index
    %294 = vector.load %arg24[%c4_220, %c0_221] : memref<8x8xf32, #tpu.memory_space<vmem>>, vector<2x8xf32>
    tpu.vector_store %arg24[%c4_220, %c0_221], %293 {strides = array<i32>} : memref<8x8xf32, #tpu.memory_space<vmem>>, vector<2x8xf32>,
    %295 = vector.extract_strided_slice %277 {offsets = [0, 24], sizes = [2, 8], strides = [1, 1]} : vector<8x32xf32> to vector<2x8xf32>
    %c6_222 = arith.constant 6 : index
    %c0_223 = arith.constant 0 : index
    %296 = vector.load %arg24[%c6_222, %c0_223] : memref<8x8xf32, #tpu.memory_space<vmem>>, vector<2x8xf32>
    tpu.vector_store %arg24[%c6_222, %c0_223], %295 {strides = array<i32>} : memref<8x8xf32, #tpu.memory_space<vmem>>, vector<2x8xf32>,
    %297 = vector.extract_strided_slice %286 {offsets = [0, 0], sizes = [3, 8], strides = [1, 1]} : vector<12x64xf32> to vector<3x8xf32>
    %c0_224 = arith.constant 0 : index
    %c0_225 = arith.constant 0 : index
    %298 = vector.load %arg25[%c0_224, %c0_225] : memref<12x8xf32, #tpu.memory_space<vmem>>, vector<3x8xf32>
    tpu.vector_store %arg25[%c0_224, %c0_225], %297 {strides = array<i32>} : memref<12x8xf32, #tpu.memory_space<vmem>>, vector<3x8xf32>,
    %299 = vector.extract_strided_slice %286 {offsets = [0, 32], sizes = [3, 8], strides = [1, 1]} : vector<12x64xf32> to vector<3x8xf32>
    %c0_226 = arith.constant 0 : index
    %c0_227 = arith.constant 0 : index
    %300 = vector.load %arg26[%c0_226, %c0_227] : memref<12x8xf32, #tpu.memory_space<vmem>>, vector<3x8xf32>
    tpu.vector_store %arg26[%c0_226, %c0_227], %299 {strides = array<i32>} : memref<12x8xf32, #tpu.memory_space<vmem>>, vector<3x8xf32>,
    %301 = vector.extract_strided_slice %286 {offsets = [0, 8], sizes = [3, 8], strides = [1, 1]} : vector<12x64xf32> to vector<3x8xf32>
    %c3 = arith.constant 3 : index
    %c0_228 = arith.constant 0 : index
    %302 = vector.load %arg25[%c3, %c0_228] : memref<12x8xf32, #tpu.memory_space<vmem>>, vector<3x8xf32>
    tpu.vector_store %arg25[%c3, %c0_228], %301 {strides = array<i32>} : memref<12x8xf32, #tpu.memory_space<vmem>>, vector<3x8xf32>,
    %303 = vector.extract_strided_slice %286 {offsets = [0, 40], sizes = [3, 8], strides = [1, 1]} : vector<12x64xf32> to vector<3x8xf32>
    %c3_229 = arith.constant 3 : index
    %c0_230 = arith.constant 0 : index
    %304 = vector.load %arg26[%c3_229, %c0_230] : memref<12x8xf32, #tpu.memory_space<vmem>>, vector<3x8xf32>
    tpu.vector_store %arg26[%c3_229, %c0_230], %303 {strides = array<i32>} : memref<12x8xf32, #tpu.memory_space<vmem>>, vector<3x8xf32>,
    %305 = vector.extract_strided_slice %286 {offsets = [0, 16], sizes = [3, 8], strides = [1, 1]} : vector<12x64xf32> to vector<3x8xf32>
    %c6_231 = arith.constant 6 : index
    %c0_232 = arith.constant 0 : index
    %306 = vector.load %arg25[%c6_231, %c0_232] : memref<12x8xf32, #tpu.memory_space<vmem>>, vector<3x8xf32>
    tpu.vector_store %arg25[%c6_231, %c0_232], %305 {strides = array<i32>} : memref<12x8xf32, #tpu.memory_space<vmem>>, vector<3x8xf32>,
    %307 = vector.extract_strided_slice %286 {offsets = [0, 48], sizes = [3, 8], strides = [1, 1]} : vector<12x64xf32> to vector<3x8xf32>
    %c6_233 = arith.constant 6 : index
    %c0_234 = arith.constant 0 : index
    %308 = vector.load %arg26[%c6_233, %c0_234] : memref<12x8xf32, #tpu.memory_space<vmem>>, vector<3x8xf32>
    tpu.vector_store %arg26[%c6_233, %c0_234], %307 {strides = array<i32>} : memref<12x8xf32, #tpu.memory_space<vmem>>, vector<3x8xf32>,
    %309 = vector.extract_strided_slice %286 {offsets = [0, 24], sizes = [3, 8], strides = [1, 1]} : vector<12x64xf32> to vector<3x8xf32>
    %c9 = arith.constant 9 : index
    %c0_235 = arith.constant 0 : index
    %310 = vector.load %arg25[%c9, %c0_235] : memref<12x8xf32, #tpu.memory_space<vmem>>, vector<3x8xf32>
    tpu.vector_store %arg25[%c9, %c0_235], %309 {strides = array<i32>} : memref<12x8xf32, #tpu.memory_space<vmem>>, vector<3x8xf32>,
    %311 = vector.extract_strided_slice %286 {offsets = [0, 56], sizes = [3, 8], strides = [1, 1]} : vector<12x64xf32> to vector<3x8xf32>
    %c9_236 = arith.constant 9 : index
    %c0_237 = arith.constant 0 : index
    %312 = vector.load %arg26[%c9_236, %c0_237] : memref<12x8xf32, #tpu.memory_space<vmem>>, vector<3x8xf32>
    tpu.vector_store %arg26[%c9_236, %c0_237], %311 {strides = array<i32>} : memref<12x8xf32, #tpu.memory_space<vmem>>, vector<3x8xf32>,
    %c0_238 = arith.constant 0 : index
    %c0_239 = arith.constant 0 : index
    %313 = vector.load %arg24[%c0_238, %c0_239] : memref<8x8xf32, #tpu.memory_space<vmem>>, vector<8x8xf32>
    %c0_240 = arith.constant 0 : index
    %c0_241 = arith.constant 0 : index
    %314 = vector.load %arg25[%c0_240, %c0_241] : memref<12x8xf32, #tpu.memory_space<vmem>>, vector<12x8xf32>
    %315 = arith.truncf %313 : vector<8x8xf32> to vector<8x8xbf16>
    %316 = arith.truncf %314 : vector<12x8xf32> to vector<12x8xbf16>
    %cst_242 = arith.constant dense<0.000000e+00> : vector<8x12xf32>
    %317 = tpu.matmul %315, %316, %cst_242 {dimension_numbers = #tpu.dot_dimension_numbers<[1], [1], [0], [0], [0, 0, 1, 0], [], []>} : vector<8x8xbf16>, vector<12x8xbf16>, vector<8x12xf32> -> vector<8x12xf32>
    %cst_243 = arith.constant 0.353553385 : f32
    %318 = vector.broadcast %cst_243 : f32 to vector<8x12xf32>
    %319 = arith.mulf %317, %318 : vector<8x12xf32>
    %320 = vector.broadcast %288 : vector<1x12xf32> to vector<8x12xf32>
    %321 = arith.addf %319, %320 : vector<8x12xf32>
    %cst_244 = arith.constant dense<0xFF800000> : vector<8xf32>
    %322 = vector.multi_reduction <maximumf>, %321, %cst_244 [1] : vector<8x12xf32> to vector<8xf32>
    %323 = vector.shape_cast %322 : vector<8xf32> to vector<8x1xf32>
    %324 = vector.broadcast %323 : vector<8x1xf32> to vector<8x12xf32>
    %325 = arith.subf %321, %324 : vector<8x12xf32>
    %326 = math.exp %325 : vector<8x12xf32>
    %cst_245 = arith.constant dense<0.000000e+00> : vector<8xf32>
    %327 = vector.multi_reduction <add>, %326, %cst_245 [1] : vector<8x12xf32> to vector<8xf32>
    %328 = vector.shape_cast %327 : vector<8xf32> to vector<8x1xf32>
    %329 = vector.broadcast %328 : vector<8x1xf32> to vector<8x12xf32>
    %330 = arith.divf %326, %329 : vector<8x12xf32>
    %c0_246 = arith.constant 0 : index
    %c0_247 = arith.constant 0 : index
    %331 = vector.load %arg26[%c0_246, %c0_247] : memref<12x8xf32, #tpu.memory_space<vmem>>, vector<12x8xf32>
    %332 = arith.truncf %330 : vector<8x12xf32> to vector<8x12xbf16>
    %333 = arith.truncf %331 : vector<12x8xf32> to vector<12x8xbf16>
    %cst_248 = arith.constant dense<0.000000e+00> : vector<8x8xf32>
    %334 = tpu.matmul %332, %333, %cst_248 {dimension_numbers = #tpu.dot_dimension_numbers<[1], [0], [0], [1], [0, 0, 1, 1], [], []>} : vector<8x12xbf16>, vector<12x8xbf16>, vector<8x8xf32> -> vector<8x8xf32>
    %335 = vector.extract_strided_slice %334 {offsets = [0, 0], sizes = [2, 8], strides = [1, 1]} : vector<8x8xf32> to vector<2x8xf32>
    %c0_249 = arith.constant 0 : index
    %c0_250 = arith.constant 0 : index
    %336 = vector.load %arg23[%c0_249, %c0_250] : memref<8x32xf32, #tpu.memory_space<vmem>>, vector<2x8xf32>
    tpu.vector_store %arg23[%c0_249, %c0_250], %335 {strides = array<i32>} : memref<8x32xf32, #tpu.memory_space<vmem>>, vector<2x8xf32>,
    %337 = vector.extract_strided_slice %334 {offsets = [2, 0], sizes = [2, 8], strides = [1, 1]} : vector<8x8xf32> to vector<2x8xf32>
    %c0_251 = arith.constant 0 : index
    %c8_252 = arith.constant 8 : index
    %338 = vector.load %arg23[%c0_251, %c8_252] : memref<8x32xf32, #tpu.memory_space<vmem>>, vector<2x8xf32>
    tpu.vector_store %arg23[%c0_251, %c8_252], %337 {strides = array<i32>} : memref<8x32xf32, #tpu.memory_space<vmem>>, vector<2x8xf32>,
    %339 = vector.extract_strided_slice %334 {offsets = [4, 0], sizes = [2, 8], strides = [1, 1]} : vector<8x8xf32> to vector<2x8xf32>
    %c0_253 = arith.constant 0 : index
    %c16_254 = arith.constant 16 : index
    %340 = vector.load %arg23[%c0_253, %c16_254] : memref<8x32xf32, #tpu.memory_space<vmem>>, vector<2x8xf32>
    tpu.vector_store %arg23[%c0_253, %c16_254], %339 {strides = array<i32>} : memref<8x32xf32, #tpu.memory_space<vmem>>, vector<2x8xf32>,
    %341 = vector.extract_strided_slice %334 {offsets = [6, 0], sizes = [2, 8], strides = [1, 1]} : vector<8x8xf32> to vector<2x8xf32>
    %c0_255 = arith.constant 0 : index
    %c24_256 = arith.constant 24 : index
    %342 = vector.load %arg23[%c0_255, %c24_256] : memref<8x32xf32, #tpu.memory_space<vmem>>, vector<2x8xf32>
    tpu.vector_store %arg23[%c0_255, %c24_256], %341 {strides = array<i32>} : memref<8x32xf32, #tpu.memory_space<vmem>>, vector<2x8xf32>,
    %343 = vector.extract_strided_slice %277 {offsets = [2, 0], sizes = [2, 8], strides = [1, 1]} : vector<8x32xf32> to vector<2x8xf32>
    %c0_257 = arith.constant 0 : index
    %c0_258 = arith.constant 0 : index
    %344 = vector.load %arg24[%c0_257, %c0_258] : memref<8x8xf32, #tpu.memory_space<vmem>>, vector<2x8xf32>
    tpu.vector_store %arg24[%c0_257, %c0_258], %343 {strides = array<i32>} : memref<8x8xf32, #tpu.memory_space<vmem>>, vector<2x8xf32>,
    %345 = vector.extract_strided_slice %277 {offsets = [2, 8], sizes = [2, 8], strides = [1, 1]} : vector<8x32xf32> to vector<2x8xf32>
    %c2_259 = arith.constant 2 : index
    %c0_260 = arith.constant 0 : index
    %346 = vector.load %arg24[%c2_259, %c0_260] : memref<8x8xf32, #tpu.memory_space<vmem>>, vector<2x8xf32>
    tpu.vector_store %arg24[%c2_259, %c0_260], %345 {strides = array<i32>} : memref<8x8xf32, #tpu.memory_space<vmem>>, vector<2x8xf32>,
    %347 = vector.extract_strided_slice %277 {offsets = [2, 16], sizes = [2, 8], strides = [1, 1]} : vector<8x32xf32> to vector<2x8xf32>
    %c4_261 = arith.constant 4 : index
    %c0_262 = arith.constant 0 : index
    %348 = vector.load %arg24[%c4_261, %c0_262] : memref<8x8xf32, #tpu.memory_space<vmem>>, vector<2x8xf32>
    tpu.vector_store %arg24[%c4_261, %c0_262], %347 {strides = array<i32>} : memref<8x8xf32, #tpu.memory_space<vmem>>, vector<2x8xf32>,
    %349 = vector.extract_strided_slice %277 {offsets = [2, 24], sizes = [2, 8], strides = [1, 1]} : vector<8x32xf32> to vector<2x8xf32>
    %c6_263 = arith.constant 6 : index
    %c0_264 = arith.constant 0 : index
    %350 = vector.load %arg24[%c6_263, %c0_264] : memref<8x8xf32, #tpu.memory_space<vmem>>, vector<2x8xf32>
    tpu.vector_store %arg24[%c6_263, %c0_264], %349 {strides = array<i32>} : memref<8x8xf32, #tpu.memory_space<vmem>>, vector<2x8xf32>,
    %351 = vector.extract_strided_slice %286 {offsets = [3, 0], sizes = [3, 8], strides = [1, 1]} : vector<12x64xf32> to vector<3x8xf32>
    %c0_265 = arith.constant 0 : index
    %c0_266 = arith.constant 0 : index
    %352 = vector.load %arg25[%c0_265, %c0_266] : memref<12x8xf32, #tpu.memory_space<vmem>>, vector<3x8xf32>
    tpu.vector_store %arg25[%c0_265, %c0_266], %351 {strides = array<i32>} : memref<12x8xf32, #tpu.memory_space<vmem>>, vector<3x8xf32>,
    %353 = vector.extract_strided_slice %286 {offsets = [3, 32], sizes = [3, 8], strides = [1, 1]} : vector<12x64xf32> to vector<3x8xf32>
    %c0_267 = arith.constant 0 : index
    %c0_268 = arith.constant 0 : index
    %354 = vector.load %arg26[%c0_267, %c0_268] : memref<12x8xf32, #tpu.memory_space<vmem>>, vector<3x8xf32>
    tpu.vector_store %arg26[%c0_267, %c0_268], %353 {strides = array<i32>} : memref<12x8xf32, #tpu.memory_space<vmem>>, vector<3x8xf32>,
    %355 = vector.extract_strided_slice %286 {offsets = [3, 8], sizes = [3, 8], strides = [1, 1]} : vector<12x64xf32> to vector<3x8xf32>
    %c3_269 = arith.constant 3 : index
    %c0_270 = arith.constant 0 : index
    %356 = vector.load %arg25[%c3_269, %c0_270] : memref<12x8xf32, #tpu.memory_space<vmem>>, vector<3x8xf32>
    tpu.vector_store %arg25[%c3_269, %c0_270], %355 {strides = array<i32>} : memref<12x8xf32, #tpu.memory_space<vmem>>, vector<3x8xf32>,
    %357 = vector.extract_strided_slice %286 {offsets = [3, 40], sizes = [3, 8], strides = [1, 1]} : vector<12x64xf32> to vector<3x8xf32>
    %c3_271 = arith.constant 3 : index
    %c0_272 = arith.constant 0 : index
    %358 = vector.load %arg26[%c3_271, %c0_272] : memref<12x8xf32, #tpu.memory_space<vmem>>, vector<3x8xf32>
    tpu.vector_store %arg26[%c3_271, %c0_272], %357 {strides = array<i32>} : memref<12x8xf32, #tpu.memory_space<vmem>>, vector<3x8xf32>,
    %359 = vector.extract_strided_slice %286 {offsets = [3, 16], sizes = [3, 8], strides = [1, 1]} : vector<12x64xf32> to vector<3x8xf32>
    %c6_273 = arith.constant 6 : index
    %c0_274 = arith.constant 0 : index
    %360 = vector.load %arg25[%c6_273, %c0_274] : memref<12x8xf32, #tpu.memory_space<vmem>>, vector<3x8xf32>
    tpu.vector_store %arg25[%c6_273, %c0_274], %359 {strides = array<i32>} : memref<12x8xf32, #tpu.memory_space<vmem>>, vector<3x8xf32>,
    %361 = vector.extract_strided_slice %286 {offsets = [3, 48], sizes = [3, 8], strides = [1, 1]} : vector<12x64xf32> to vector<3x8xf32>
    %c6_275 = arith.constant 6 : index
    %c0_276 = arith.constant 0 : index
    %362 = vector.load %arg26[%c6_275, %c0_276] : memref<12x8xf32, #tpu.memory_space<vmem>>, vector<3x8xf32>
    tpu.vector_store %arg26[%c6_275, %c0_276], %361 {strides = array<i32>} : memref<12x8xf32, #tpu.memory_space<vmem>>, vector<3x8xf32>,
    %363 = vector.extract_strided_slice %286 {offsets = [3, 24], sizes = [3, 8], strides = [1, 1]} : vector<12x64xf32> to vector<3x8xf32>
    %c9_277 = arith.constant 9 : index
    %c0_278 = arith.constant 0 : index
    %364 = vector.load %arg25[%c9_277, %c0_278] : memref<12x8xf32, #tpu.memory_space<vmem>>, vector<3x8xf32>
    tpu.vector_store %arg25[%c9_277, %c0_278], %363 {strides = array<i32>} : memref<12x8xf32, #tpu.memory_space<vmem>>, vector<3x8xf32>,
    %365 = vector.extract_strided_slice %286 {offsets = [3, 56], sizes = [3, 8], strides = [1, 1]} : vector<12x64xf32> to vector<3x8xf32>
    %c9_279 = arith.constant 9 : index
    %c0_280 = arith.constant 0 : index
    %366 = vector.load %arg26[%c9_279, %c0_280] : memref<12x8xf32, #tpu.memory_space<vmem>>, vector<3x8xf32>
    tpu.vector_store %arg26[%c9_279, %c0_280], %365 {strides = array<i32>} : memref<12x8xf32, #tpu.memory_space<vmem>>, vector<3x8xf32>,
    %c0_281 = arith.constant 0 : index
    %c0_282 = arith.constant 0 : index
    %367 = vector.load %arg24[%c0_281, %c0_282] : memref<8x8xf32, #tpu.memory_space<vmem>>, vector<8x8xf32>
    %c0_283 = arith.constant 0 : index
    %c0_284 = arith.constant 0 : index
    %368 = vector.load %arg25[%c0_283, %c0_284] : memref<12x8xf32, #tpu.memory_space<vmem>>, vector<12x8xf32>
    %369 = arith.truncf %367 : vector<8x8xf32> to vector<8x8xbf16>
    %370 = arith.truncf %368 : vector<12x8xf32> to vector<12x8xbf16>
    %cst_285 = arith.constant dense<0.000000e+00> : vector<8x12xf32>
    %371 = tpu.matmul %369, %370, %cst_285 {dimension_numbers = #tpu.dot_dimension_numbers<[1], [1], [0], [0], [0, 0, 1, 0], [], []>} : vector<8x8xbf16>, vector<12x8xbf16>, vector<8x12xf32> -> vector<8x12xf32>
    %cst_286 = arith.constant 0.353553385 : f32
    %372 = vector.broadcast %cst_286 : f32 to vector<8x12xf32>
    %373 = arith.mulf %371, %372 : vector<8x12xf32>
    %374 = vector.broadcast %288 : vector<1x12xf32> to vector<8x12xf32>
    %375 = arith.addf %373, %374 : vector<8x12xf32>
    %cst_287 = arith.constant dense<0xFF800000> : vector<8xf32>
    %376 = vector.multi_reduction <maximumf>, %375, %cst_287 [1] : vector<8x12xf32> to vector<8xf32>
    %377 = vector.shape_cast %376 : vector<8xf32> to vector<8x1xf32>
    %378 = vector.broadcast %377 : vector<8x1xf32> to vector<8x12xf32>
    %379 = arith.subf %375, %378 : vector<8x12xf32>
    %380 = math.exp %379 : vector<8x12xf32>
    %cst_288 = arith.constant dense<0.000000e+00> : vector<8xf32>
    %381 = vector.multi_reduction <add>, %380, %cst_288 [1] : vector<8x12xf32> to vector<8xf32>
    %382 = vector.shape_cast %381 : vector<8xf32> to vector<8x1xf32>
    %383 = vector.broadcast %382 : vector<8x1xf32> to vector<8x12xf32>
    %384 = arith.divf %380, %383 : vector<8x12xf32>
    %c0_289 = arith.constant 0 : index
    %c0_290 = arith.constant 0 : index
    %385 = vector.load %arg26[%c0_289, %c0_290] : memref<12x8xf32, #tpu.memory_space<vmem>>, vector<12x8xf32>
    %386 = arith.truncf %384 : vector<8x12xf32> to vector<8x12xbf16>
    %387 = arith.truncf %385 : vector<12x8xf32> to vector<12x8xbf16>
    %cst_291 = arith.constant dense<0.000000e+00> : vector<8x8xf32>
    %388 = tpu.matmul %386, %387, %cst_291 {dimension_numbers = #tpu.dot_dimension_numbers<[1], [0], [0], [1], [0, 0, 1, 1], [], []>} : vector<8x12xbf16>, vector<12x8xbf16>, vector<8x8xf32> -> vector<8x8xf32>
    %389 = vector.extract_strided_slice %388 {offsets = [0, 0], sizes = [2, 8], strides = [1, 1]} : vector<8x8xf32> to vector<2x8xf32>
    %c2_292 = arith.constant 2 : index
    %c0_293 = arith.constant 0 : index
    %390 = vector.load %arg23[%c2_292, %c0_293] : memref<8x32xf32, #tpu.memory_space<vmem>>, vector<2x8xf32>
    tpu.vector_store %arg23[%c2_292, %c0_293], %389 {strides = array<i32>} : memref<8x32xf32, #tpu.memory_space<vmem>>, vector<2x8xf32>,
    %391 = vector.extract_strided_slice %388 {offsets = [2, 0], sizes = [2, 8], strides = [1, 1]} : vector<8x8xf32> to vector<2x8xf32>
    %c2_294 = arith.constant 2 : index
    %c8_295 = arith.constant 8 : index
    %392 = vector.load %arg23[%c2_294, %c8_295] : memref<8x32xf32, #tpu.memory_space<vmem>>, vector<2x8xf32>
    tpu.vector_store %arg23[%c2_294, %c8_295], %391 {strides = array<i32>} : memref<8x32xf32, #tpu.memory_space<vmem>>, vector<2x8xf32>,
    %393 = vector.extract_strided_slice %388 {offsets = [4, 0], sizes = [2, 8], strides = [1, 1]} : vector<8x8xf32> to vector<2x8xf32>
    %c2_296 = arith.constant 2 : index
    %c16_297 = arith.constant 16 : index
    %394 = vector.load %arg23[%c2_296, %c16_297] : memref<8x32xf32, #tpu.memory_space<vmem>>, vector<2x8xf32>
    tpu.vector_store %arg23[%c2_296, %c16_297], %393 {strides = array<i32>} : memref<8x32xf32, #tpu.memory_space<vmem>>, vector<2x8xf32>,
    %395 = vector.extract_strided_slice %388 {offsets = [6, 0], sizes = [2, 8], strides = [1, 1]} : vector<8x8xf32> to vector<2x8xf32>
    %c2_298 = arith.constant 2 : index
    %c24_299 = arith.constant 24 : index
    %396 = vector.load %arg23[%c2_298, %c24_299] : memref<8x32xf32, #tpu.memory_space<vmem>>, vector<2x8xf32>
    tpu.vector_store %arg23[%c2_298, %c24_299], %395 {strides = array<i32>} : memref<8x32xf32, #tpu.memory_space<vmem>>, vector<2x8xf32>,
    %397 = vector.extract_strided_slice %277 {offsets = [4, 0], sizes = [2, 8], strides = [1, 1]} : vector<8x32xf32> to vector<2x8xf32>
    %c0_300 = arith.constant 0 : index
    %c0_301 = arith.constant 0 : index
    %398 = vector.load %arg24[%c0_300, %c0_301] : memref<8x8xf32, #tpu.memory_space<vmem>>, vector<2x8xf32>
    tpu.vector_store %arg24[%c0_300, %c0_301], %397 {strides = array<i32>} : memref<8x8xf32, #tpu.memory_space<vmem>>, vector<2x8xf32>,
    %399 = vector.extract_strided_slice %277 {offsets = [4, 8], sizes = [2, 8], strides = [1, 1]} : vector<8x32xf32> to vector<2x8xf32>
    %c2_302 = arith.constant 2 : index
    %c0_303 = arith.constant 0 : index
    %400 = vector.load %arg24[%c2_302, %c0_303] : memref<8x8xf32, #tpu.memory_space<vmem>>, vector<2x8xf32>
    tpu.vector_store %arg24[%c2_302, %c0_303], %399 {strides = array<i32>} : memref<8x8xf32, #tpu.memory_space<vmem>>, vector<2x8xf32>,
    %401 = vector.extract_strided_slice %277 {offsets = [4, 16], sizes = [2, 8], strides = [1, 1]} : vector<8x32xf32> to vector<2x8xf32>
    %c4_304 = arith.constant 4 : index
    %c0_305 = arith.constant 0 : index
    %402 = vector.load %arg24[%c4_304, %c0_305] : memref<8x8xf32, #tpu.memory_space<vmem>>, vector<2x8xf32>
    tpu.vector_store %arg24[%c4_304, %c0_305], %401 {strides = array<i32>} : memref<8x8xf32, #tpu.memory_space<vmem>>, vector<2x8xf32>,
    %403 = vector.extract_strided_slice %277 {offsets = [4, 24], sizes = [2, 8], strides = [1, 1]} : vector<8x32xf32> to vector<2x8xf32>
    %c6_306 = arith.constant 6 : index
    %c0_307 = arith.constant 0 : index
    %404 = vector.load %arg24[%c6_306, %c0_307] : memref<8x8xf32, #tpu.memory_space<vmem>>, vector<2x8xf32>
    tpu.vector_store %arg24[%c6_306, %c0_307], %403 {strides = array<i32>} : memref<8x8xf32, #tpu.memory_space<vmem>>, vector<2x8xf32>,
    %405 = vector.extract_strided_slice %286 {offsets = [6, 0], sizes = [3, 8], strides = [1, 1]} : vector<12x64xf32> to vector<3x8xf32>
    %c0_308 = arith.constant 0 : index
    %c0_309 = arith.constant 0 : index
    %406 = vector.load %arg25[%c0_308, %c0_309] : memref<12x8xf32, #tpu.memory_space<vmem>>, vector<3x8xf32>
    tpu.vector_store %arg25[%c0_308, %c0_309], %405 {strides = array<i32>} : memref<12x8xf32, #tpu.memory_space<vmem>>, vector<3x8xf32>,
    %407 = vector.extract_strided_slice %286 {offsets = [6, 32], sizes = [3, 8], strides = [1, 1]} : vector<12x64xf32> to vector<3x8xf32>
    %c0_310 = arith.constant 0 : index
    %c0_311 = arith.constant 0 : index
    %408 = vector.load %arg26[%c0_310, %c0_311] : memref<12x8xf32, #tpu.memory_space<vmem>>, vector<3x8xf32>
    tpu.vector_store %arg26[%c0_310, %c0_311], %407 {strides = array<i32>} : memref<12x8xf32, #tpu.memory_space<vmem>>, vector<3x8xf32>,
    %409 = vector.extract_strided_slice %286 {offsets = [6, 8], sizes = [3, 8], strides = [1, 1]} : vector<12x64xf32> to vector<3x8xf32>
    %c3_312 = arith.constant 3 : index
    %c0_313 = arith.constant 0 : index
    %410 = vector.load %arg25[%c3_312, %c0_313] : memref<12x8xf32, #tpu.memory_space<vmem>>, vector<3x8xf32>
    tpu.vector_store %arg25[%c3_312, %c0_313], %409 {strides = array<i32>} : memref<12x8xf32, #tpu.memory_space<vmem>>, vector<3x8xf32>,
    %411 = vector.extract_strided_slice %286 {offsets = [6, 40], sizes = [3, 8], strides = [1, 1]} : vector<12x64xf32> to vector<3x8xf32>
    %c3_314 = arith.constant 3 : index
    %c0_315 = arith.constant 0 : index
    %412 = vector.load %arg26[%c3_314, %c0_315] : memref<12x8xf32, #tpu.memory_space<vmem>>, vector<3x8xf32>
    tpu.vector_store %arg26[%c3_314, %c0_315], %411 {strides = array<i32>} : memref<12x8xf32, #tpu.memory_space<vmem>>, vector<3x8xf32>,
    %413 = vector.extract_strided_slice %286 {offsets = [6, 16], sizes = [3, 8], strides = [1, 1]} : vector<12x64xf32> to vector<3x8xf32>
    %c6_316 = arith.constant 6 : index
    %c0_317 = arith.constant 0 : index
    %414 = vector.load %arg25[%c6_316, %c0_317] : memref<12x8xf32, #tpu.memory_space<vmem>>, vector<3x8xf32>
    tpu.vector_store %arg25[%c6_316, %c0_317], %413 {strides = array<i32>} : memref<12x8xf32, #tpu.memory_space<vmem>>, vector<3x8xf32>,
    %415 = vector.extract_strided_slice %286 {offsets = [6, 48], sizes = [3, 8], strides = [1, 1]} : vector<12x64xf32> to vector<3x8xf32>
    %c6_318 = arith.constant 6 : index
    %c0_319 = arith.constant 0 : index
    %416 = vector.load %arg26[%c6_318, %c0_319] : memref<12x8xf32, #tpu.memory_space<vmem>>, vector<3x8xf32>
    tpu.vector_store %arg26[%c6_318, %c0_319], %415 {strides = array<i32>} : memref<12x8xf32, #tpu.memory_space<vmem>>, vector<3x8xf32>,
    %417 = vector.extract_strided_slice %286 {offsets = [6, 24], sizes = [3, 8], strides = [1, 1]} : vector<12x64xf32> to vector<3x8xf32>
    %c9_320 = arith.constant 9 : index
    %c0_321 = arith.constant 0 : index
    %418 = vector.load %arg25[%c9_320, %c0_321] : memref<12x8xf32, #tpu.memory_space<vmem>>, vector<3x8xf32>
    tpu.vector_store %arg25[%c9_320, %c0_321], %417 {strides = array<i32>} : memref<12x8xf32, #tpu.memory_space<vmem>>, vector<3x8xf32>,
    %419 = vector.extract_strided_slice %286 {offsets = [6, 56], sizes = [3, 8], strides = [1, 1]} : vector<12x64xf32> to vector<3x8xf32>
    %c9_322 = arith.constant 9 : index
    %c0_323 = arith.constant 0 : index
    %420 = vector.load %arg26[%c9_322, %c0_323] : memref<12x8xf32, #tpu.memory_space<vmem>>, vector<3x8xf32>
    tpu.vector_store %arg26[%c9_322, %c0_323], %419 {strides = array<i32>} : memref<12x8xf32, #tpu.memory_space<vmem>>, vector<3x8xf32>,
    %c0_324 = arith.constant 0 : index
    %c0_325 = arith.constant 0 : index
    %421 = vector.load %arg24[%c0_324, %c0_325] : memref<8x8xf32, #tpu.memory_space<vmem>>, vector<8x8xf32>
    %c0_326 = arith.constant 0 : index
    %c0_327 = arith.constant 0 : index
    %422 = vector.load %arg25[%c0_326, %c0_327] : memref<12x8xf32, #tpu.memory_space<vmem>>, vector<12x8xf32>
    %423 = arith.truncf %421 : vector<8x8xf32> to vector<8x8xbf16>
    %424 = arith.truncf %422 : vector<12x8xf32> to vector<12x8xbf16>
    %cst_328 = arith.constant dense<0.000000e+00> : vector<8x12xf32>
    %425 = tpu.matmul %423, %424, %cst_328 {dimension_numbers = #tpu.dot_dimension_numbers<[1], [1], [0], [0], [0, 0, 1, 0], [], []>} : vector<8x8xbf16>, vector<12x8xbf16>, vector<8x12xf32> -> vector<8x12xf32>
    %cst_329 = arith.constant 0.353553385 : f32
    %426 = vector.broadcast %cst_329 : f32 to vector<8x12xf32>
    %427 = arith.mulf %425, %426 : vector<8x12xf32>
    %428 = vector.broadcast %288 : vector<1x12xf32> to vector<8x12xf32>
    %429 = arith.addf %427, %428 : vector<8x12xf32>
    %cst_330 = arith.constant dense<0xFF800000> : vector<8xf32>
    %430 = vector.multi_reduction <maximumf>, %429, %cst_330 [1] : vector<8x12xf32> to vector<8xf32>
    %431 = vector.shape_cast %430 : vector<8xf32> to vector<8x1xf32>
    %432 = vector.broadcast %431 : vector<8x1xf32> to vector<8x12xf32>
    %433 = arith.subf %429, %432 : vector<8x12xf32>
    %434 = math.exp %433 : vector<8x12xf32>
    %cst_331 = arith.constant dense<0.000000e+00> : vector<8xf32>
    %435 = vector.multi_reduction <add>, %434, %cst_331 [1] : vector<8x12xf32> to vector<8xf32>
    %436 = vector.shape_cast %435 : vector<8xf32> to vector<8x1xf32>
    %437 = vector.broadcast %436 : vector<8x1xf32> to vector<8x12xf32>
    %438 = arith.divf %434, %437 : vector<8x12xf32>
    %c0_332 = arith.constant 0 : index
    %c0_333 = arith.constant 0 : index
    %439 = vector.load %arg26[%c0_332, %c0_333] : memref<12x8xf32, #tpu.memory_space<vmem>>, vector<12x8xf32>
    %440 = arith.truncf %438 : vector<8x12xf32> to vector<8x12xbf16>
    %441 = arith.truncf %439 : vector<12x8xf32> to vector<12x8xbf16>
    %cst_334 = arith.constant dense<0.000000e+00> : vector<8x8xf32>
    %442 = tpu.matmul %440, %441, %cst_334 {dimension_numbers = #tpu.dot_dimension_numbers<[1], [0], [0], [1], [0, 0, 1, 1], [], []>} : vector<8x12xbf16>, vector<12x8xbf16>, vector<8x8xf32> -> vector<8x8xf32>
    %443 = vector.extract_strided_slice %442 {offsets = [0, 0], sizes = [2, 8], strides = [1, 1]} : vector<8x8xf32> to vector<2x8xf32>
    %c4_335 = arith.constant 4 : index
    %c0_336 = arith.constant 0 : index
    %444 = vector.load %arg23[%c4_335, %c0_336] : memref<8x32xf32, #tpu.memory_space<vmem>>, vector<2x8xf32>
    tpu.vector_store %arg23[%c4_335, %c0_336], %443 {strides = array<i32>} : memref<8x32xf32, #tpu.memory_space<vmem>>, vector<2x8xf32>,
    %445 = vector.extract_strided_slice %442 {offsets = [2, 0], sizes = [2, 8], strides = [1, 1]} : vector<8x8xf32> to vector<2x8xf32>
    %c4_337 = arith.constant 4 : index
    %c8_338 = arith.constant 8 : index
    %446 = vector.load %arg23[%c4_337, %c8_338] : memref<8x32xf32, #tpu.memory_space<vmem>>, vector<2x8xf32>
    tpu.vector_store %arg23[%c4_337, %c8_338], %445 {strides = array<i32>} : memref<8x32xf32, #tpu.memory_space<vmem>>, vector<2x8xf32>,
    %447 = vector.extract_strided_slice %442 {offsets = [4, 0], sizes = [2, 8], strides = [1, 1]} : vector<8x8xf32> to vector<2x8xf32>
    %c4_339 = arith.constant 4 : index
    %c16_340 = arith.constant 16 : index
    %448 = vector.load %arg23[%c4_339, %c16_340] : memref<8x32xf32, #tpu.memory_space<vmem>>, vector<2x8xf32>
    tpu.vector_store %arg23[%c4_339, %c16_340], %447 {strides = array<i32>} : memref<8x32xf32, #tpu.memory_space<vmem>>, vector<2x8xf32>,
    %449 = vector.extract_strided_slice %442 {offsets = [6, 0], sizes = [2, 8], strides = [1, 1]} : vector<8x8xf32> to vector<2x8xf32>
    %c4_341 = arith.constant 4 : index
    %c24_342 = arith.constant 24 : index
    %450 = vector.load %arg23[%c4_341, %c24_342] : memref<8x32xf32, #tpu.memory_space<vmem>>, vector<2x8xf32>
    tpu.vector_store %arg23[%c4_341, %c24_342], %449 {strides = array<i32>} : memref<8x32xf32, #tpu.memory_space<vmem>>, vector<2x8xf32>,
    %451 = vector.extract_strided_slice %277 {offsets = [6, 0], sizes = [2, 8], strides = [1, 1]} : vector<8x32xf32> to vector<2x8xf32>
    %c0_343 = arith.constant 0 : index
    %c0_344 = arith.constant 0 : index
    %452 = vector.load %arg24[%c0_343, %c0_344] : memref<8x8xf32, #tpu.memory_space<vmem>>, vector<2x8xf32>
    tpu.vector_store %arg24[%c0_343, %c0_344], %451 {strides = array<i32>} : memref<8x8xf32, #tpu.memory_space<vmem>>, vector<2x8xf32>,
    %453 = vector.extract_strided_slice %277 {offsets = [6, 8], sizes = [2, 8], strides = [1, 1]} : vector<8x32xf32> to vector<2x8xf32>
    %c2_345 = arith.constant 2 : index
    %c0_346 = arith.constant 0 : index
    %454 = vector.load %arg24[%c2_345, %c0_346] : memref<8x8xf32, #tpu.memory_space<vmem>>, vector<2x8xf32>
    tpu.vector_store %arg24[%c2_345, %c0_346], %453 {strides = array<i32>} : memref<8x8xf32, #tpu.memory_space<vmem>>, vector<2x8xf32>,
    %455 = vector.extract_strided_slice %277 {offsets = [6, 16], sizes = [2, 8], strides = [1, 1]} : vector<8x32xf32> to vector<2x8xf32>
    %c4_347 = arith.constant 4 : index
    %c0_348 = arith.constant 0 : index
    %456 = vector.load %arg24[%c4_347, %c0_348] : memref<8x8xf32, #tpu.memory_space<vmem>>, vector<2x8xf32>
    tpu.vector_store %arg24[%c4_347, %c0_348], %455 {strides = array<i32>} : memref<8x8xf32, #tpu.memory_space<vmem>>, vector<2x8xf32>,
    %457 = vector.extract_strided_slice %277 {offsets = [6, 24], sizes = [2, 8], strides = [1, 1]} : vector<8x32xf32> to vector<2x8xf32>
    %c6_349 = arith.constant 6 : index
    %c0_350 = arith.constant 0 : index
    %458 = vector.load %arg24[%c6_349, %c0_350] : memref<8x8xf32, #tpu.memory_space<vmem>>, vector<2x8xf32>
    tpu.vector_store %arg24[%c6_349, %c0_350], %457 {strides = array<i32>} : memref<8x8xf32, #tpu.memory_space<vmem>>, vector<2x8xf32>,
    %459 = vector.extract_strided_slice %286 {offsets = [9, 0], sizes = [3, 8], strides = [1, 1]} : vector<12x64xf32> to vector<3x8xf32>
    %c0_351 = arith.constant 0 : index
    %c0_352 = arith.constant 0 : index
    %460 = vector.load %arg25[%c0_351, %c0_352] : memref<12x8xf32, #tpu.memory_space<vmem>>, vector<3x8xf32>
    tpu.vector_store %arg25[%c0_351, %c0_352], %459 {strides = array<i32>} : memref<12x8xf32, #tpu.memory_space<vmem>>, vector<3x8xf32>,
    %461 = vector.extract_strided_slice %286 {offsets = [9, 32], sizes = [3, 8], strides = [1, 1]} : vector<12x64xf32> to vector<3x8xf32>
    %c0_353 = arith.constant 0 : index
    %c0_354 = arith.constant 0 : index
    %462 = vector.load %arg26[%c0_353, %c0_354] : memref<12x8xf32, #tpu.memory_space<vmem>>, vector<3x8xf32>
    tpu.vector_store %arg26[%c0_353, %c0_354], %461 {strides = array<i32>} : memref<12x8xf32, #tpu.memory_space<vmem>>, vector<3x8xf32>,
    %463 = vector.extract_strided_slice %286 {offsets = [9, 8], sizes = [3, 8], strides = [1, 1]} : vector<12x64xf32> to vector<3x8xf32>
    %c3_355 = arith.constant 3 : index
    %c0_356 = arith.constant 0 : index
    %464 = vector.load %arg25[%c3_355, %c0_356] : memref<12x8xf32, #tpu.memory_space<vmem>>, vector<3x8xf32>
    tpu.vector_store %arg25[%c3_355, %c0_356], %463 {strides = array<i32>} : memref<12x8xf32, #tpu.memory_space<vmem>>, vector<3x8xf32>,
    %465 = vector.extract_strided_slice %286 {offsets = [9, 40], sizes = [3, 8], strides = [1, 1]} : vector<12x64xf32> to vector<3x8xf32>
    %c3_357 = arith.constant 3 : index
    %c0_358 = arith.constant 0 : index
    %466 = vector.load %arg26[%c3_357, %c0_358] : memref<12x8xf32, #tpu.memory_space<vmem>>, vector<3x8xf32>
    tpu.vector_store %arg26[%c3_357, %c0_358], %465 {strides = array<i32>} : memref<12x8xf32, #tpu.memory_space<vmem>>, vector<3x8xf32>,
    %467 = vector.extract_strided_slice %286 {offsets = [9, 16], sizes = [3, 8], strides = [1, 1]} : vector<12x64xf32> to vector<3x8xf32>
    %c6_359 = arith.constant 6 : index
    %c0_360 = arith.constant 0 : index
    %468 = vector.load %arg25[%c6_359, %c0_360] : memref<12x8xf32, #tpu.memory_space<vmem>>, vector<3x8xf32>
    tpu.vector_store %arg25[%c6_359, %c0_360], %467 {strides = array<i32>} : memref<12x8xf32, #tpu.memory_space<vmem>>, vector<3x8xf32>,
    %469 = vector.extract_strided_slice %286 {offsets = [9, 48], sizes = [3, 8], strides = [1, 1]} : vector<12x64xf32> to vector<3x8xf32>
    %c6_361 = arith.constant 6 : index
    %c0_362 = arith.constant 0 : index
    %470 = vector.load %arg26[%c6_361, %c0_362] : memref<12x8xf32, #tpu.memory_space<vmem>>, vector<3x8xf32>
    tpu.vector_store %arg26[%c6_361, %c0_362], %469 {strides = array<i32>} : memref<12x8xf32, #tpu.memory_space<vmem>>, vector<3x8xf32>,
    %471 = vector.extract_strided_slice %286 {offsets = [9, 24], sizes = [3, 8], strides = [1, 1]} : vector<12x64xf32> to vector<3x8xf32>
    %c9_363 = arith.constant 9 : index
    %c0_364 = arith.constant 0 : index
    %472 = vector.load %arg25[%c9_363, %c0_364] : memref<12x8xf32, #tpu.memory_space<vmem>>, vector<3x8xf32>
    tpu.vector_store %arg25[%c9_363, %c0_364], %471 {strides = array<i32>} : memref<12x8xf32, #tpu.memory_space<vmem>>, vector<3x8xf32>,
    %473 = vector.extract_strided_slice %286 {offsets = [9, 56], sizes = [3, 8], strides = [1, 1]} : vector<12x64xf32> to vector<3x8xf32>
    %c9_365 = arith.constant 9 : index
    %c0_366 = arith.constant 0 : index
    %474 = vector.load %arg26[%c9_365, %c0_366] : memref<12x8xf32, #tpu.memory_space<vmem>>, vector<3x8xf32>
    tpu.vector_store %arg26[%c9_365, %c0_366], %473 {strides = array<i32>} : memref<12x8xf32, #tpu.memory_space<vmem>>, vector<3x8xf32>,
    %c0_367 = arith.constant 0 : index
    %c0_368 = arith.constant 0 : index
    %475 = vector.load %arg24[%c0_367, %c0_368] : memref<8x8xf32, #tpu.memory_space<vmem>>, vector<8x8xf32>
    %c0_369 = arith.constant 0 : index
    %c0_370 = arith.constant 0 : index
    %476 = vector.load %arg25[%c0_369, %c0_370] : memref<12x8xf32, #tpu.memory_space<vmem>>, vector<12x8xf32>
    %477 = arith.truncf %475 : vector<8x8xf32> to vector<8x8xbf16>
    %478 = arith.truncf %476 : vector<12x8xf32> to vector<12x8xbf16>
    %cst_371 = arith.constant dense<0.000000e+00> : vector<8x12xf32>
    %479 = tpu.matmul %477, %478, %cst_371 {dimension_numbers = #tpu.dot_dimension_numbers<[1], [1], [0], [0], [0, 0, 1, 0], [], []>} : vector<8x8xbf16>, vector<12x8xbf16>, vector<8x12xf32> -> vector<8x12xf32>
    %cst_372 = arith.constant 0.353553385 : f32
    %480 = vector.broadcast %cst_372 : f32 to vector<8x12xf32>
    %481 = arith.mulf %479, %480 : vector<8x12xf32>
    %482 = vector.broadcast %288 : vector<1x12xf32> to vector<8x12xf32>
    %483 = arith.addf %481, %482 : vector<8x12xf32>
    %cst_373 = arith.constant dense<0xFF800000> : vector<8xf32>
    %484 = vector.multi_reduction <maximumf>, %483, %cst_373 [1] : vector<8x12xf32> to vector<8xf32>
    %485 = vector.shape_cast %484 : vector<8xf32> to vector<8x1xf32>
    %486 = vector.broadcast %485 : vector<8x1xf32> to vector<8x12xf32>
    %487 = arith.subf %483, %486 : vector<8x12xf32>
    %488 = math.exp %487 : vector<8x12xf32>
    %cst_374 = arith.constant dense<0.000000e+00> : vector<8xf32>
    %489 = vector.multi_reduction <add>, %488, %cst_374 [1] : vector<8x12xf32> to vector<8xf32>
    %490 = vector.shape_cast %489 : vector<8xf32> to vector<8x1xf32>
    %491 = vector.broadcast %490 : vector<8x1xf32> to vector<8x12xf32>
    %492 = arith.divf %488, %491 : vector<8x12xf32>
    %c0_375 = arith.constant 0 : index
    %c0_376 = arith.constant 0 : index
    %493 = vector.load %arg26[%c0_375, %c0_376] : memref<12x8xf32, #tpu.memory_space<vmem>>, vector<12x8xf32>
    %494 = arith.truncf %492 : vector<8x12xf32> to vector<8x12xbf16>
    %495 = arith.truncf %493 : vector<12x8xf32> to vector<12x8xbf16>
    %cst_377 = arith.constant dense<0.000000e+00> : vector<8x8xf32>
    %496 = tpu.matmul %494, %495, %cst_377 {dimension_numbers = #tpu.dot_dimension_numbers<[1], [0], [0], [1], [0, 0, 1, 1], [], []>} : vector<8x12xbf16>, vector<12x8xbf16>, vector<8x8xf32> -> vector<8x8xf32>
    %497 = vector.extract_strided_slice %496 {offsets = [0, 0], sizes = [2, 8], strides = [1, 1]} : vector<8x8xf32> to vector<2x8xf32>
    %c6_378 = arith.constant 6 : index
    %c0_379 = arith.constant 0 : index
    %498 = vector.load %arg23[%c6_378, %c0_379] : memref<8x32xf32, #tpu.memory_space<vmem>>, vector<2x8xf32>
    tpu.vector_store %arg23[%c6_378, %c0_379], %497 {strides = array<i32>} : memref<8x32xf32, #tpu.memory_space<vmem>>, vector<2x8xf32>,
    %499 = vector.extract_strided_slice %496 {offsets = [2, 0], sizes = [2, 8], strides = [1, 1]} : vector<8x8xf32> to vector<2x8xf32>
    %c6_380 = arith.constant 6 : index
    %c8_381 = arith.constant 8 : index
    %500 = vector.load %arg23[%c6_380, %c8_381] : memref<8x32xf32, #tpu.memory_space<vmem>>, vector<2x8xf32>
    tpu.vector_store %arg23[%c6_380, %c8_381], %499 {strides = array<i32>} : memref<8x32xf32, #tpu.memory_space<vmem>>, vector<2x8xf32>,
    %501 = vector.extract_strided_slice %496 {offsets = [4, 0], sizes = [2, 8], strides = [1, 1]} : vector<8x8xf32> to vector<2x8xf32>
    %c6_382 = arith.constant 6 : index
    %c16_383 = arith.constant 16 : index
    %502 = vector.load %arg23[%c6_382, %c16_383] : memref<8x32xf32, #tpu.memory_space<vmem>>, vector<2x8xf32>
    tpu.vector_store %arg23[%c6_382, %c16_383], %501 {strides = array<i32>} : memref<8x32xf32, #tpu.memory_space<vmem>>, vector<2x8xf32>,
    %503 = vector.extract_strided_slice %496 {offsets = [6, 0], sizes = [2, 8], strides = [1, 1]} : vector<8x8xf32> to vector<2x8xf32>
    %c6_384 = arith.constant 6 : index
    %c24_385 = arith.constant 24 : index
    %504 = vector.load %arg23[%c6_384, %c24_385] : memref<8x32xf32, #tpu.memory_space<vmem>>, vector<2x8xf32>
    tpu.vector_store %arg23[%c6_384, %c24_385], %503 {strides = array<i32>} : memref<8x32xf32, #tpu.memory_space<vmem>>, vector<2x8xf32>,
    %c0_386 = arith.constant 0 : index
    %c0_387 = arith.constant 0 : index
    %505 = vector.load %arg23[%c0_386, %c0_387] : memref<8x32xf32, #tpu.memory_space<vmem>>, vector<8x32xf32>
    %c0_388 = arith.constant 0 : index
    %c0_389 = arith.constant 0 : index
    %c0_390 = arith.constant 0 : index
    %506 = vector.load %arg15[%c0_388, %c0_389, %c0_390] : memref<1x32x32xbf16, #tpu.memory_space<vmem>>, vector<1x32x32xbf16>
    %507 = vector.shape_cast %506 : vector<1x32x32xbf16> to vector<32x32xbf16>
    %508 = arith.truncf %505 : vector<8x32xf32> to vector<8x32xbf16>
    %cst_391 = arith.constant dense<0.000000e+00> : vector<8x32xf32>
    %509 = tpu.matmul %508, %507, %cst_391 {dimension_numbers = #tpu.dot_dimension_numbers<[1], [0], [0], [1], [0, 0, 1, 1], [], []>} : vector<8x32xbf16>, vector<32x32xbf16>, vector<8x32xf32> -> vector<8x32xf32>
    %510 = arith.addf %252, %509 : vector<8x32xf32>
    %c0_392 = arith.constant 0 : index
    %c0_393 = arith.constant 0 : index
    %c0_394 = arith.constant 0 : index
    %511 = vector.load %arg16[%c0_392, %c0_393, %c0_394] : memref<1x1x32xf32, #tpu.memory_space<vmem>>, vector<1x1x32xf32>
    %512 = vector.shape_cast %511 : vector<1x1x32xf32> to vector<1x32xf32>
    %513 = vector.broadcast %512 : vector<1x32xf32> to vector<8x32xf32>
    %514 = arith.addf %510, %513 : vector<8x32xf32>
    %cst_395 = arith.constant dense<0.000000e+00> : vector<8xf32>
    %515 = vector.multi_reduction <add>, %514, %cst_395 [1] : vector<8x32xf32> to vector<8xf32>
    %516 = vector.shape_cast %515 : vector<8xf32> to vector<8x1xf32>
    %cst_396 = arith.constant 3.200000e+01 : f32
    %517 = vector.broadcast %cst_396 : f32 to vector<8x1xf32>
    %518 = arith.divf %516, %517 : vector<8x1xf32>
    %519 = vector.broadcast %518 : vector<8x1xf32> to vector<8x32xf32>
    %520 = arith.subf %514, %519 : vector<8x32xf32>
    %521 = arith.mulf %520, %520 : vector<8x32xf32>
    %cst_397 = arith.constant dense<0.000000e+00> : vector<8xf32>
    %522 = vector.multi_reduction <add>, %521, %cst_397 [1] : vector<8x32xf32> to vector<8xf32>
    %523 = vector.shape_cast %522 : vector<8xf32> to vector<8x1xf32>
    %cst_398 = arith.constant 3.100000e+01 : f32
    %524 = vector.broadcast %cst_398 : f32 to vector<8x1xf32>
    %525 = arith.divf %523, %524 : vector<8x1xf32>
    %526 = math.sqrt %525 : vector<8x1xf32>
    %cst_399 = arith.constant 1.000000e-07 : f32
    %527 = vector.broadcast %cst_399 : f32 to vector<8x1xf32>
    %528 = arith.addf %526, %527 : vector<8x1xf32>
    %529 = tpu.reciprocal %528 {approx = true} : vector<8x1xf32> -> vector<8x1xf32>
    %530 = vector.broadcast %529 : vector<8x1xf32> to vector<8x32xf32>
    %531 = arith.mulf %520, %530 : vector<8x32xf32>
    %c0_400 = arith.constant 0 : index
    %c0_401 = arith.constant 0 : index
    %c0_402 = arith.constant 0 : index
    %532 = vector.load %arg17[%c0_400, %c0_401, %c0_402] : memref<1x32x64xbf16, #tpu.memory_space<vmem>>, vector<1x32x64xbf16>
    %533 = vector.shape_cast %532 : vector<1x32x64xbf16> to vector<32x64xbf16>
    %534 = arith.truncf %531 : vector<8x32xf32> to vector<8x32xbf16>
    %cst_403 = arith.constant dense<0.000000e+00> : vector<8x64xf32>
    %535 = tpu.matmul %534, %533, %cst_403 {dimension_numbers = #tpu.dot_dimension_numbers<[1], [0], [0], [1], [0, 0, 1, 1], [], []>} : vector<8x32xbf16>, vector<32x64xbf16>, vector<8x64xf32> -> vector<8x64xf32>
    %c0_404 = arith.constant 0 : index
    %c0_405 = arith.constant 0 : index
    %c0_406 = arith.constant 0 : index
    %536 = vector.load %arg18[%c0_404, %c0_405, %c0_406] : memref<1x1x64xf32, #tpu.memory_space<vmem>>, vector<1x1x64xf32>
    %537 = vector.shape_cast %536 : vector<1x1x64xf32> to vector<1x64xf32>
    %538 = vector.broadcast %537 : vector<1x64xf32> to vector<8x64xf32>
    %539 = arith.addf %535, %538 : vector<8x64xf32>
    %cst_407 = arith.constant 0.000000e+00 : f32
    %540 = vector.broadcast %cst_407 : f32 to vector<8x64xf32>
    %541 = arith.maximumf %539, %540 : vector<8x64xf32>
    %c0_408 = arith.constant 0 : index
    %c0_409 = arith.constant 0 : index
    %c0_410 = arith.constant 0 : index
    %542 = vector.load %arg19[%c0_408, %c0_409, %c0_410] : memref<1x64x32xbf16, #tpu.memory_space<vmem>>, vector<1x64x32xbf16>
    %543 = vector.shape_cast %542 : vector<1x64x32xbf16> to vector<64x32xbf16>
    %544 = arith.truncf %541 : vector<8x64xf32> to vector<8x64xbf16>
    %cst_411 = arith.constant dense<0.000000e+00> : vector<8x32xf32>
    %545 = tpu.matmul %544, %543, %cst_411 {dimension_numbers = #tpu.dot_dimension_numbers<[1], [0], [0], [1], [0, 0, 1, 1], [], []>} : vector<8x64xbf16>, vector<64x32xbf16>, vector<8x32xf32> -> vector<8x32xf32>
    %546 = arith.addf %514, %545 : vector<8x32xf32>
    %c0_412 = arith.constant 0 : index
    %c0_413 = arith.constant 0 : index
    %c0_414 = arith.constant 0 : index
    %547 = vector.load %arg20[%c0_412, %c0_413, %c0_414] : memref<1x1x32xf32, #tpu.memory_space<vmem>>, vector<1x1x32xf32>
    %548 = vector.shape_cast %547 : vector<1x1x32xf32> to vector<1x32xf32>
    %549 = vector.broadcast %548 : vector<1x32xf32> to vector<8x32xf32>
    %550 = arith.addf %546, %549 : vector<8x32xf32>
    %c0_415 = arith.constant 0 : index
    %c0_416 = arith.constant 0 : index
    %551 = vector.load %arg22[%c0_415, %c0_416] : memref<8x32xf32, #tpu.memory_space<vmem>>, vector<8x32xf32>
    tpu.vector_store %arg22[%c0_415, %c0_416], %550 {strides = array<i32>} : memref<8x32xf32, #tpu.memory_space<vmem>>, vector<8x32xf32>,
    %c1_i32 = arith.constant 1 : i32
    %552 = arith.cmpi eq, %arg1, %c1_i32 : i32
    %553 = arith.extui %552 : i1 to i32
    %c0_i32_417 = arith.constant 0 : i32
    %554 = arith.cmpi ne, %553, %c0_i32_417 : i32
    scf.if %554 {
      %cst_418 = arith.constant dense<0.000000e+00> : vector<8xf32>
      %555 = vector.multi_reduction <add>, %550, %cst_418 [1] : vector<8x32xf32> to vector<8xf32>
      %556 = vector.shape_cast %555 : vector<8xf32> to vector<8x1xf32>
      %cst_419 = arith.constant 3.200000e+01 : f32
      %557 = vector.broadcast %cst_419 : f32 to vector<8x1xf32>
      %558 = arith.divf %556, %557 : vector<8x1xf32>
      %559 = vector.broadcast %558 : vector<8x1xf32> to vector<8x32xf32>
      %560 = arith.subf %550, %559 : vector<8x32xf32>
      %561 = arith.mulf %560, %560 : vector<8x32xf32>
      %cst_420 = arith.constant dense<0.000000e+00> : vector<8xf32>
      %562 = vector.multi_reduction <add>, %561, %cst_420 [1] : vector<8x32xf32> to vector<8xf32>
      %563 = vector.shape_cast %562 : vector<8xf32> to vector<8x1xf32>
      %cst_421 = arith.constant 3.100000e+01 : f32
      %564 = vector.broadcast %cst_421 : f32 to vector<8x1xf32>
      %565 = arith.divf %563, %564 : vector<8x1xf32>
      %566 = math.sqrt %565 : vector<8x1xf32>
      %cst_422 = arith.constant 1.000000e-07 : f32
      %567 = vector.broadcast %cst_422 : f32 to vector<8x1xf32>
      %568 = arith.addf %566, %567 : vector<8x1xf32>
      %569 = tpu.reciprocal %568 {approx = true} : vector<8x1xf32> -> vector<8x1xf32>
      %570 = vector.broadcast %569 : vector<8x1xf32> to vector<8x32xf32>
      %571 = arith.mulf %560, %570 : vector<8x32xf32>
      %c0_423 = arith.constant 0 : index
      %c0_424 = arith.constant 0 : index
      %572 = vector.load %arg6[%c0_423, %c0_424] : memref<2x32xf32, #tpu.memory_space<vmem>>, vector<1x32xf32>
      %573 = vector.broadcast %572 : vector<1x32xf32> to vector<8x32xf32>
      %574 = arith.mulf %571, %573 : vector<8x32xf32>
      %c1 = arith.constant 1 : index
      %c0_425 = arith.constant 0 : index
      %575 = vector.load %arg6[%c1, %c0_425] : memref<2x32xf32, #tpu.memory_space<vmem>>, vector<1x32xf32>
      %576 = vector.broadcast %575 : vector<1x32xf32> to vector<8x32xf32>
      %577 = arith.addf %574, %576 : vector<8x32xf32>
      %c0_426 = arith.constant 0 : index
      %c0_427 = arith.constant 0 : index
      %c0_428 = arith.constant 0 : index
      %578 = vector.load %arg21[%c0_426, %c0_427, %c0_428] : memref<1x8x32xf32, #tpu.memory_space<vmem>>, vector<1x8x32xf32>
      %579 = vector.shape_cast %578 : vector<1x8x32xf32> to vector<8x32xf32>
      %580 = vector.shape_cast %577 : vector<8x32xf32> to vector<1x8x32xf32>
      tpu.vector_store %arg21[%c0_426, %c0_427, %c0_428], %580 {strides = array<i32>} : memref<1x8x32xf32, #tpu.memory_space<vmem>>, vector<1x8x32xf32>,
    } else {
    }
    return
  }
  func.func @transform_0(%arg0: i32, %arg1: i32) -> (i32, i32, i32) {
    %c0_i32 = arith.constant 0 : i32
    %c0_i32_0 = arith.constant 0 : i32
    %c0_i32_1 = arith.constant 0 : i32
    return %arg0, %c0_i32, %c0_i32_0 : i32, i32, i32
  }
  func.func @transform_1(%arg0: i32, %arg1: i32) -> (i32, i32, i32) {
    %c0_i32 = arith.constant 0 : i32
    %c0_i32_0 = arith.constant 0 : i32
    %c0_i32_1 = arith.constant 0 : i32
    return %arg0, %c0_i32, %c0_i32_0 : i32, i32, i32
  }
  func.func @transform_2(%arg0: i32, %arg1: i32) -> (i32, i32, i32) {
    %c0_i32 = arith.constant 0 : i32
    %c0_i32_0 = arith.constant 0 : i32
    %c0_i32_1 = arith.constant 0 : i32
    return %arg0, %c0_i32, %c0_i32_0 : i32, i32, i32
  }
  func.func @transform_3(%arg0: i32, %arg1: i32) -> (i32, i32, i32) {
    %c0_i32 = arith.constant 0 : i32
    %c0_i32_0 = arith.constant 0 : i32
    %c0_i32_1 = arith.constant 0 : i32
    return %arg0, %c0_i32, %c0_i32_0 : i32, i32, i32
  }
  func.func @transform_4(%arg0: i32, %arg1: i32) -> (i32, i32) {
    %c0_i32 = arith.constant 0 : i32
    %c0_i32_0 = arith.constant 0 : i32
    %c0_i32_1 = arith.constant 0 : i32
    return %c0_i32, %c0_i32_0 : i32, i32
  }
  func.func @transform_5(%arg0: i32, %arg1: i32) -> (i32, i32, i32) {
    %c0_i32 = arith.constant 0 : i32
    %c0_i32_0 = arith.constant 0 : i32
    %c0_i32_1 = arith.constant 0 : i32
    return %arg1, %c0_i32, %c0_i32_0 : i32, i32, i32
  }
  func.func @transform_6(%arg0: i32, %arg1: i32) -> (i32, i32, i32) {
    %c0_i32 = arith.constant 0 : i32
    %c0_i32_0 = arith.constant 0 : i32
    %c0_i32_1 = arith.constant 0 : i32
    return %arg1, %c0_i32, %c0_i32_0 : i32, i32, i32
  }
  func.func @transform_7(%arg0: i32, %arg1: i32) -> (i32, i32, i32) {
    %c0_i32 = arith.constant 0 : i32
    %c0_i32_0 = arith.constant 0 : i32
    %c0_i32_1 = arith.constant 0 : i32
    return %arg1, %c0_i32, %c0_i32_0 : i32, i32, i32
  }
  func.func @transform_8(%arg0: i32, %arg1: i32) -> (i32, i32, i32) {
    %c0_i32 = arith.constant 0 : i32
    %c0_i32_0 = arith.constant 0 : i32
    %c0_i32_1 = arith.constant 0 : i32
    return %arg1, %c0_i32, %c0_i32_0 : i32, i32, i32
  }
  func.func @transform_9(%arg0: i32, %arg1: i32) -> (i32, i32, i32) {
    %c0_i32 = arith.constant 0 : i32
    %c0_i32_0 = arith.constant 0 : i32
    %c0_i32_1 = arith.constant 0 : i32
    return %arg1, %c0_i32, %c0_i32_0 : i32, i32, i32
  }
  func.func @transform_10(%arg0: i32, %arg1: i32) -> (i32, i32, i32) {
    %c0_i32 = arith.constant 0 : i32
    %c0_i32_0 = arith.constant 0 : i32
    %c0_i32_1 = arith.constant 0 : i32
    return %arg1, %c0_i32, %c0_i32_0 : i32, i32, i32
  }
  func.func @transform_11(%arg0: i32, %arg1: i32) -> (i32, i32, i32) {
    %c0_i32 = arith.constant 0 : i32
    %c0_i32_0 = arith.constant 0 : i32
    %c0_i32_1 = arith.constant 0 : i32
    return %arg1, %c0_i32, %c0_i32_0 : i32, i32, i32
  }
  func.func @transform_12(%arg0: i32, %arg1: i32) -> (i32, i32, i32) {
    %c0_i32 = arith.constant 0 : i32
    %c0_i32_0 = arith.constant 0 : i32
    %c0_i32_1 = arith.constant 0 : i32
    return %arg1, %c0_i32, %c0_i32_0 : i32, i32, i32
  }
  func.func @transform_13(%arg0: i32, %arg1: i32) -> (i32, i32, i32) {
    %c0_i32 = arith.constant 0 : i32
    %c0_i32_0 = arith.constant 0 : i32
    %c0_i32_1 = arith.constant 0 : i32
    return %arg1, %c0_i32, %c0_i32_0 : i32, i32, i32
  }
  func.func @transform_14(%arg0: i32, %arg1: i32) -> (i32, i32, i32) {
    %c0_i32 = arith.constant 0 : i32
    %c0_i32_0 = arith.constant 0 : i32
    %c0_i32_1 = arith.constant 0 : i32
    return %arg1, %c0_i32, %c0_i32_0 : i32, i32, i32
  }
  func.func @transform_15(%arg0: i32, %arg1: i32) -> (i32, i32, i32) {
    %c0_i32 = arith.constant 0 : i32
    %c0_i32_0 = arith.constant 0 : i32
    %c0_i32_1 = arith.constant 0 : i32
    return %arg1, %c0_i32, %c0_i32_0 : i32, i32, i32
  }
  func.func @transform_16(%arg0: i32, %arg1: i32) -> (i32, i32, i32) {
    %c0_i32 = arith.constant 0 : i32
    %c0_i32_0 = arith.constant 0 : i32
    %c0_i32_1 = arith.constant 0 : i32
    return %arg1, %c0_i32, %c0_i32_0 : i32, i32, i32
  }
  func.func @transform_17(%arg0: i32, %arg1: i32) -> (i32, i32, i32) {
    %c0_i32 = arith.constant 0 : i32
    %c0_i32_0 = arith.constant 0 : i32
    %c0_i32_1 = arith.constant 0 : i32
    return %arg1, %c0_i32, %c0_i32_0 : i32, i32, i32
  }
  func.func @transform_18(%arg0: i32, %arg1: i32) -> (i32, i32, i32) {
    %c0_i32 = arith.constant 0 : i32
    %c0_i32_0 = arith.constant 0 : i32
    %c0_i32_1 = arith.constant 0 : i32
    return %arg1, %c0_i32, %c0_i32_0 : i32, i32, i32
  }
  func.func @transform_19(%arg0: i32, %arg1: i32) -> (i32, i32, i32) {
    %c0_i32 = arith.constant 0 : i32
    %c0_i32_0 = arith.constant 0 : i32
    %c0_i32_1 = arith.constant 0 : i32
    return %arg0, %c0_i32, %c0_i32_0 : i32, i32, i32
  }
}

</mosaic_0001>

<bundles_post_ra>
// kernel: decoder_block_forward.1
= control target key start
LH: loop header
LB: loop body
LE: loop exit
PB: predicated region body
PF: predicated region fallthrough
CT: control target
= control target key end

     0   :  { %s3661_s0 = inlined_call_operand.vmem [shape: f32[2,8,32], index: 0, kind: input, shape index: {}]   ;;  %s3662_s1 = inlined_call_operand.vmem [shape: bf16[2,12,32], index: 1, kind: input, shape index: {}]   ;;  %s3663_s2 = inlined_call_operand.vmem [shape: f32[2,8,8], index: 2, kind: input, shape index: {}]   ;;  %s3664_s3 = inlined_call_operand.vmem [shape: f32[2,1,12], index: 3, kind: input, shape index: {}]   ;;  %s3665_s4 = inlined_call_operand.vmem [shape: f32[2,32], index: 4, kind: input, shape index: {}]   ;;  %s3666_s5 = inlined_call_operand.vmem [shape: bf16[2,32,96], index: 5, kind: input, shape index: {}]   ;;  %s3667_s6 = inlined_call_operand.vmem [shape: f32[2,1,96], index: 6, kind: input, shape index: {}]   ;;  %s3668_s7 = inlined_call_operand.vmem [shape: bf16[2,32,32], index: 7, kind: input, shape index: {}]   ;;  %s3669_s8 = inlined_call_operand.vmem [shape: f32[2,1,32], index: 8, kind: input, shape index: {}]   ;;  %s3670_s9 = inlined_call_operand.vmem [shape: bf16[2,32,32], index: 9, kind: input, shape index: {}]   ;;  %s3671_s10 = inlined_call_operand.vmem [shape: f32[2,1,32], index: 10, kind: input, shape index: {}]   ;;  %s3672_s11 = inlined_call_operand.vmem [shape: bf16[2,32,64], index: 11, kind: input, shape index: {}]   ;;  %s3673_s12 = inlined_call_operand.vmem [shape: f32[2,1,64], index: 12, kind: input, shape index: {}]   ;;  %s3674_s13 = inlined_call_operand.vmem [shape: bf16[2,32,32], index: 13, kind: input, shape index: {}]   ;;  %s3675_s14 = inlined_call_operand.vmem [shape: f32[2,1,32], index: 14, kind: input, shape index: {}]   ;;  %s3676_s15 = inlined_call_operand.vmem [shape: bf16[2,32,64], index: 15, kind: input, shape index: {}]   ;;  %s3677_s16 = inlined_call_operand.vmem [shape: f32[2,1,64], index: 16, kind: input, shape index: {}]   ;;  %s3678_s17 = inlined_call_operand.vmem [shape: bf16[2,64,32], index: 17, kind: input, shape index: {}]   ;;  %s3679_s18 = inlined_call_operand.vmem [shape: f32[2,1,32], index: 18, kind: input, shape index: {}]   ;;  %s3680_s19 = inlined_call_operand.hbm [shape: f32[2,8,32], index: 19, kind: output, shape index: {}]  }
   0x1   :  { %3700 = sst [smem:[#allocation26_spill]] %s3661_s0 }
   0x2   :  { %3701 = sst [smem:[#allocation27_spill]] %s3662_s1 }
   0x3   :  { %3702 = sst [smem:[#allocation28_spill]] %s3663_s2 }
   0x4   :  { %3703 = sst [smem:[#allocation29_spill]] %s3664_s3 }
   0x5   :  { %3704 = sst [smem:[#allocation30_spill]] %s3665_s4 }
   0x6   :  { %3705 = sst [smem:[#allocation31_spill]] %s3666_s5 }
   0x7   :  { %3706 = sst [smem:[#allocation32_spill]] %s3668_s7 }
   0x8   :  { %3707 = sst [smem:[#allocation33_spill]] %s3669_s8 }
   0x9   :  { %3708 = sst [smem:[#allocation34_spill]] %s3670_s9 }
   0xa   :  { %3709 = sst [smem:[#allocation35_spill]] %s3671_s10 }
   0xb   :  { %3710 = sst [smem:[#allocation36_spill]] %s3672_s11 }
   0xc   :  { %3711 = sst [smem:[#allocation37_spill]] %s3673_s12 }
   0xd   :  { %3712 = sst [smem:[#allocation38_spill]] %s3674_s13 }
   0xe   :  { %3713 = sst [smem:[#allocation39_spill]] %s3676_s15 }
   0xf   :  { %3714 = sst [smem:[#allocation40_spill]] %s3677_s16 }
  0x10   :  { %3715 = sst [smem:[#allocation41_spill]] %s3678_s17 }
  0x11   :  { %3716 = sst [smem:[#allocation42_spill]] %s3679_s18 }
  0x12   :  { %3717 = sst [smem:[#allocation43_spill]] %s3680_s19 }
  0x13   :  { %24 = vsyncpa [#allocation8], 0 }
  0x14   :  { %26 = vsyncpa [#allocation8 + $0x1], 0  ;;  %s3000_s0 = smov 0   ;;  %s3002_s30 = smov 0  }
  0x15   :  { %s3004_s20 = smov 0   ;;  %s3006_s21 = smov 0  }
  0x16   :  { %s3008_s1 = smov 0   ;;  %s3010_s22 = smov 0  }
  0x17   :  { %s3012_s2 = smov 0   ;;  %s3014_s23 = smov 0  }
  0x18 LB: > { %3718 = sst [smem:[#allocation10_spill]] %s2854_s0  ;;  %s2493_s24 = sadd.s32 4294967295, %s2882_s23   ;;  %s2882_s23 = sphi %s3014_s23, %s32_s23   ;;  %s2878_s2 = sphi %s3012_s2, %s3785_s2   ;;  %s2874_s22 = sphi %s3010_s22, %s3784_s22   ;;  %s2870_s1 = sphi %s3008_s1, %s3783_s1   ;;  %s2866_s21 = sphi %s3006_s21, %s3782_s21   ;;  %s2862_s20 = sphi %s3004_s20, %s3781_s20   ;;  %s2858_s30 = sphi %s3002_s30, %s3780_s30   ;;  %s2854_s0 = sphi %s3000_s0, %s3779_s0  }
  0x19   : > { %3719 = sst [smem:[#allocation11_spill]] %s2858_s30  ;;  %s2494_s25 = sadd.s32 4294967294, %s2882_s23  }
  0x1a   : > { %3720 = sst [smem:[#allocation12_spill]] %s2862_s20  ;;  %s41_s3 = sadd.s32 1, %s2874_s22 }
  0x1b   : > { %3721 = sst [smem:[#allocation13_spill]] %s2866_s21  ;;  %p42_p0 = scmp.ge.s32.totalorder %s41_s3, 2 }
  0x1c   : > { %3722 = sst [smem:[#allocation14_spill]] %s2870_s1  ;;  %s44_s26 = sadd.s32 1, %s2878_s2 }
  0x1d   : > { %3723 = sst [smem:[#allocation15_spill]] %s2874_s22  ;;  %p550_p1 = scmp.ne.s32.totalorder %s2862_s20, %s2858_s30 }
  0x1e   : > { %3724 = sst [smem:[#allocation16_spill]] %s2878_s2  ;;  %p551_p2 = scmp.eq.s32.totalorder %s2493_s24, 3 }
  0x1f   : > { %3725 = sst [smem:[#allocation17_spill]] %s2882_s23  ;;  %s3787_s3 = smov (%p42_p0, %s41_s3), 0 }
  0x20   : > { %3726 = sst [smem:[#allocation18_spill]] %s3787_s3  ;;  %s3789_s26 = smov (!%p42_p0, %s44_s26), %s2878_s2 }
  0x21   : > { %p3049_p3 = por %p551_p2, %p550_p1  ;;  %p556_p4 = scmp.ne.s32.totalorder %s2858_s30, %s2854_s0 }
  0x22   : > { %p46_p5 = scmp.ge.s32.totalorder %s3789_s26, 2  ;;  %p557_p6 = scmp.eq.s32.totalorder %s2494_s25, 3 }
  0x23   : > { %s3727_s27 = scalar_select %p3049_p3, 1, 0 }
  0x24   : > { %p2497_p7 = scmp.ge.s32.totalorder %s2882_s23, 1  ;;  %p704_p8 = scmp.lt.s32.totalorder %s2882_s23, 5 }
  0x25   : > { %3728 = sst [smem:[#allocation19_spill]] %s3727_s27  ;;  %s3791_s26 = smov (%p46_p5, %s3789_s26), 0 }
  0x26   : > { %3729 = sst [smem:[#allocation20_spill]] %s3791_s26  ;;  %p3059_p9 = por %p557_p6, %p556_p4 }
  0x27   : > { %p705_p10 = pnand %p2497_p7, %p704_p8  ;;  %s537_s29 = ssub.s32 %s2878_s2, %s3791_s26 }
  0x28   : > { %s3730_s28 = scalar_select %p3059_p9, 1, 0 }
  0x29   : > { %s540_s24 = sadd.s32 1, %s2862_s20  ;;  %p538_p11 = scmp.eq.s32.totalorder %s537_s29, 0 }
  0x2a   : > { %3731 = sst [smem:[#allocation21_spill]] %s3730_s28  ;;  %708 = sbr.rel (%p705_p10) target bundleno = 3704 (0xe78), region = 96 }
  0x2b   : > { %s3067_s3 = scalar_select %p538_p11, %s2862_s20, %s540_s24  }
  0x2d   : > { %3732 = sst [smem:[#allocation22_spill]] %s3067_s3 }
  0x2f   : > { %s3685_s25 = sand.u32 1, %s2858_s30   ;;  %p827_p12 = scmp.lt.s32.totalorder %s2870_s1, 1 }
  0x30   : > { %s3073_s22 = sshll.u32 %s3685_s25, 3  ;;  %p843_p13 = scmp.lt.s32.totalorder %s2866_s21, 1 }
  0x31   : > { %s3077_s28 = scalar_select %p827_p12, %s2870_s1, 1 }
  0x32   : > { %s3080_s29 = scalar_select %p843_p13, %s2866_s21, 1 }
  0x33   : > { %3733 = sst [smem:[#allocation23_spill]] %s3077_s28  ;;  %s3083_s24 = sshll.u32 %s3077_s28, 3 }
  0x34   : > { %s3735_s23 = sld [smem:[#allocation26_spill]]  ;;  %s2615_s26 = sshll.u32 %s3080_s29, 4 }
  0x35   : > { %s3736_s1 = sld [smem:[#allocation27_spill]]  ;;  %s2621_s30 = sshll.u32 %s3080_s29, 5 }
  0x36   : > { %s3738_s5 = sld [smem:[#allocation31_spill]]  ;;  %s826_s2 = scalar_lea.vmem [#allocation7], %s3073_s22 }
  0x37   : > { %s3739_s7 = sld [smem:[#allocation32_spill]] }
  0x38   : > { %s3741_s9 = sld [smem:[#allocation34_spill]] }
  0x39   : > { %s3744_s11 = sld [smem:[#allocation36_spill]] }
  0x3a   : > { %s830_s19 = scalar_lea.vmem %s3735_s23, %s3083_s24  ;;  %s3746_s13 = sld [smem:[#allocation38_spill]] }
  0x3b   : > { %s3097_s4 = scalar_lea.vmem %s3736_s1, %s3083_s24  ;;  %s3748_s28 = sld [smem:[#allocation39_spill]] }
  0x3c   : > { %s3107_s3 = scalar_lea.vmem %s3738_s5, %s2615_s26  ;;  %s3750_s12 = sld [smem:[#allocation42_spill]] }
  0x3d   : > { %s3116_s1 = scalar_lea.vmem %s3739_s7, %s2615_s26  ;;  %s3752_s21 = sld [smem:[#allocation13_spill]] }
  0x3e   : > { %s3125_s15 = scalar_lea.vmem %s3741_s9, %s2615_s26  ;;  %s882_s9 = scalar_lea.vmem %s3675_s14, %s3080_s29 }
  0x3f   : > { %3742 = sst [smem:[#allocation24_spill]] %s3125_s15  ;;  %s3134_s23 = scalar_lea.vmem %s3744_s11, %s2615_s26 }
  0x40   : > { %s3143_s18 = scalar_lea.vmem %s3746_s13, %s2615_s26  ;;  %s3749_s11 = sld [smem:[#allocation40_spill]] }
  0x41   : > { %3747 = sst [smem:[#allocation25_spill]] %s3143_s18  ;;  %s3152_s10 = scalar_lea.vmem %s3748_s28, %s2615_s26 }
  0x42   : > { %s898_s25 = scalar_lea.vmem %s3750_s12, %s3080_s29  ;;  %s3751_s18 = sld [smem:[#allocation41_spill]] }
  0x43   : > { %p2517_p0 = scmp.ne.s32.totalorder %s3752_s21, 0 }
  0x45   : > { %903 = sbr.rel (%p2517_p0) target bundleno = 76 (0x4c), region = 100 }
  0x46   : > { %s890_s15 = scalar_lea.vmem %s3749_s11, %s3080_s29 }
  0x48   : > { %s3166_s8 = scalar_lea.vmem %s3751_s18, %s2621_s30 }
  0x4a   : > { %v904_v0 = vld [vmem:[%s830_s19] sm:$0xff]  ;;  %vm905_vm0 = vcmask 261120  }
  0x4b   : > { %906 = vst.msk [vmem:[#allocation2] sm:$0xff] %vm905_vm0, %v904_v0 }
  0x4c PF: > { %vm908_vm1 = vcmask 261120   ;;  %v2884_v3 = vmov 32.0   ;;  %v2885_v15 = vmov 31.0   ;;  %v2623_v16 = vld [vmem:[%s3107_s3 + $0x8] sm:$0xff]  ;;  %v2622_v18 = vld [vmem:[%s3107_s3] sm:$0xff]  ;;  %s3753_s12 = scalar_lea.vmem %s3667_s6, %s3080_s29  ;;  %vm986_vm6 = vcmask 58368  }
  0x4d   : > { %2734 = vrcp.f32 %v2884_v3  ;;  %978 = vmatpush.bf16.msra.mxu0 %v2623_v16  ;;  %v2726_v40 = vld [vmem:[%s3753_s12] ss:$0 sm:$0xff]  ;;  %s2886_s13 = smov 120   ;;  %s2887_s19 = smov 80   ;;  %vm1123_vm7 = vcmask 60418   ;;  %vm1037_vm8 = vcmask 64512  }
  0x4e   : > { %2736 = vrcp.f32 %v2885_v15  ;;  %s2888_s28 = smov 96   ;;  %s2889_s26 = smov 72   ;;  %vm1221_vm9 = vcmask 62468   ;;  %vm1319_vm10 = vcmask 64518   ;;  %vm1089_vm15 = vcmask 1043456  }
  0x4f   : > { %s2890_s3 = smov 88   ;;  %s2891_s18 = smov 104  }
  0x50   : > { %s2892_s5 = smov 112   ;;  %s2893_s16 = smov 64  }
  0x51   : > { %979 = vmatpush.bf16.msra.mxu0 %v2622_v18  ;;  %s3754_s30 = sld [smem:[#allocation28_spill]]  ;;  %s2895_s17 = smov 48  }
  0x52   : > { %v3170_v1 = vld [vmem:[#allocation2] sm:$0xff]  ;;  %s2896_s21 = smov 56   ;;  %s2897_s7 = smov 16  }
  0x53   : > { %v909_v2 = vsel %vm908_vm1, %v3170_v1, 0.0  ;;  %v2735_v4 = vpop.eup %2734  ;;  %s2898_s11 = smov 8   ;;  %s2899_s12 = smov 24  }
  0x54   : > { %910 = vadd.xlane.f32.xlu0 %v909_v2  ;;  %v913_v5 = vmul.f32 32.0, %v2735_v4  ;;  %vm917_vm2 = vweird.f32 %v2735_v4  ;;  %v2737_v17 = vpop.eup %2736  ;;  %s3756_s0 = sld [smem:[#allocation33_spill]] }
  0x55   : > { %v926_v19 = vmul.f32 31.0, %v2737_v17  ;;  %vm930_vm3 = vweird.f32 %v2737_v17 }
  0x56   : > { %v914_v6 = vsub.f32 1.0, %v913_v5 }
  0x57   : > { %v927_v20 = vsub.f32 1.0, %v926_v19  ;;  %s3755_s27 = scalar_lea.vmem %s3754_s30, %s3083_s24  ;;  %s2894_s24 = smov 40  }
  0x58   : > { %v915_v7 = vmul.f32 %v2735_v4, %v914_v6  ;;  %s3758_s30 = sld [smem:[#allocation24_spill]] }
  0x59   : > { %v928_v21 = vmul.f32 %v2737_v17, %v927_v20 }
  0x5a   : > { %v916_v8 = vadd.f32 %v2735_v4, %v915_v7  ;;  %s3757_s20 = scalar_lea.vmem %s3756_s0, %s3080_s29  ;;  %s3764_s0 = sld [smem:[#allocation29_spill]] }
  0x5b   : > { %v929_v22 = vadd.f32 %v2737_v17, %v928_v21 }
  0x5c   : > { %v3174_v9 = vsel %vm917_vm2, %v2735_v4, %v916_v8 }
  0x5d   : > { %v3181_v23 = vsel %vm930_vm3, %v2737_v17, %v929_v22 }
  0xc7   : > { %v911_v10 = vpop.xlane.xlu0 %910 }
  0xc8   : > { %v919_v11 = vmul.f32 %v3174_v9, %v911_v10 }
  0xca   : > { %v920_v12 = vsub.f32 %v3170_v1, %v919_v11  ;;  %v985_v11 = vld [vmem:[%s3755_s27] sm:$0xff]  ;;  %s3759_s27 = sld [smem:[#allocation37_spill]] }
  0xcc   : > { %v921_v13 = vmul.f32 %v920_v12, %v920_v12 }
  0xce   : > { %v922_v14 = vsel %vm908_vm1, %v921_v13, 0.0 }
  0xcf   : > { %923 = vadd.xlane.f32.xlu0 %v922_v14 }
 0x142   : > { %v924_v24 = vpop.xlane.xlu0 %923 }
 0x143   : > { %v932_v25 = vmul.f32 %v3181_v23, %v924_v24 }
 0x145   : > { %2738 = vrsqrt.f32 %v932_v25  ;;  %vm940_vm4 = vcmp.eq.f32.partialorder %v932_v25, inf  ;;  %v943_v33 = vand.u32 2147483648, %v932_v25  ;;  %vm942_vm5 = vcmp.eq.f32.partialorder %v932_v25, 0.0 }
 0x14b   : > { %v2739_v26 = vpop.eup %2738 }
 0x14c   : > { %v934_v27 = vmul.f32 %v2739_v26, %v932_v25 }
 0x14e   : > { %v935_v28 = vmul.f32 %v2739_v26, %v934_v27 }
 0x150   : > { %v936_v29 = vmul.f32 0.5, %v935_v28 }
 0x152   : > { %v937_v30 = vsub.f32 1.5, %v936_v29 }
 0x154   : > { %v938_v31 = vmul.f32 %v2739_v26, %v937_v30 }
 0x156   : > { %v939_v32 = vmul.f32 %v938_v31, %v932_v25 }
 0x158   : > { %v941_v34 = vsel %vm940_vm4, %v932_v25, %v939_v32 }
 0x159   : > { %v944_v35 = vsel %vm942_vm5, %v943_v33, %v941_v34 }
 0x15a   : > { %v945_v36 = vadd.f32 1e-07, %v944_v35 }
 0x15c   : > { %2740 = vrcp.f32 %v945_v36 }
 0x162   : > { %v2741_v37 = vpop.eup %2740 }
 0x163   : > { %v947_v38 = vmul.f32 %v2741_v37, %v920_v12 }
 0x165   : > { %v952_v39 = vpack.c.bf16 %v947_v38, %v947_v38 }
 0x167   : > { %2526 = vmatmul.msk.bf16.vlgmr.msra.gmra.mxu0 %vm908_vm1, %v952_v39 }
 0x1e4   : > { %v981_v41 = vpop.f32.mrf.mxu0 }
 0x1e5   : > { %v3190_v42 = vadd.f32 %v2726_v40, %v981_v41 }
 0x1e7   : > { %987 = vst.msk [vmem:[#allocation4] sm:$0x3] %vm986_vm6, %v3190_v42  ;;  %989 = vrot.lane.b32.xlu0 %v3190_v42, %s2886_s13  ;;  %1017 = vrot.lane.b32.xlu2 %v3190_v42, %s2887_s19 }
 0x1e8   : > { %1001 = vrot.lane.b32.xlu1 %v3190_v42, %s2888_s28 }
 0x1ec   : > { %v983_v43 = vpop.f32.mrf.mxu0 }
 0x1ef   : > { %1025 = vrot.lane.b32.xlu2 %v3190_v42, %s2889_s26 }
 0x1f0   : > { %1009 = vrot.lane.b32.xlu1 %v3190_v42, %s2890_s3 }
 0x1f7   : > { %997 = vrot.lane.b32.xlu2 %v3190_v42, %s2891_s18 }
 0x1f8   : > { %993 = vrot.lane.b32.xlu1 %v3190_v42, %s2892_s5 }
 0x1ff   : > { %1005 = vrot.lane.b32.xlu2 %v3190_v42, %s2893_s16 }
 0x241   : > { %v1018_v44 = vpop.permute.xlu2 %1017 }
 0x242   : > { %1020 = vst.msk [vmem:[#allocation5 + $0x4] sm:$0x3] %vm986_vm6, %v1018_v44 }
 0x249   : > { %v1026_v45 = vpop.permute.xlu2 %1025 }
 0x24a   : > { %1028 = vst.msk [vmem:[#allocation5 + $0x6] sm:$0x3] %vm986_vm6, %v1026_v45 }
 0x251   : > { %v3211_v46 = vpop.permute.xlu2 %997 }
 0x252   : > { %1000 = vst.msk [vmem:[#allocation4 + $0x6] sm:$0x3] %vm986_vm6, %v3211_v46 }
 0x259   : > { %v990_v47 = vpop.permute.xlu0 %989  ;;  %v3215_v48 = vpop.permute.xlu2 %1005 }
 0x25a   : > { %992 = vst.msk [vmem:[#allocation4 + $0x2] sm:$0x3] %vm986_vm6, %v990_v47  ;;  %v1002_v49 = vpop.permute.xlu1 %1001 }
 0x25b   : > { %1008 = vst.msk [vmem:[#allocation6] sm:$0x3] %vm986_vm6, %v3215_v48 }
 0x25c   : > { %1004 = vst.msk [vmem:[#allocation5] sm:$0x3] %vm986_vm6, %v1002_v49 }
 0x262   : > { %v1010_v50 = vpop.permute.xlu1 %1009 }
 0x263   : > { %1012 = vst.msk [vmem:[#allocation5 + $0x2] sm:$0x3] %vm986_vm6, %v1010_v50 }
 0x26a   : > { %v1034_v51 = vld [vmem:[#allocation5] sm:$0xff]  ;;  %v994_v53 = vpop.permute.xlu1 %993 }
 0x26b   : > { %1128 = vst.msk [vmem:[#allocation5 - $0x2] sm:$0xc] %vm1123_vm7, %v1002_v49  ;;  %v1036_v52 = vpack.c.bf16 %v1034_v51, %v1034_v51 }
 0x26c   : > { %1130 = vst.msk [vmem:[#allocation5] sm:$0xc] %vm1123_vm7, %v1010_v50 }
 0x26d   : > { %1132 = vst.msk [vmem:[#allocation5 + $0x2] sm:$0xc] %vm1123_vm7, %v1018_v44  ;;  %v1042_v54 = vsel %vm1037_vm8, %v1036_v52, 0 }
 0x26e   : > { %1134 = vst.msk [vmem:[#allocation5 + $0x4] sm:$0xc] %vm1123_vm7, %v1026_v45  ;;  %1051 = vmatpush.bf16.xpose.msra.mxu1 %v1042_v54 }
 0x26f   : > { %996 = vst.msk [vmem:[#allocation4 + $0x4] sm:$0x3] %vm986_vm6, %v994_v53 }
 0x275   : > { %v1137_v55 = vld [vmem:[#allocation5] sm:$0xff] }
 0x276   : > { %1226 = vst.msk [vmem:[#allocation5 - $0x4] sm:$0x30] %vm1221_vm9, %v1002_v49  ;;  %v1033_v56 = vld [vmem:[#allocation4] sm:$0xff]  ;;  %v1139_v57 = vpack.c.bf16 %v1137_v55, %v1137_v55 }
 0x277   : > { %1228 = vst.msk [vmem:[#allocation5 - $0x2] sm:$0x30] %vm1221_vm9, %v1010_v50  ;;  %v1035_v58 = vpack.c.bf16 %v1033_v56, %v1033_v56 }
 0x278   : > { %1230 = vst.msk [vmem:[#allocation5] sm:$0x30] %vm1221_vm9, %v1018_v44  ;;  %v1144_v59 = vsel %vm1037_vm8, %v1139_v57, 0 }
 0x279   : > { %1232 = vst.msk [vmem:[#allocation5 + $0x2] sm:$0x30] %vm1221_vm9, %v1026_v45  ;;  %2527 = vmatmul.msk.bf16.vlgmr.msra.gmra.mxu1 %vm1037_vm8, %v1035_v58  ;;  %1153 = vmatpush.bf16.xpose.msra.mxu3 %v1144_v59 }
 0x27a   : > { %1124 = vst.msk [vmem:[#allocation4 - $0x2] sm:$0xc] %vm1123_vm7, %v3190_v42 }
 0x27b   : > { %1125 = vst.msk [vmem:[#allocation4] sm:$0xc] %vm1123_vm7, %v990_v47 }
 0x27c   : > { %1126 = vst.msk [vmem:[#allocation4 + $0x2] sm:$0xc] %vm1123_vm7, %v994_v53 }
 0x27d   : > { %1127 = vst.msk [vmem:[#allocation4 + $0x4] sm:$0xc] %vm1123_vm7, %v3211_v46 }
 0x280   : > { %v1235_v60 = vld [vmem:[#allocation5] sm:$0xff] }
 0x281   : > { %1324 = vst.msk [vmem:[#allocation5 - $0x6] sm:$0xc0] %vm1319_vm10, %v1002_v49  ;;  %v1237_v61 = vpack.c.bf16 %v1235_v60, %v1235_v60 }
 0x282   : > { %1326 = vst.msk [vmem:[#allocation5 - $0x4] sm:$0xc0] %vm1319_vm10, %v1010_v50 }
 0x283   : > { %1328 = vst.msk [vmem:[#allocation5 - $0x2] sm:$0xc0] %vm1319_vm10, %v1018_v44  ;;  %v1242_v62 = vsel %vm1037_vm8, %v1237_v61, 0 }
 0x284   : > { %1330 = vst.msk [vmem:[#allocation5] sm:$0xc0] %vm1319_vm10, %v1026_v45  ;;  %v1136_v63 = vld [vmem:[#allocation4] sm:$0xff]  ;;  %1251 = vmatpush.bf16.xpose.msrb.mxu0 %v1242_v62 }
 0x285   : > { %1222 = vst.msk [vmem:[#allocation4 - $0x4] sm:$0x30] %vm1221_vm9, %v3190_v42  ;;  %v1138_v0 = vpack.c.bf16 %v1136_v63, %v1136_v63 }
 0x286   : > { %1223 = vst.msk [vmem:[#allocation4 - $0x2] sm:$0x30] %vm1221_vm9, %v990_v47 }
 0x287   : > { %1224 = vst.msk [vmem:[#allocation4] sm:$0x30] %vm1221_vm9, %v994_v53  ;;  %2529 = vmatmul.msk.bf16.vlgmr.msra.gmra.mxu3 %vm1037_vm8, %v1138_v0 }
 0x288   : > { %1225 = vst.msk [vmem:[#allocation4 + $0x2] sm:$0x30] %vm1221_vm9, %v3211_v46 }
 0x28b   : > { %v1333_v2 = vld [vmem:[#allocation5] sm:$0xff] }
 0x28c   : > { %v1335_v3 = vpack.c.bf16 %v1333_v2, %v1333_v2 }
 0x28e   : > { %v1340_v4 = vsel %vm1037_vm8, %v1335_v3, 0 }
 0x28f   : > { %v1234_v5 = vld [vmem:[#allocation4] sm:$0xff]  ;;  %1349 = vmatpush.bf16.xpose.msrb.mxu3 %v1340_v4 }
 0x290   : > { %1320 = vst.msk [vmem:[#allocation4 - $0x6] sm:$0xc0] %vm1319_vm10, %v3190_v42  ;;  %v1236_v6 = vpack.c.bf16 %v1234_v5, %v1234_v5 }
 0x291   : > { %1321 = vst.msk [vmem:[#allocation4 - $0x4] sm:$0xc0] %vm1319_vm10, %v990_v47 }
 0x292   : > { %1322 = vst.msk [vmem:[#allocation4 - $0x2] sm:$0xc0] %vm1319_vm10, %v994_v53  ;;  %2531 = vmatmul.msk.bf16.vlgmr.msrb.gmra.mxu0 %vm1037_vm8, %v1236_v6 }
 0x293   : > { %1323 = vst.msk [vmem:[#allocation4] sm:$0xc0] %vm1319_vm10, %v3211_v46 }
 0x29a   : > { %v1332_v7 = vld [vmem:[#allocation4] sm:$0xff] }
 0x29b   : > { %v1334_v8 = vpack.c.bf16 %v1332_v7, %v1332_v7 }
 0x29d   : > { %2533 = vmatmul.msk.bf16.vlgmr.msrb.gmra.mxu3 %vm1037_vm8, %v1334_v8 }
 0x2f6   : > { %v1053_v10 = vpop.f32.mrf.mxu1 }
 0x2f7   : > { %v1057_v12 = vmul.f32 0.35355338, %v1053_v10 }
 0x2f9   : > { %v1058_v13 = vadd.f32 %v1057_v12, %v985_v11 }
 0x2fb   : > { %v1059_v14 = vsel %vm1037_vm8, %v1058_v13, -inf }
 0x2fc   : > { %1060 = vmax.xlane.f32.xlu1 %v1059_v14 }
 0x2fe   : > { %v1055_v15 = vpop.f32.mrf.mxu1 }
 0x30a   : > { %v1155_v16 = vpop.f32.mrf.mxu3 }
 0x30b   : > { %v1159_v17 = vmul.f32 0.35355338, %v1155_v16 }
 0x30d   : > { %v1160_v18 = vadd.f32 %v1159_v17, %v985_v11 }
 0x30f   : > { %v1253_v19 = vpop.f32.mrf.mxu0  ;;  %v1161_v20 = vsel %vm1037_vm8, %v1160_v18, -inf }
 0x310   : > { %v1257_v21 = vmul.f32 0.35355338, %v1253_v19  ;;  %1162 = vmax.xlane.f32.xlu2 %v1161_v20 }
 0x312   : > { %v1157_v22 = vpop.f32.mrf.mxu3  ;;  %v1258_v24 = vadd.f32 %v1257_v21, %v985_v11 }
 0x314   : > { %v1259_v26 = vsel %vm1037_vm8, %v1258_v24, -inf }
 0x317   : > { %v1255_v25 = vpop.f32.mrf.mxu0 }
 0x318   : > { %1260 = vmax.xlane.f32.xlu2 %v1259_v26 }
 0x320   : > { %v1351_v27 = vpop.f32.mrf.mxu3 }
 0x321   : > { %v1355_v28 = vmul.f32 0.35355338, %v1351_v27 }
 0x323   : > { %v1356_v29 = vadd.f32 %v1355_v28, %v985_v11 }
 0x325   : > { %v1357_v30 = vsel %vm1037_vm8, %v1356_v29, -inf }
 0x326   : > { %1358 = vmax.xlane.f32.xlu0 %v1357_v30 }
 0x328   : > { %v1353_v31 = vpop.f32.mrf.mxu3 }
 0x330   : > { %1029 = vrot.lane.b32.xlu2 %v3190_v42, %s2894_s24  ;;  %s3760_s24 = scalar_lea.vmem %s3759_s27, %s3080_s29 }
 0x33a   : > { %1021 = vrot.lane.b32.xlu0 %v3190_v42, %s2895_s17 }
 0x36f   : > { %v1061_v32 = vpop.xlane.xlu1 %1060 }
 0x370   : > { %v1062_v33 = vsub.f32 %v1058_v13, %v1061_v32 }
 0x372   : > { %v1063_v34 = vmul.f32 1.442695, %v1062_v33 }
 0x374   : > { %2742 = vpow2.f32 %v1063_v34 }
 0x37a   : > { %v2743_v35 = vpop.eup %2742 }
 0x37b   : > { %v1065_v36 = vsel %vm1037_vm8, %v2743_v35, 0.0 }
 0x37c   : > { %1066 = vadd.xlane.f32.xlu1 %v1065_v36 }
 0x383   : > { %v1163_v37 = vpop.xlane.xlu2 %1162 }
 0x384   : > { %v1164_v38 = vsub.f32 %v1160_v18, %v1163_v37 }
 0x386   : > { %v1165_v39 = vmul.f32 1.442695, %v1164_v38 }
 0x388   : > { %2744 = vpow2.f32 %v1165_v39 }
 0x38b   : > { %v1261_v40 = vpop.xlane.xlu2 %1260 }
 0x38c   : > { %v1262_v41 = vsub.f32 %v1258_v24, %v1261_v40 }
 0x38e   : > { %v3273_v43 = vpop.eup %2744  ;;  %v1263_v44 = vmul.f32 1.442695, %v1262_v41 }
 0x38f   : > { %v1167_v45 = vsel %vm1037_vm8, %v3273_v43, 0.0 }
 0x390   : > { %2746 = vpow2.f32 %v1263_v44  ;;  %1168 = vadd.xlane.f32.xlu0 %v1167_v45 }
 0x393   : > { %v3277_v46 = vpop.permute.xlu2 %1029 }
 0x394   : > { %1032 = vst.msk [vmem:[#allocation6 + $0x6] sm:$0x3] %vm986_vm6, %v3277_v46 }
 0x395   : > { %1013 = vrot.lane.b32.xlu1 %v3190_v42, %s2896_s21 }
 0x396   : > { %v3282_v47 = vpop.eup %2746 }
 0x397   : > { %v1265_v49 = vsel %vm1037_vm8, %v3282_v47, 0.0 }
 0x398   : > { %1266 = vadd.xlane.f32.xlu2 %v1265_v49 }
 0x399   : > { %v1359_v50 = vpop.xlane.xlu0 %1358 }
 0x39a   : > { %v1360_v52 = vsub.f32 %v1356_v29, %v1359_v50 }
 0x39c   : > { %v1361_v53 = vmul.f32 1.442695, %v1360_v52 }
 0x39e   : > { %2748 = vpow2.f32 %v1361_v53 }
 0x3a4   : > { %v3290_v54 = vpop.eup %2748 }
 0x3a5   : > { %v1363_v42 = vsel %vm1037_vm8, %v3290_v54, 0.0 }
 0x3ac   : > { %v3286_v51 = vpop.permute.xlu0 %1021 }
 0x3ad   : > { %1024 = vst.msk [vmem:[#allocation6 + $0x4] sm:$0x3] %vm986_vm6, %v3286_v51 }
 0x3bf   : > { %1364 = vadd.xlane.f32.xlu1 %v1363_v42 }
 0x3ef   : > { %v1067_v55 = vpop.xlane.xlu1 %1066 }
 0x3f0   : > { %2750 = vrcp.f32 %v1067_v55  ;;  %v1079_v62 = vand.u32 2147483648, %v1067_v55  ;;  %vm1073_vm12 = vweird.f32 %v1067_v55  ;;  %v1077_v0 = vand.u32 2147483647, %v1067_v55 }
 0x3f2   : > { %v1080_v4 = vor.u32 1.1754944e-38, %v1079_v62  ;;  %vm1078_vm14 = vcmp.eq.f32.partialorder %v1077_v0, 8.507059e+37 }
 0x3f6   : > { %v2751_v56 = vpop.eup %2750 }
 0x3f7   : > { %v1069_v57 = vmul.f32 %v2751_v56, %v1067_v55  ;;  %vm1074_vm11 = vweird.f32 %v2751_v56 }
 0x3f8   : > { %vm1075_vm13 = vmor %vm1073_vm12, %vm1074_vm11 }
 0x3f9   : > { %v1070_v58 = vsub.f32 1.0, %v1069_v57 }
 0x3fb   : > { %v1071_v59 = vmul.f32 %v2751_v56, %v1070_v58 }
 0x3fd   : > { %v1072_v61 = vadd.f32 %v2751_v56, %v1071_v59 }
 0x3ff   : > { %v1076_v3 = vsel %vm1075_vm13, %v2751_v56, %v1072_v61 }
 0x400   : > { %v1081_v7 = vsel %vm1078_vm14, %v1080_v4, %v1076_v3 }
 0x401   : > { %v1082_v12 = vmul.f32 %v2743_v35, %v1081_v7 }
 0x403   : > { %v1169_v60 = vpop.xlane.xlu0 %1168  ;;  %v1084_v17 = vpack.c.bf16 %v1082_v12, %v1082_v12 }
 0x404   : > { %2752 = vrcp.f32 %v1169_v60  ;;  %v1181_v20 = vand.u32 2147483648, %v1169_v60  ;;  %vm1175_vm2 = vweird.f32 %v1169_v60  ;;  %v1179_v21 = vand.u32 2147483647, %v1169_v60 }
 0x406   : > { %v1182_v26 = vor.u32 1.1754944e-38, %v1181_v20  ;;  %vm1180_vm4 = vcmp.eq.f32.partialorder %v1179_v21, 8.507059e+37  ;;  %v2630_v21 = vld [vmem:[%s3134_s23 + $0x8] sm:$0xff] }
 0x407   : > { %v3294_v63 = vpop.permute.xlu1 %1013  ;;  %1555 = vmatpush.bf16.msra.mxu3 %v2630_v21 }
 0x408   : > { %1016 = vst.msk [vmem:[#allocation6 + $0x2] sm:$0x3] %vm986_vm6, %v3294_v63 }
 0x40a   : > { %v2753_v2 = vpop.eup %2752 }
 0x40b   : > { %v1171_v5 = vmul.f32 %v2753_v2, %v1169_v60  ;;  %v1267_v6 = vpop.xlane.xlu2 %1266  ;;  %vm1176_vm0 = vweird.f32 %v2753_v2 }
 0x40c   : > { %2754 = vrcp.f32 %v1267_v6  ;;  %vm1177_vm3 = vmor %vm1175_vm2, %vm1176_vm0  ;;  %v1279_v29 = vand.u32 2147483648, %v1267_v6  ;;  %vm1273_vm11 = vweird.f32 %v1267_v6  ;;  %v1277_v32 = vand.u32 2147483647, %v1267_v6 }
 0x40d   : > { %v1172_v8 = vsub.f32 1.0, %v1171_v5 }
 0x40e   : > { %v1280_v35 = vor.u32 1.1754944e-38, %v1279_v29  ;;  %vm1278_vm13 = vcmp.eq.f32.partialorder %v1277_v32, 8.507059e+37 }
 0x40f   : > { %v1083_v10 = vld [vmem:[#allocation6] sm:$0xff]  ;;  %v1173_v14 = vmul.f32 %v2753_v2, %v1172_v8 }
 0x410   : > { %1129 = vst.msk [vmem:[#allocation6 - $0x2] sm:$0xc] %vm1123_vm7, %v3215_v48  ;;  %v1085_v11 = vpack.c.bf16 %v1083_v10, %v1083_v10 }
 0x411   : > { %1131 = vst.msk [vmem:[#allocation6] sm:$0xc] %vm1123_vm7, %v3294_v63  ;;  %v1174_v19 = vadd.f32 %v2753_v2, %v1173_v14  ;;  %v2624_v14 = vld [vmem:[%s3116_s1] sm:$0xff] }
 0x412   : > { %v2755_v13 = vpop.eup %2754  ;;  %1133 = vst.msk [vmem:[#allocation6 + $0x2] sm:$0xc] %vm1123_vm7, %v3286_v51  ;;  %v1091_v15 = vsel %vm1089_vm15, %v1085_v11, 0 }
 0x413   : > { %v1269_v16 = vmul.f32 %v2755_v13, %v1267_v6  ;;  %1135 = vst.msk [vmem:[#allocation6 + $0x4] sm:$0xc] %vm1123_vm7, %v3277_v46  ;;  %1100 = vmatpush.bf16.msra.mxu2 %v1091_v15  ;;  %v1178_v25 = vsel %vm1177_vm3, %v2753_v2, %v1174_v19  ;;  %vm1274_vm5 = vweird.f32 %v2755_v13 }
 0x414   : > { %v1183_v31 = vsel %vm1180_vm4, %v1182_v26, %v1178_v25  ;;  %vm1275_vm12 = vmor %vm1273_vm11, %vm1274_vm5  ;;  %vm1116_vm4 = vcmask 193668   ;;  %vm1121_vm5 = vcmask 261318   ;;  %v2628_v25 = vld [vmem:[%s3097_s4] sm:$0x30]  ;;  %vm1578_vm11 = vcmask 59392  }
 0x415   : > { %v1270_v18 = vsub.f32 1.0, %v1269_v16  ;;  %v1184_v33 = vmul.f32 %v3273_v43, %v1183_v31 }
 0x416   : > { %2528 = vmatmul.msk.bf16.vlgmr.msra.gmra.mxu2 %vm1037_vm8, %v1084_v17 }
 0x417   : > { %v1271_v22 = vmul.f32 %v2755_v13, %v1270_v18  ;;  %v1186_v37 = vpack.c.bf16 %v1184_v33, %v1184_v33  ;;  %v2728_v33 = vld [vmem:[%s3760_s24] ss:$0 sm:$0xff] }
 0x419   : > { %v1272_v28 = vadd.f32 %v2755_v13, %v1271_v22  ;;  %v2629_v22 = vld [vmem:[%s3134_s23] sm:$0xff] }
 0x41a   : > { %v1185_v24 = vld [vmem:[#allocation6] sm:$0xff]  ;;  %1556 = vmatpush.bf16.msra.mxu3 %v2629_v22 }
 0x41b   : > { %1227 = vst.msk [vmem:[#allocation6 - $0x4] sm:$0x30] %vm1221_vm9, %v3215_v48  ;;  %v1187_v27 = vpack.c.bf16 %v1185_v24, %v1185_v24  ;;  %v1276_v34 = vsel %vm1275_vm12, %v2755_v13, %v1272_v28  ;;  %v2625_v13 = vld [vmem:[%s3116_s1 + $0x8] sm:$0xff]  ;;  %v2555_v24 = vld [vmem:[%s3097_s4] sm:$0xf]  ;;  %vm1705_vm12 = vcmask 62467  }
 0x41c   : > { %1229 = vst.msk [vmem:[#allocation6 - $0x2] sm:$0x30] %vm1221_vm9, %v3294_v63  ;;  %v1281_v36 = vsel %vm1278_vm13, %v1280_v35, %v1276_v34  ;;  %1444 = vmatpush.bf16.msra.mxu0 %v2625_v13  ;;  %v2556_v26 = vor.u32 %v2628_v25, %v2555_v24  ;;  %s3761_s1 = sld [smem:[#allocation35_spill]] }
 0x41d   : > { %1231 = vst.msk [vmem:[#allocation6] sm:$0x30] %vm1221_vm9, %v3286_v51  ;;  %v1192_v30 = vsel %vm1089_vm15, %v1187_v27, 0  ;;  %v1282_v40 = vmul.f32 %v3282_v47, %v1281_v36  ;;  %v2727_v27 = vld [vmem:[%s3757_s20] ss:$0 sm:$0xff] }
 0x41e   : > { %1233 = vst.msk [vmem:[#allocation6 + $0x2] sm:$0x30] %vm1221_vm9, %v3277_v46  ;;  %1201 = vmatpush.bf16.msrb.mxu2 %v1192_v30  ;;  %2565 = vmatmul.msk.bf16.vlgmr.msra.gmra.mxu3 %vm908_vm1, %v2556_v26 }
 0x41f   : > { %v1284_v43 = vpack.c.bf16 %v1282_v40, %v1282_v40  ;;  %v2627_v40 = vld [vmem:[%s3758_s30 + $0x8] sm:$0xff] }
 0x420   : > { %1445 = vmatpush.bf16.msra.mxu0 %v2624_v14 }
 0x422   : > { %s3762_s16 = scalar_lea.vmem %s3761_s1, %s3080_s29 }
 0x425   : > { %v1283_v38 = vld [vmem:[#allocation6] sm:$0xff] }
 0x426   : > { %1325 = vst.msk [vmem:[#allocation6 - $0x6] sm:$0xc0] %vm1319_vm10, %v3215_v48  ;;  %v1285_v39 = vpack.c.bf16 %v1283_v38, %v1283_v38  ;;  %2530 = vmatmul.msk.bf16.vlgmr.msrb.gmra.mxu2 %vm1037_vm8, %v1186_v37 }
 0x427   : > { %1327 = vst.msk [vmem:[#allocation6 - $0x4] sm:$0xc0] %vm1319_vm10, %v3294_v63 }
 0x428   : > { %1329 = vst.msk [vmem:[#allocation6 - $0x2] sm:$0xc0] %vm1319_vm10, %v3286_v51  ;;  %v1290_v41 = vsel %vm1089_vm15, %v1285_v39, 0 }
 0x429   : > { %1331 = vst.msk [vmem:[#allocation6] sm:$0xc0] %vm1319_vm10, %v3277_v46  ;;  %1299 = vmatpush.bf16.msrb.mxu1 %v1290_v41  ;;  %v2626_v41 = vld [vmem:[%s3758_s30] sm:$0xff] }
 0x42c   : > { %2532 = vmatmul.msk.bf16.vlgmr.msrb.gmra.mxu1 %vm1037_vm8, %v1284_v43 }
 0x42d   : > { %1512 = vmatpush.bf16.msra.mxu1 %v2627_v40 }
 0x430   : > { %v1381_v48 = vld [vmem:[#allocation6] sm:$0xff] }
 0x431   : > { %v1383_v44 = vpack.c.bf16 %v1381_v48, %v1381_v48  ;;  %1513 = vmatpush.bf16.msra.mxu1 %v2626_v41 }
 0x432   : > { %v1365_v45 = vpop.xlane.xlu1 %1364 }
 0x433   : > { %v1388_v47 = vsel %vm1089_vm15, %v1383_v44, 0  ;;  %2756 = vrcp.f32 %v1365_v45  ;;  %v1377_v51 = vand.u32 2147483648, %v1365_v45  ;;  %v1375_v42 = vand.u32 2147483647, %v1365_v45 }
 0x434   : > { %1397 = vmatpush.bf16.msra.mxu2 %v1388_v47  ;;  %vm1371_vm0 = vweird.f32 %v1365_v45  ;;  %vm1111_vm15 = vcmask 126018  }
 0x435   : > { %v1378_v46 = vor.u32 1.1754944e-38, %v1377_v51  ;;  %vm1376_vm3 = vcmp.eq.f32.partialorder %v1375_v42, 8.507059e+37 }
 0x439   : > { %v2757_v49 = vpop.eup %2756 }
 0x43a   : > { %v1367_v50 = vmul.f32 %v2757_v49, %v1365_v45  ;;  %vm1372_vm14 = vweird.f32 %v2757_v49 }
 0x43b   : > { %vm1373_vm2 = vmor %vm1371_vm0, %vm1372_vm14  ;;  %vm1806_vm0 = vcmask 57344  }
 0x43c   : > { %v1368_v52 = vsub.f32 1.0, %v1367_v50 }
 0x43e   : > { %v1369_v53 = vmul.f32 %v2757_v49, %v1368_v52 }
 0x440   : > { %v1370_v55 = vadd.f32 %v2757_v49, %v1369_v53 }
 0x442   : > { %v1374_v56 = vsel %vm1373_vm2, %v2757_v49, %v1370_v55  ;;  %vm1935_vm2 = vcmask 60417  }
 0x443   : > { %v1379_v57 = vsel %vm1376_vm3, %v1378_v46, %v1374_v56 }
 0x444   : > { %v1380_v58 = vmul.f32 %v3290_v54, %v1379_v57 }
 0x446   : > { %v1382_v59 = vpack.c.bf16 %v1380_v58, %v1380_v58 }
 0x448   : > { %2534 = vmatmul.msk.bf16.vlgmr.msra.gmra.mxu2 %vm1037_vm8, %v1382_v59 }
 0x499   : > { %v1102_v60 = vpop.f32.mrf.mxu2 }
 0x49a   : > { %1106 = vst.msk [vmem:[#allocation3] sm:$0x3] %vm986_vm6, %v1102_v60  ;;  %1113 = vrot.lane.b32.xlu1 %v1102_v60, %s2897_s7  ;;  %1108 = vrot.lane.b32.xlu0 %v1102_v60, %s2898_s11 }
 0x4a1   : > { %v1104_v61 = vpop.f32.mrf.mxu2  ;;  %v1558_v34 = vpop.f32.mrf.mxu3 }
 0x4a2   : > { %1118 = vrot.lane.b32.xlu0 %v1102_v60, %s2899_s12  ;;  %v3384_v35 = vadd.f32 %v2728_v33, %v1558_v34 }
 0x4a4   : > { %1579 = vst.msk [vmem:[#allocation5] sm:$0x7] %vm1578_vm11, %v3384_v35 }
 0x4a9   : > { %v1301_v62 = vpop.f32.mrf.mxu1  ;;  %v1203_v63 = vpop.f32.mrf.mxu2 }
 0x4aa   : > { %1305 = vst.msk [vmem:[#allocation3 + $0x4] sm:$0x3] %vm986_vm6, %v1301_v62  ;;  %1307 = vrot.lane.b32.xlu2 %v1301_v62, %s2898_s11  ;;  %1213 = vrot.lane.b32.xlu0 %v1203_v63, %s2897_s7  ;;  %v1560_v47 = vpop.f32.mrf.mxu3 }
 0x4ab   : > { %1207 = vst.msk [vmem:[#allocation3 + $0x2] sm:$0x3] %vm986_vm6, %v1203_v63  ;;  %1209 = vrot.lane.b32.xlu1 %v1203_v63, %s2898_s11  ;;  %v3401_v50 = vadd.f32 %v2728_v33, %v1560_v47 }
 0x4b1   : > { %v1303_v54 = vpop.f32.mrf.mxu1  ;;  %v1205_v0 = vpop.f32.mrf.mxu2 }
 0x4b2   : > { %1311 = vrot.lane.b32.xlu2 %v1301_v62, %s2897_s7 }
 0x4ba   : > { %1217 = vrot.lane.b32.xlu2 %v1203_v63, %s2899_s12 }
 0x4cb   : > { %v1399_v2 = vpop.f32.mrf.mxu2 }
 0x4cc   : > { %1403 = vst.msk [vmem:[#allocation3 + $0x6] sm:$0x3] %vm986_vm6, %v1399_v2  ;;  %1409 = vrot.lane.b32.xlu1 %v1399_v2, %s2897_s7  ;;  %1405 = vrot.lane.b32.xlu0 %v1399_v2, %s2898_s11 }
 0x4d3   : > { %v1401_v3 = vpop.f32.mrf.mxu2 }
 0x4d4   : > { %1413 = vrot.lane.b32.xlu0 %v1399_v2, %s2899_s12  ;;  %1315 = vrot.lane.b32.xlu1 %v1301_v62, %s2899_s12 }
 0x4dc   : > { %1585 = vrot.lane.b32.xlu0 %v3384_v35, %s2886_s13 }
 0x4e4   : > { %1593 = vrot.lane.b32.xlu0 %v3384_v35, %s2892_s5 }
 0x4ec   : > { %1601 = vrot.lane.b32.xlu0 %v3384_v35, %s2891_s18 }
 0x504   : > { %v1308_v4 = vpop.permute.xlu2 %1307 }
 0x505   : > { %1310 = vst.msk [vmem:[#allocation3 + $0x2] sm:$0xc] %vm1111_vm15, %v1308_v4 }
 0x50c   : > { %v1312_v5 = vpop.permute.xlu2 %1311  ;;  %v1109_v6 = vpop.permute.xlu0 %1108 }
 0x50d   : > { %1314 = vst.msk [vmem:[#allocation3] sm:$0x30] %vm1116_vm4, %v1312_v5  ;;  %v1114_v7 = vpop.permute.xlu1 %1113 }
 0x50e   : > { %1112 = vst.msk [vmem:[#allocation3 - $0x2] sm:$0xc] %vm1111_vm15, %v1109_v6 }
 0x50f   : > { %1117 = vst.msk [vmem:[#allocation3 - $0x4] sm:$0x30] %vm1116_vm4, %v1114_v7 }
 0x514   : > { %v1119_v8 = vpop.permute.xlu0 %1118  ;;  %v1218_v12 = vpop.permute.xlu2 %1217 }
 0x515   : > { %1122 = vst.msk [vmem:[#allocation3 - $0x6] sm:$0xc0] %vm1121_vm5, %v1119_v8 }
 0x51c   : > { %v1214_v10 = vpop.permute.xlu0 %1213 }
 0x51d   : > { %v1210_v11 = vpop.permute.xlu1 %1209 }
 0x51e   : > { %1212 = vst.msk [vmem:[#allocation3] sm:$0xc] %vm1111_vm15, %v1210_v11 }
 0x51f   : > { %1216 = vst.msk [vmem:[#allocation3 - $0x2] sm:$0x30] %vm1116_vm4, %v1214_v10  ;;  %v2729_v10 = vld [vmem:[%s3762_s16] ss:$0 sm:$0xff] }
 0x520   : > { %1220 = vst.msk [vmem:[#allocation3 - $0x4] sm:$0xc0] %vm1121_vm5, %v1218_v12 }
 0x53e   : > { %v1406_v15 = vpop.permute.xlu0 %1405  ;;  %v1410_v16 = vpop.permute.xlu1 %1409 }
 0x53f   : > { %1408 = vst.msk [vmem:[#allocation3 + $0x4] sm:$0xc] %vm1111_vm15, %v1406_v15 }
 0x540   : > { %1412 = vst.msk [vmem:[#allocation3 + $0x2] sm:$0x30] %vm1116_vm4, %v1410_v16 }
 0x546   : > { %v1414_v17 = vpop.permute.xlu0 %1413  ;;  %v1316_v18 = vpop.permute.xlu1 %1315 }
 0x547   : > { %1416 = vst.msk [vmem:[#allocation3] sm:$0xc0] %vm1121_vm5, %v1414_v17 }
 0x548   : > { %1318 = vst.msk [vmem:[#allocation3 - $0x2] sm:$0xc0] %vm1121_vm5, %v1316_v18 }
 0x54e   : > { %v1586_v44 = vpop.permute.xlu0 %1585 }
 0x54f   : > { %v1417_v19 = vld [vmem:[#allocation3] sm:$0xff]  ;;  %1588 = vst.msk [vmem:[#allocation5 + $0x3] sm:$0x7] %vm1578_vm11, %v1586_v44 }
 0x550   : > { %v1422_v20 = vpack.c.bf16 %v1417_v19, %v1417_v19 }
 0x552   : > { %2543 = vmatmul.msk.bf16.vlgmr.msra.gmra.mxu0 %vm908_vm1, %v1422_v20 }
 0x556   : > { %v1594_v51 = vpop.permute.xlu0 %1593 }
 0x557   : > { %1596 = vst.msk [vmem:[#allocation5 + $0x6] sm:$0x7] %vm1578_vm11, %v1594_v51 }
 0x55e   : > { %v1610_v57 = vld [vmem:[#allocation5] sm:$0xff]  ;;  %v1602_v58 = vpop.permute.xlu0 %1601 }
 0x55f   : > { %1706 = vst.msk [vmem:[#allocation5 - $0x3] sm:$0x38] %vm1705_vm12, %v3384_v35 }
 0x560   : > { %1708 = vst.msk [vmem:[#allocation5] sm:$0x38] %vm1705_vm12, %v1586_v44 }
 0x561   : > { %1604 = vst.msk [vmem:[#allocation5 + $0x9] sm:$0x7] %vm1578_vm11, %v1602_v58 }
 0x568   : > { %v1611_v62 = vld [vmem:[#allocation5 + $0x8] sm:$0xf] }
 0x569   : > { %1710 = vst.msk [vmem:[#allocation5 + $0x3] sm:$0x38] %vm1705_vm12, %v1594_v51  ;;  %v1613_v54 = vpack.c.bf16 %v1611_v62, %v1610_v57 }
 0x56a   : > { %1712 = vst.msk [vmem:[#allocation5 + $0x6] sm:$0x38] %vm1705_vm12, %v1602_v58 }
 0x56b   : > { %v1618_v2 = vsel %vm1037_vm8, %v1613_v54, 0 }
 0x56c   : > { %1627 = vmatpush.bf16.xpose.msrb.mxu2 %v1618_v2 }
 0x570   : > { %v1715_v4 = vld [vmem:[#allocation5] sm:$0xff] }
 0x571   : > { %v1716_v5 = vld [vmem:[#allocation5 + $0x8] sm:$0xf]  ;;  %1805 = vst.msk [vmem:[#allocation5 - $0x6] sm:$0xc0] %vm1319_vm10, %v3384_v35 }
 0x572   : > { %1837 = vst.msk [vmem:[#allocation5 + $0x3] sm:$0xc0] %vm1319_vm10, %v1602_v58  ;;  %v1718_v6 = vpack.c.bf16 %v1716_v5, %v1715_v4 }
 0x573   : > { %1817 = vst.msk [vmem:[#allocation5 - $0x3] sm:$0xc0] %vm1319_vm10, %v1586_v44 }
 0x574   : > { %v1723_v7 = vsel %vm1037_vm8, %v1718_v6, 0  ;;  %1827 = vst.msk [vmem:[#allocation5] sm:$0xc0] %vm1319_vm10, %v1594_v51 }
 0x575   : > { %1732 = vmatpush.bf16.xpose.msrb.mxu1 %v1723_v7  ;;  %1807 = vst.msk [vmem:[#allocation5 + $0x2] sm:$0x1] %vm1806_vm0, %v3401_v50 }
 0x5cf   : > { %v1447_v28 = vpop.f32.mrf.mxu0 }
 0x5d0   : > { %v1451_v29 = vadd.f32 %v1447_v28, %v3170_v1 }
 0x5d2   : > { %v3375_v30 = vadd.f32 %v2727_v27, %v1451_v29 }
 0x5d4   : > { %v1457_v31 = vsel %vm908_vm1, %v3375_v30, 0.0 }
 0x5d5   : > { %1458 = vadd.xlane.f32.xlu2 %v1457_v31 }
 0x5d7   : > { %v1449_v32 = vpop.f32.mrf.mxu0 }
 0x648   : > { %v1459_v1 = vpop.xlane.xlu2 %1458 }
 0x649   : > { %v1460_v36 = vmul.f32 %v1459_v1, %v3174_v9 }
 0x64b   : > { %v1461_v37 = vsub.f32 %v3375_v30, %v1460_v36 }
 0x64d   : > { %v1462_v38 = vmul.f32 %v1461_v37, %v1461_v37 }
 0x64f   : > { %v1463_v39 = vsel %vm908_vm1, %v1462_v38, 0.0 }
 0x650   : > { %1464 = vadd.xlane.f32.xlu1 %v1463_v39 }
 0x669   : > { %1824 = vrot.lane.b32.xlu1 %v3401_v50, %s2892_s5 }
 0x6c3   : > { %v1465_v43 = vpop.xlane.xlu1 %1464 }
 0x6c4   : > { %v1466_v48 = vmul.f32 %v1465_v43, %v3181_v23 }
 0x6c6   : > { %2758 = vrsqrt.f32 %v1466_v48  ;;  %vm1474_vm13 = vcmp.eq.f32.partialorder %v1466_v48, inf  ;;  %v1477_v56 = vand.u32 2147483648, %v1466_v48  ;;  %vm1476_vm14 = vcmp.eq.f32.partialorder %v1466_v48, 0.0 }
 0x6cc   : > { %v2759_v45 = vpop.eup %2758 }
 0x6cd   : > { %v1468_v49 = vmul.f32 %v2759_v45, %v1466_v48 }
 0x6cf   : > { %v1469_v52 = vmul.f32 %v2759_v45, %v1468_v49 }
 0x6d1   : > { %v1470_v53 = vmul.f32 0.5, %v1469_v52 }
 0x6d3   : > { %v1471_v42 = vsub.f32 1.5, %v1470_v53 }
 0x6d5   : > { %v1472_v55 = vmul.f32 %v2759_v45, %v1471_v42 }
 0x6d7   : > { %v1473_v46 = vmul.f32 %v1472_v55, %v1466_v48 }
 0x6d9   : > { %v1475_v59 = vsel %vm1474_vm13, %v1466_v48, %v1473_v46 }
 0x6da   : > { %v1478_v60 = vsel %vm1476_vm14, %v1477_v56, %v1475_v59 }
 0x6db   : > { %v1479_v61 = vadd.f32 1e-07, %v1478_v60  ;;  %v1825_v8 = vpop.permute.xlu1 %1824 }
 0x6dc   : > { %1828 = vst.msk [vmem:[#allocation5 + $0x8] sm:$0x1] %vm1806_vm0, %v1825_v8 }
 0x6dd   : > { %2760 = vrcp.f32 %v1479_v61 }
 0x6e3   : > { %v2761_v63 = vpop.eup %2760 }
 0x6e4   : > { %v1481_v0 = vmul.f32 %v2761_v63, %v1461_v37 }
 0x6e6   : > { %v1486_v3 = vpack.c.bf16 %v1481_v0, %v1481_v0 }
 0x6e8   : > { %2552 = vmatmul.msk.bf16.vlgmr.msra.gmra.mxu1 %vm908_vm1, %v1486_v3 }
 0x765   : > { %v1515_v11 = vpop.f32.mrf.mxu1 }
 0x766   : > { %v1516_v12 = vadd.f32 %v2729_v10, %v1515_v11 }
 0x768   : > { %1564 = vst.msk [vmem:[#allocation4] sm:$0x3] %vm986_vm6, %v1516_v12  ;;  %1574 = vrot.lane.b32.xlu2 %v1516_v12, %s2891_s18  ;;  %1566 = vrot.lane.b32.xlu0 %v1516_v12, %s2886_s13 }
 0x76d   : > { %v1517_v13 = vpop.f32.mrf.mxu1 }
 0x770   : > { %1581 = vrot.lane.b32.xlu2 %v3384_v35, %s2888_s28  ;;  %1570 = vrot.lane.b32.xlu0 %v1516_v12, %s2892_s5 }
 0x778   : > { %1814 = vrot.lane.b32.xlu0 %v3401_v50, %s2886_s13  ;;  %s3763_s13 = sld [smem:[#allocation23_spill]] }
 0x77e   : > { %s3765_s20 = scalar_lea.vmem %s3764_s0, %s3763_s13 }
 0x77f   : > { %v2730_v38 = vld [vmem:[%s3765_s20] ss:$0 sm:$0xff] }
 0x780   : > { %1834 = vrot.lane.b32.xlu0 %v3401_v50, %s2891_s18 }
 0x7c2   : > { %v1575_v14 = vpop.permute.xlu2 %1574 }
 0x7c3   : > { %1577 = vst.msk [vmem:[#allocation4 + $0x6] sm:$0x3] %vm986_vm6, %v1575_v14 }
 0x7ca   : > { %v3439_v15 = vpop.permute.xlu2 %1581 }
 0x7cb   : > { %1584 = vst.msk [vmem:[#allocation6] sm:$0x7] %vm1578_vm11, %v3439_v15 }
 0x7da   : > { %v1567_v16 = vpop.permute.xlu0 %1566 }
 0x7db   : > { %1569 = vst.msk [vmem:[#allocation4 + $0x2] sm:$0x3] %vm986_vm6, %v1567_v16 }
 0x7e2   : > { %v1571_v17 = vpop.permute.xlu0 %1570 }
 0x7e3   : > { %1573 = vst.msk [vmem:[#allocation4 + $0x4] sm:$0x3] %vm986_vm6, %v1571_v17 }
 0x7ea   : > { %v1609_v18 = vld [vmem:[#allocation4] sm:$0xff]  ;;  %v1815_v19 = vpop.permute.xlu0 %1814 }
 0x7eb   : > { %1701 = vst.msk [vmem:[#allocation4 - $0x2] sm:$0xc] %vm1123_vm7, %v1516_v12  ;;  %v1612_v20 = vpack.c.bf16 %v1609_v18, %v1609_v18 }
 0x7ec   : > { %1702 = vst.msk [vmem:[#allocation4] sm:$0xc] %vm1123_vm7, %v1567_v16 }
 0x7ed   : > { %1703 = vst.msk [vmem:[#allocation4 + $0x2] sm:$0xc] %vm1123_vm7, %v1571_v17  ;;  %2566 = vmatmul.msk.bf16.vlgmr.msrb.gmra.mxu2 %vm1037_vm8, %v1612_v20 }
 0x7ee   : > { %1704 = vst.msk [vmem:[#allocation4 + $0x4] sm:$0xc] %vm1123_vm7, %v1575_v14  ;;  %vm1638_vm7 = vcmask 97280  }
 0x7ef   : > { %1818 = vst.msk [vmem:[#allocation5 + $0x5] sm:$0x1] %vm1806_vm0, %v1815_v19 }
 0x7f2   : > { %v1835_v21 = vpop.permute.xlu0 %1834 }
 0x7f3   : > { %1838 = vst.msk [vmem:[#allocation5 + $0xb] sm:$0x1] %vm1806_vm0, %v1835_v21 }
 0x7f5   : > { %v1714_v22 = vld [vmem:[#allocation4] sm:$0xff] }
 0x7f6   : > { %1803 = vst.msk [vmem:[#allocation4] sm:$0x30] %vm1221_vm9, %v1571_v17  ;;  %v1717_v24 = vpack.c.bf16 %v1714_v22, %v1714_v22  ;;  %v1845_v25 = vld [vmem:[#allocation5] sm:$0xff] }
 0x7f7   : > { %1801 = vst.msk [vmem:[#allocation4 - $0x4] sm:$0x30] %vm1221_vm9, %v1516_v12 }
 0x7f8   : > { %1802 = vst.msk [vmem:[#allocation4 - $0x2] sm:$0x30] %vm1221_vm9, %v1567_v16  ;;  %2568 = vmatmul.msk.bf16.vlgmr.msrb.gmra.mxu1 %vm1037_vm8, %v1717_v24 }
 0x7f9   : > { %1804 = vst.msk [vmem:[#allocation4 + $0x2] sm:$0x30] %vm1221_vm9, %v1575_v14 }
 0x7fa   : > { %v1846_v26 = vld [vmem:[#allocation5 + $0x8] sm:$0xf]  ;;  %1936 = vst.msk [vmem:[#allocation5 - $0x1] sm:$0xe] %vm1935_vm2, %v3401_v50 }
 0x7fb   : > { %v1848_v27 = vpack.c.bf16 %v1846_v26, %v1845_v25  ;;  %1942 = vst.msk [vmem:[#allocation5 + $0x8] sm:$0xe] %vm1935_vm2, %v1835_v21 }
 0x7fc   : > { %1938 = vst.msk [vmem:[#allocation5 + $0x2] sm:$0xe] %vm1935_vm2, %v1815_v19 }
 0x7fd   : > { %v1853_v28 = vsel %vm1037_vm8, %v1848_v27, 0  ;;  %1940 = vst.msk [vmem:[#allocation5 + $0x5] sm:$0xe] %vm1935_vm2, %v1825_v8 }
 0x7fe   : > { %1862 = vmatpush.bf16.xpose.msra.mxu2 %v1853_v28 }
 0x800   : > { %v1844_v29 = vld [vmem:[#allocation4] sm:$0xff] }
 0x801   : > { %1931 = vst.msk [vmem:[#allocation4 - $0x6] sm:$0xc0] %vm1319_vm10, %v1516_v12  ;;  %v1847_v31 = vpack.c.bf16 %v1844_v29, %v1844_v29 }
 0x802   : > { %1932 = vst.msk [vmem:[#allocation4 - $0x4] sm:$0xc0] %vm1319_vm10, %v1567_v16 }
 0x803   : > { %1933 = vst.msk [vmem:[#allocation4 - $0x2] sm:$0xc0] %vm1319_vm10, %v1571_v17 }
 0x804   : > { %1934 = vst.msk [vmem:[#allocation4] sm:$0xc0] %vm1319_vm10, %v1575_v14  ;;  %v1945_v32 = vld [vmem:[#allocation5] sm:$0xff]  ;;  %v1946_v33 = vld [vmem:[#allocation5 + $0x8] sm:$0xf] }
 0x805   : > { %2570 = vmatmul.msk.bf16.vlgmr.msra.gmra.mxu2 %vm1037_vm8, %v1847_v31  ;;  %v1948_v34 = vpack.c.bf16 %v1946_v33, %v1945_v32 }
 0x807   : > { %v1953_v1 = vsel %vm1037_vm8, %v1948_v34, 0 }
 0x808   : > { %1962 = vmatpush.bf16.xpose.msra.mxu1 %v1953_v1 }
 0x80b   : > { %v1944_v36 = vld [vmem:[#allocation4] sm:$0xff] }
 0x80c   : > { %v1947_v37 = vpack.c.bf16 %v1944_v36, %v1944_v36 }
 0x80f   : > { %2572 = vmatmul.msk.bf16.vlgmr.msra.gmra.mxu1 %vm1037_vm8, %v1947_v37  ;;  %vm1670_vm8 = vcmask 1045504  }
 0x870   : > { %v1629_v39 = vpop.f32.mrf.mxu2 }
 0x871   : > { %v1633_v40 = vmul.f32 0.35355338, %v1629_v39 }
 0x873   : > { %v1637_v41 = vadd.f32 %v2730_v38, %v1633_v40 }
 0x875   : > { %v1734_v43 = vpop.f32.mrf.mxu1  ;;  %v1639_v48 = vsel %vm1638_vm7, %v1637_v41, -inf }
 0x876   : > { %v1738_v44 = vmul.f32 0.35355338, %v1734_v43  ;;  %1640 = vmax.xlane.f32.xlu2 %v1639_v48 }
 0x878   : > { %v1739_v45 = vadd.f32 %v2730_v38, %v1738_v44  ;;  %v1631_v47 = vpop.f32.mrf.mxu2 }
 0x87a   : > { %v1740_v49 = vsel %vm1638_vm7, %v1739_v45, -inf }
 0x87b   : > { %1741 = vmax.xlane.f32.xlu0 %v1740_v49 }
 0x87d   : > { %v1736_v52 = vpop.f32.mrf.mxu1 }
 0x888   : > { %v1864_v51 = vpop.f32.mrf.mxu2 }
 0x889   : > { %v1868_v53 = vmul.f32 0.35355338, %v1864_v51 }
 0x88b   : > { %v1869_v42 = vadd.f32 %v2730_v38, %v1868_v53 }
 0x88c   : > { %v1964_v55 = vpop.f32.mrf.mxu1 }
 0x88d   : > { %v1968_v46 = vmul.f32 0.35355338, %v1964_v55  ;;  %v1870_v56 = vsel %vm1638_vm7, %v1869_v42, -inf }
 0x88e   : > { %1605 = vrot.lane.b32.xlu2 %v3384_v35, %s2889_s26  ;;  %1871 = vmax.xlane.f32.xlu0 %v1870_v56 }
 0x88f   : > { %v1969_v57 = vadd.f32 %v2730_v38, %v1968_v46 }
 0x890   : > { %v1866_v58 = vpop.f32.mrf.mxu2 }
 0x891   : > { %v1970_v59 = vsel %vm1638_vm7, %v1969_v57, -inf }
 0x892   : > { %1971 = vmax.xlane.f32.xlu1 %v1970_v59 }
 0x894   : > { %v1966_v60 = vpop.f32.mrf.mxu1 }
 0x896   : > { %1809 = vrot.lane.b32.xlu2 %v3401_v50, %s2888_s28 }
 0x89e   : > { %1819 = vrot.lane.b32.xlu2 %v3401_v50, %s2890_s3 }
 0x8a2   : > { %1589 = vrot.lane.b32.xlu0 %v3384_v35, %s2890_s3 }
 0x8a6   : > { %1829 = vrot.lane.b32.xlu2 %v3401_v50, %s2887_s19 }
 0x8ab   : > { %1597 = vrot.lane.b32.xlu1 %v3384_v35, %s2887_s19  ;;  %s3766_s19 = sld [smem:[#allocation25_spill]] }
 0x8ae   : > { %1839 = vrot.lane.b32.xlu2 %v3401_v50, %s2889_s26 }
 0x8e9   : > { %v1641_v61 = vpop.xlane.xlu2 %1640 }
 0x8ea   : > { %v1642_v62 = vsub.f32 %v1637_v41, %v1641_v61 }
 0x8ec   : > { %v1643_v63 = vmul.f32 1.442695, %v1642_v62 }
 0x8ee   : > { %2762 = vpow2.f32 %v1643_v63  ;;  %v1742_v54 = vpop.xlane.xlu0 %1741 }
 0x8ef   : > { %v1743_v0 = vsub.f32 %v1739_v45, %v1742_v54 }
 0x8f1   : > { %v1744_v2 = vmul.f32 1.442695, %v1743_v0  ;;  %v1606_v3 = vpop.permute.xlu2 %1605 }
 0x8f2   : > { %1608 = vst.msk [vmem:[#allocation6 + $0x9] sm:$0x7] %vm1578_vm11, %v1606_v3 }
 0x8f3   : > { %2764 = vpow2.f32 %v1744_v2 }
 0x8f4   : > { %v3494_v4 = vpop.eup %2762 }
 0x8f5   : > { %v1645_v5 = vsel %vm1638_vm7, %v3494_v4, 0.0 }
 0x8f6   : > { %1646 = vadd.xlane.f32.xlu1 %v1645_v5 }
 0x8f9   : > { %v3498_v35 = vpop.eup %2764  ;;  %v1810_v19 = vpop.permute.xlu2 %1809 }
 0x8fa   : > { %v1746_v50 = vsel %vm1638_vm7, %v3498_v35, 0.0 }
 0x8fb   : > { %1747 = vadd.xlane.f32.xlu0 %v1746_v50 }
 0x901   : > { %v1872_v6 = vpop.xlane.xlu0 %1871  ;;  %v1820_v21 = vpop.permute.xlu2 %1819 }
 0x902   : > { %v1873_v7 = vsub.f32 %v1869_v42, %v1872_v6 }
 0x904   : > { %v1874_v8 = vmul.f32 1.442695, %v1873_v7 }
 0x905   : > { %v1972_v10 = vpop.xlane.xlu1 %1971 }
 0x906   : > { %2766 = vpow2.f32 %v1874_v8  ;;  %v1973_v11 = vsub.f32 %v1969_v57, %v1972_v10 }
 0x908   : > { %v1974_v12 = vmul.f32 1.442695, %v1973_v11 }
 0x909   : > { %v1830_v27 = vpop.permute.xlu2 %1829 }
 0x90a   : > { %2768 = vpow2.f32 %v1974_v12 }
 0x90c   : > { %v3502_v13 = vpop.eup %2766 }
 0x90d   : > { %v1876_v14 = vsel %vm1638_vm7, %v3502_v13, 0.0 }
 0x90e   : > { %1877 = vadd.xlane.f32.xlu0 %v1876_v14 }
 0x910   : > { %v3506_v16 = vpop.eup %2768 }
 0x911   : > { %v1976_v17 = vsel %vm1638_vm7, %v3506_v16, 0.0  ;;  %v1840_v33 = vpop.permute.xlu2 %1839 }
 0x912   : > { %1977 = vadd.xlane.f32.xlu2 %v1976_v17 }
 0x914   : > { %v1590_v18 = vpop.permute.xlu0 %1589 }
 0x915   : > { %1592 = vst.msk [vmem:[#allocation6 + $0x3] sm:$0x7] %vm1578_vm11, %v1590_v18 }
 0x91d   : > { %v1598_v20 = vpop.permute.xlu1 %1597 }
 0x91e   : > { %1600 = vst.msk [vmem:[#allocation6 + $0x6] sm:$0x7] %vm1578_vm11, %v1598_v20 }
 0x925   : > { %v1663_v22 = vld [vmem:[#allocation6] sm:$0xff]  ;;  %v1664_v24 = vld [vmem:[#allocation6 + $0x8] sm:$0xf] }
 0x926   : > { %1707 = vst.msk [vmem:[#allocation6 - $0x3] sm:$0x38] %vm1705_vm12, %v3439_v15  ;;  %v1666_v25 = vpack.c.bf16 %v1664_v24, %v1663_v22 }
 0x927   : > { %1709 = vst.msk [vmem:[#allocation6] sm:$0x38] %vm1705_vm12, %v1590_v18 }
 0x928   : > { %1711 = vst.msk [vmem:[#allocation6 + $0x3] sm:$0x38] %vm1705_vm12, %v1598_v20  ;;  %v1672_v26 = vsel %vm1670_vm8, %v1666_v25, 0 }
 0x929   : > { %1713 = vst.msk [vmem:[#allocation6 + $0x6] sm:$0x38] %vm1705_vm12, %v1606_v3  ;;  %1681 = vmatpush.bf16.msrb.mxu0 %v1672_v26 }
 0x92f   : > { %v1764_v28 = vld [vmem:[#allocation6] sm:$0xff] }
 0x930   : > { %1832 = vst.msk [vmem:[#allocation6] sm:$0xc0] %vm1319_vm10, %v1598_v20  ;;  %v1765_v29 = vld [vmem:[#allocation6 + $0x8] sm:$0xf] }
 0x931   : > { %1812 = vst.msk [vmem:[#allocation6 - $0x6] sm:$0xc0] %vm1319_vm10, %v3439_v15  ;;  %v1767_v31 = vpack.c.bf16 %v1765_v29, %v1764_v28 }
 0x932   : > { %1813 = vst.msk [vmem:[#allocation6 + $0x2] sm:$0x1] %vm1806_vm0, %v1810_v19 }
 0x933   : > { %1822 = vst.msk [vmem:[#allocation6 - $0x3] sm:$0xc0] %vm1319_vm10, %v1590_v18  ;;  %v1772_v32 = vsel %vm1670_vm8, %v1767_v31, 0 }
 0x934   : > { %1823 = vst.msk [vmem:[#allocation6 + $0x5] sm:$0x1] %vm1806_vm0, %v1820_v21  ;;  %1781 = vmatpush.bf16.msrb.mxu3 %v1772_v32 }
 0x935   : > { %1833 = vst.msk [vmem:[#allocation6 + $0x8] sm:$0x1] %vm1806_vm0, %v1830_v27 }
 0x936   : > { %1842 = vst.msk [vmem:[#allocation6 + $0x3] sm:$0xc0] %vm1319_vm10, %v1606_v3 }
 0x937   : > { %1843 = vst.msk [vmem:[#allocation6 + $0xb] sm:$0x1] %vm1806_vm0, %v1840_v33 }
 0x93b   : > { %v1894_v34 = vld [vmem:[#allocation6] sm:$0xff] }
 0x93c   : > { %1937 = vst.msk [vmem:[#allocation6 - $0x1] sm:$0xe] %vm1935_vm2, %v1810_v19 }
 0x93d   : > { %1939 = vst.msk [vmem:[#allocation6 + $0x2] sm:$0xe] %vm1935_vm2, %v1820_v21 }
 0x93e   : > { %v1895_v15 = vld [vmem:[#allocation6 + $0x8] sm:$0xf] }
 0x93f   : > { %v1897_v1 = vpack.c.bf16 %v1895_v15, %v1894_v34  ;;  %1943 = vst.msk [vmem:[#allocation6 + $0x8] sm:$0xe] %vm1935_vm2, %v1840_v33 }
 0x940   : > { %1941 = vst.msk [vmem:[#allocation6 + $0x5] sm:$0xe] %vm1935_vm2, %v1830_v27 }
 0x941   : > { %v1902_v36 = vsel %vm1670_vm8, %v1897_v1, 0 }
 0x942   : > { %1911 = vmatpush.bf16.msra.mxu0 %v1902_v36 }
 0x947   : > { %v1994_v37 = vld [vmem:[#allocation6] sm:$0xff]  ;;  %v1995_v38 = vld [vmem:[#allocation6 + $0x8] sm:$0xf] }
 0x948   : > { %v1997_v39 = vpack.c.bf16 %v1995_v38, %v1994_v37 }
 0x94a   : > { %v2002_v40 = vsel %vm1670_vm8, %v1997_v39, 0 }
 0x94b   : > { %2011 = vmatpush.bf16.msra.mxu3 %v2002_v40 }
 0x969   : > { %v1647_v41 = vpop.xlane.xlu1 %1646 }
 0x96a   : > { %2770 = vrcp.f32 %v1647_v41  ;;  %v1659_v47 = vand.u32 2147483648, %v1647_v41  ;;  %v1657_v51 = vand.u32 2147483647, %v1647_v41  ;;  %vm1653_vm10 = vweird.f32 %v1647_v41 }
 0x96c   : > { %v1660_v55 = vor.u32 1.1754944e-38, %v1659_v47  ;;  %vm1658_vm11 = vcmp.eq.f32.partialorder %v1657_v51, 8.507059e+37  ;;  %v2631_v47 = vld [vmem:[%s3766_s19] sm:$0xff] }
 0x96e   : > { %v1748_v43 = vpop.xlane.xlu0 %1747 }
 0x96f   : > { %2772 = vrcp.f32 %v1748_v43  ;;  %v1760_v57 = vand.u32 2147483648, %v1748_v43  ;;  %v1758_v60 = vand.u32 2147483647, %v1748_v43  ;;  %vm1754_vm13 = vweird.f32 %v1748_v43 }
 0x970   : > { %v2771_v48 = vpop.eup %2770 }
 0x971   : > { %v1649_v44 = vmul.f32 %v2771_v48, %v1647_v41  ;;  %vm1654_vm9 = vweird.f32 %v2771_v48  ;;  %v1761_v63 = vor.u32 1.1754944e-38, %v1760_v57  ;;  %vm1759_vm0 = vcmp.eq.f32.partialorder %v1758_v60, 8.507059e+37 }
 0x972   : > { %vm1655_vm3 = vmor %vm1653_vm10, %vm1654_vm9 }
 0x973   : > { %v1650_v45 = vsub.f32 1.0, %v1649_v44 }
 0x975   : > { %v2773_v49 = vpop.eup %2772  ;;  %v1651_v52 = vmul.f32 %v2771_v48, %v1650_v45  ;;  %v2632_v45 = vld [vmem:[%s3766_s19 + $0x8] sm:$0xff] }
 0x976   : > { %v1750_v53 = vmul.f32 %v2773_v49, %v1748_v43  ;;  %vm1755_vm12 = vweird.f32 %v2773_v49  ;;  %2058 = vmatpush.bf16.msrb.mxu2 %v2632_v45 }
 0x977   : > { %v1652_v42 = vadd.f32 %v2771_v48, %v1651_v52  ;;  %vm1756_vm14 = vmor %vm1754_vm13, %vm1755_vm12 }
 0x978   : > { %v1751_v46 = vsub.f32 1.0, %v1750_v53 }
 0x979   : > { %v1656_v56 = vsel %vm1655_vm3, %v2771_v48, %v1652_v42 }
 0x97a   : > { %v1661_v58 = vsel %vm1658_vm11, %v1660_v55, %v1656_v56  ;;  %v1752_v59 = vmul.f32 %v2773_v49, %v1751_v46  ;;  %2059 = vmatpush.bf16.msrb.mxu2 %v2631_v47 }
 0x97b   : > { %v1662_v61 = vmul.f32 %v3494_v4, %v1661_v58  ;;  %v2731_v58 = vld [vmem:[%s882_s9] ss:$0 sm:$0xff] }
 0x97c   : > { %v1753_v62 = vadd.f32 %v2773_v49, %v1752_v59 }
 0x97d   : > { %v1665_v54 = vpack.c.bf16 %v1662_v61, %v1662_v61 }
 0x97e   : > { %v1757_v0 = vsel %vm1756_vm14, %v2773_v49, %v1753_v62 }
 0x97f   : > { %v1762_v2 = vsel %vm1759_vm0, %v1761_v63, %v1757_v0  ;;  %2567 = vmatmul.msk.bf16.vlgmr.msrb.gmra.mxu0 %vm1638_vm7, %v1665_v54 }
 0x980   : > { %v1763_v3 = vmul.f32 %v3498_v35, %v1762_v2 }
 0x981   : > { %v1878_v5 = vpop.xlane.xlu0 %1877 }
 0x982   : > { %v1766_v50 = vpack.c.bf16 %v1763_v3, %v1763_v3  ;;  %2774 = vrcp.f32 %v1878_v5  ;;  %v1888_v11 = vand.u32 2147483647, %v1878_v5  ;;  %v1890_v12 = vand.u32 2147483648, %v1878_v5 }
 0x983   : > { %vm1884_vm8 = vweird.f32 %v1878_v5 }
 0x984   : > { %2569 = vmatmul.msk.bf16.vlgmr.msrb.gmra.mxu3 %vm1638_vm7, %v1766_v50  ;;  %vm1889_vm10 = vcmp.eq.f32.partialorder %v1888_v11, 8.507059e+37  ;;  %v1891_v35 = vor.u32 1.1754944e-38, %v1890_v12  ;;  %v2634_v50 = vld [vmem:[%s3152_s10 + $0x8] sm:$0xff] }
 0x985   : > { %v1978_v6 = vpop.xlane.xlu2 %1977  ;;  %2126 = vmatpush.bf16.msrb.mxu0 %v2634_v50 }
 0x986   : > { %2776 = vrcp.f32 %v1978_v6  ;;  %v1990_v20 = vand.u32 2147483648, %v1978_v6  ;;  %v1988_v24 = vand.u32 2147483647, %v1978_v6  ;;  %vm1984_vm11 = vweird.f32 %v1978_v6 }
 0x988   : > { %v2775_v4 = vpop.eup %2774  ;;  %v1991_v28 = vor.u32 1.1754944e-38, %v1990_v20  ;;  %vm1989_vm13 = vcmp.eq.f32.partialorder %v1988_v24, 8.507059e+37 }
 0x989   : > { %v1880_v7 = vmul.f32 %v2775_v4, %v1878_v5  ;;  %vm1885_vm2 = vweird.f32 %v2775_v4 }
 0x98a   : > { %vm1886_vm9 = vmor %vm1884_vm8, %vm1885_vm2 }
 0x98b   : > { %v1881_v8 = vsub.f32 1.0, %v1880_v7  ;;  %v2638_v7 = vld [vmem:[%s3166_s8 + $0x18] sm:$0xff] }
 0x98c   : > { %v2777_v10 = vpop.eup %2776  ;;  %2175 = vmatpush.bf16.msrb.mxu1 %v2638_v7 }
 0x98d   : > { %v1882_v14 = vmul.f32 %v2775_v4, %v1881_v8  ;;  %v1980_v17 = vmul.f32 %v2777_v10, %v1978_v6  ;;  %vm1985_vm3 = vweird.f32 %v2777_v10  ;;  %v2633_v6 = vld [vmem:[%s3152_s10] sm:$0xff]  ;;  %v2637_v8 = vld [vmem:[%s3166_s8 + $0x10] sm:$0xff] }
 0x98e   : > { %vm1986_vm12 = vmor %vm1984_vm11, %vm1985_vm3  ;;  %2127 = vmatpush.bf16.msrb.mxu0 %v2633_v6 }
 0x98f   : > { %v1883_v18 = vadd.f32 %v2775_v4, %v1882_v14  ;;  %v1981_v19 = vsub.f32 1.0, %v1980_v17 }
 0x990   : > { %2176 = vmatpush.bf16.msrb.mxu1 %v2637_v8 }
 0x991   : > { %v1887_v21 = vsel %vm1886_vm9, %v2775_v4, %v1883_v18  ;;  %v1982_v22 = vmul.f32 %v2777_v10, %v1981_v19 }
 0x992   : > { %v1892_v25 = vsel %vm1889_vm10, %v1891_v35, %v1887_v21 }
 0x993   : > { %v1893_v26 = vmul.f32 %v3502_v13, %v1892_v25  ;;  %v1983_v27 = vadd.f32 %v2777_v10, %v1982_v22 }
 0x995   : > { %v1987_v29 = vsel %vm1986_vm12, %v2777_v10, %v1983_v27  ;;  %v1896_v31 = vpack.c.bf16 %v1893_v26, %v1893_v26  ;;  %v2636_v27 = vld [vmem:[%s3166_s8 + $0x8] sm:$0xff] }
 0x996   : > { %v1992_v32 = vsel %vm1989_vm13, %v1991_v28, %v1987_v29  ;;  %2177 = vmatpush.bf16.msrb.mxu1 %v2636_v27  ;;  %v2635_v28 = vld [vmem:[%s3166_s8] sm:$0xff]  ;;  %s3769_s8 = sld [smem:[#allocation13_spill]] }
 0x997   : > { %v1993_v33 = vmul.f32 %v3506_v16, %v1992_v32  ;;  %2571 = vmatmul.msk.bf16.vlgmr.msra.gmra.mxu0 %vm1638_vm7, %v1896_v31  ;;  %v2732_v29 = vld [vmem:[%s890_s15] ss:$0 sm:$0xff] }
 0x999   : > { %v1996_v34 = vpack.c.bf16 %v1993_v33, %v1993_v33 }
 0x99a   : > { %2178 = vmatpush.bf16.msrb.mxu1 %v2635_v28 }
 0x99b   : > { %2573 = vmatmul.msk.bf16.vlgmr.msra.gmra.mxu3 %vm1638_vm7, %v1996_v34 }
 0x99c   : > { %p2609_p1 = scmp.ne.s32.totalorder %s3769_s8, 1 }
 0x9fc   : > { %v1683_v15 = vpop.f32.mrf.mxu0 }
 0x9fd   : > { %1687 = vst.msk [vmem:[#allocation3] sm:$0x3] %vm986_vm6, %v1683_v15  ;;  %1693 = vrot.lane.b32.xlu0 %v1683_v15, %s2897_s7  ;;  %1689 = vrot.lane.b32.xlu1 %v1683_v15, %s2898_s11 }
 0xa04   : > { %v1685_v13 = vpop.f32.mrf.mxu0 }
 0xa05   : > { %1697 = vrot.lane.b32.xlu1 %v1683_v15, %s2899_s12  ;;  %v2733_v13 = vld [vmem:[%s898_s25] ss:$0 sm:$0xff]  ;;  %s3770_s25 = sld [smem:[#allocation30_spill]] (!%p2609_p1) }
 0xa07   : > { %v1783_v1 = vpop.f32.mrf.mxu3 }
 0xa08   : > { %1787 = vst.msk [vmem:[#allocation3 + $0x2] sm:$0x3] %vm986_vm6, %v1783_v1  ;;  %1793 = vrot.lane.b32.xlu2 %v1783_v1, %s2897_s7  ;;  %1789 = vrot.lane.b32.xlu0 %v1783_v1, %s2898_s11 }
 0xa0f   : > { %v1785_v16 = vpop.f32.mrf.mxu3 }
 0xa10   : > { %1797 = vrot.lane.b32.xlu0 %v1783_v1, %s2899_s12 }
 0xa14   : > { %v1913_v36 = vpop.f32.mrf.mxu0 }
 0xa15   : > { %1917 = vst.msk [vmem:[#allocation3 + $0x4] sm:$0x3] %vm986_vm6, %v1913_v36  ;;  %1923 = vrot.lane.b32.xlu1 %v1913_v36, %s2897_s7 }
 0xa18   : > { %1919 = vrot.lane.b32.xlu0 %v1913_v36, %s2898_s11 }
 0xa1c   : > { %v1915_v37 = vpop.f32.mrf.mxu0 }
 0xa1e   : > { %v2013_v38 = vpop.f32.mrf.mxu3 }
 0xa1f   : > { %2017 = vst.msk [vmem:[#allocation3 + $0x6] sm:$0x3] %vm986_vm6, %v2013_v38  ;;  %2019 = vrot.lane.b32.xlu1 %v2013_v38, %s2898_s11 }
 0xa20   : > { %2023 = vrot.lane.b32.xlu0 %v2013_v38, %s2897_s7 }
 0xa26   : > { %v2015_v39 = vpop.f32.mrf.mxu3 }
 0xa27   : > { %1927 = vrot.lane.b32.xlu1 %v1913_v36, %s2899_s12 }
 0xa28   : > { %2027 = vrot.lane.b32.xlu0 %v2013_v38, %s2899_s12 }
 0xa62   : > { %v1794_v44 = vpop.permute.xlu2 %1793 }
 0xa6f   : > { %v1690_v40 = vpop.permute.xlu1 %1689  ;;  %v1694_v41 = vpop.permute.xlu0 %1693 }
 0xa70   : > { %1692 = vst.msk [vmem:[#allocation3 - $0x2] sm:$0xc] %vm1111_vm15, %v1690_v40 }
 0xa71   : > { %1696 = vst.msk [vmem:[#allocation3 - $0x4] sm:$0x30] %vm1116_vm4, %v1694_v41 }
 0xa77   : > { %v1698_v43 = vpop.permute.xlu1 %1697 }
 0xa78   : > { %1700 = vst.msk [vmem:[#allocation3 - $0x6] sm:$0xc0] %vm1121_vm5, %v1698_v43 }
 0xa7a   : > { %v1790_v48 = vpop.permute.xlu0 %1789 }
 0xa7b   : > { %1792 = vst.msk [vmem:[#allocation3] sm:$0xc] %vm1111_vm15, %v1790_v48 }
 0xa7c   : > { %1796 = vst.msk [vmem:[#allocation3 - $0x2] sm:$0x30] %vm1116_vm4, %v1794_v44 }
 0xa82   : > { %v1798_v49 = vpop.permute.xlu0 %1797 }
 0xa83   : > { %1800 = vst.msk [vmem:[#allocation3 - $0x4] sm:$0xc0] %vm1121_vm5, %v1798_v49 }
 0xa87   : > { %v1924_v52 = vpop.permute.xlu1 %1923 }
 0xa8a   : > { %v1920_v51 = vpop.permute.xlu0 %1919 }
 0xa8b   : > { %1922 = vst.msk [vmem:[#allocation3 + $0x2] sm:$0xc] %vm1111_vm15, %v1920_v51 }
 0xa8c   : > { %1926 = vst.msk [vmem:[#allocation3] sm:$0x30] %vm1116_vm4, %v1924_v52 }
 0xa91   : > { %v2020_v53 = vpop.permute.xlu1 %2019 }
 0xa92   : > { %2022 = vst.msk [vmem:[#allocation3 + $0x4] sm:$0xc] %vm1111_vm15, %v2020_v53  ;;  %v2024_v42 = vpop.permute.xlu0 %2023 }
 0xa93   : > { %2026 = vst.msk [vmem:[#allocation3 + $0x2] sm:$0x30] %vm1116_vm4, %v2024_v42  ;;  %vm2167_vm4 = vcmask 523264  }
 0xa99   : > { %v1928_v55 = vpop.permute.xlu1 %1927 }
 0xa9a   : > { %1930 = vst.msk [vmem:[#allocation3 - $0x2] sm:$0xc0] %vm1121_vm5, %v1928_v55  ;;  %v2028_v46 = vpop.permute.xlu0 %2027 }
 0xa9b   : > { %2030 = vst.msk [vmem:[#allocation3] sm:$0xc0] %vm1121_vm5, %v2028_v46 }
 0xaa2   : > { %v2031_v56 = vld [vmem:[#allocation3] sm:$0xff] }
 0xaa3   : > { %v2036_v57 = vpack.c.bf16 %v2031_v56, %v2031_v56 }
 0xaa5   : > { %2582 = vmatmul.msk.bf16.vlgmr.msrb.gmra.mxu2 %vm908_vm1, %v2036_v57 }
 0xb28   : > { %v2061_v59 = vpop.f32.mrf.mxu2 }
 0xb29   : > { %v2065_v60 = vadd.f32 %v2061_v59, %v3375_v30 }
 0xb2b   : > { %v2070_v61 = vadd.f32 %v2731_v58, %v2065_v60 }
 0xb2d   : > { %v2071_v62 = vsel %vm908_vm1, %v2070_v61, 0.0 }
 0xb2e   : > { %2072 = vadd.xlane.f32.xlu2 %v2071_v62 }
 0xb30   : > { %v2063_v63 = vpop.f32.mrf.mxu2 }
 0xba1   : > { %v2073_v54 = vpop.xlane.xlu2 %2072 }
 0xba2   : > { %v2074_v0 = vmul.f32 %v2073_v54, %v3174_v9 }
 0xba4   : > { %v2075_v2 = vsub.f32 %v2070_v61, %v2074_v0 }
 0xba6   : > { %v2076_v3 = vmul.f32 %v2075_v2, %v2075_v2 }
 0xba8   : > { %v2077_v5 = vsel %vm908_vm1, %v2076_v3, 0.0 }
 0xba9   : > { %2078 = vadd.xlane.f32.xlu1 %v2077_v5 }
 0xc1c   : > { %v2079_v30 = vpop.xlane.xlu1 %2078 }
 0xc1d   : > { %v2080_v4 = vmul.f32 %v2079_v30, %v3181_v23 }
 0xc1f   : > { %2778 = vrsqrt.f32 %v2080_v4  ;;  %vm2088_vm6 = vcmp.eq.f32.partialorder %v2080_v4, inf  ;;  %v2091_v35 = vand.u32 2147483648, %v2080_v4  ;;  %vm2090_vm15 = vcmp.eq.f32.partialorder %v2080_v4, 0.0 }
 0xc25   : > { %v2779_v10 = vpop.eup %2778 }
 0xc26   : > { %v2082_v11 = vmul.f32 %v2779_v10, %v2080_v4 }
 0xc28   : > { %v2083_v12 = vmul.f32 %v2779_v10, %v2082_v11 }
 0xc2a   : > { %v2084_v14 = vmul.f32 0.5, %v2083_v12 }
 0xc2c   : > { %v2085_v17 = vsub.f32 1.5, %v2084_v14 }
 0xc2e   : > { %v2086_v18 = vmul.f32 %v2779_v10, %v2085_v17 }
 0xc30   : > { %v2087_v19 = vmul.f32 %v2086_v18, %v2080_v4 }
 0xc32   : > { %v2089_v20 = vsel %vm2088_vm6, %v2080_v4, %v2087_v19 }
 0xc33   : > { %v2092_v21 = vsel %vm2090_vm15, %v2091_v35, %v2089_v20 }
 0xc34   : > { %v2093_v22 = vadd.f32 1e-07, %v2092_v21 }
 0xc36   : > { %2780 = vrcp.f32 %v2093_v22 }
 0xc3c   : > { %v2781_v24 = vpop.eup %2780 }
 0xc3d   : > { %v2095_v25 = vmul.f32 %v2781_v24, %v2075_v2 }
 0xc3f   : > { %v2100_v26 = vpack.c.bf16 %v2095_v25, %v2095_v25 }
 0xc41   : > { %2591 = vmatmul.msk.bf16.vlgmr.msrb.gmra.mxu0 %vm908_vm1, %v2100_v26 }
 0xcbe   : > { %v2129_v31 = vpop.f32.mrf.mxu0 }
 0xcbf   : > { %v2130_v32 = vadd.f32 %v2732_v29, %v2129_v31 }
 0xcc1   : > { %v2133_v33 = vmax.f32 %v2130_v32, 0.0 }
 0xcc3   : > { %v2142_v34 = vpack.c.bf16 %v2133_v33, %v2133_v33 }
 0xcc5   : > { %2608 = vmatmul.msk.bf16.vlgmr.msrb.gmra.mxu1 %vm2167_vm4, %v2142_v34 }
 0xcc6   : > { %v2131_v15 = vpop.f32.mrf.mxu0 }
 0xd42   : > { %v2180_v1 = vpop.f32.mrf.mxu1 }
 0xd43   : > { %v2184_v16 = vadd.f32 %v2180_v1, %v2070_v61 }
 0xd45   : > { %v2189_v36 = vadd.f32 %v2733_v13, %v2184_v16 }
 0xd46   : > { %2194 = sbr.rel (%p2609_p1) target bundleno = 3682 (0xe62), region = 104 }
 0xd47   : > { %2190 = vst.msk [vmem:[#allocation2] sm:$0xff] %vm908_vm1, %v2189_v36 }
 0xd4a   : > { %v2182_v37 = vpop.f32.mrf.mxu1 }
 0xd4b   : > { %v2195_v38 = vsel %vm908_vm1, %v2189_v36, 0.0  ;;  %v2783_v59 = vld [vmem:[%s3770_s25 + $0x1] ss:$0 sm:$0xff] }
 0xd4c   : > { %2196 = vadd.xlane.f32.xlu0 %v2195_v38 }
 0xdbf   : > { %v2197_v39 = vpop.xlane.xlu0 %2196 }
 0xdc0   : > { %v2198_v40 = vmul.f32 %v2197_v39, %v3174_v9 }
 0xdc2   : > { %v2199_v41 = vsub.f32 %v2189_v36, %v2198_v40 }
 0xdc4   : > { %v2200_v43 = vmul.f32 %v2199_v41, %v2199_v41 }
 0xdc6   : > { %v2201_v48 = vsel %vm908_vm1, %v2200_v43, 0.0 }
 0xdc7   : > { %2202 = vadd.xlane.f32.xlu0 %v2201_v48 }
 0xe3a   : > { %v2203_v44 = vpop.xlane.xlu0 %2202 }
 0xe3b   : > { %v2204_v45 = vmul.f32 %v2203_v44, %v3181_v23  ;;  %v2782_v23 = vld [vmem:[%s3770_s25] ss:$0 sm:$0xff] }
 0xe3d   : > { %2784 = vrsqrt.f32 %v2204_v45  ;;  %vm2212_vm5 = vcmp.eq.f32.partialorder %v2204_v45, inf  ;;  %v2215_v46 = vand.u32 2147483648, %v2204_v45  ;;  %vm2214_vm7 = vcmp.eq.f32.partialorder %v2204_v45, 0.0 }
 0xe43   : > { %v2785_v47 = vpop.eup %2784 }
 0xe44   : > { %v2206_v49 = vmul.f32 %v2785_v47, %v2204_v45 }
 0xe46   : > { %v2207_v52 = vmul.f32 %v2785_v47, %v2206_v49 }
 0xe48   : > { %v2208_v51 = vmul.f32 0.5, %v2207_v52 }
 0xe4a   : > { %v2209_v53 = vsub.f32 1.5, %v2208_v51 }
 0xe4c   : > { %v2210_v42 = vmul.f32 %v2785_v47, %v2209_v53 }
 0xe4e   : > { %v2211_v55 = vmul.f32 %v2210_v42, %v2204_v45 }
 0xe50   : > { %v2213_v9 = vsel %vm2212_vm5, %v2204_v45, %v2211_v55 }
 0xe51   : > { %v2216_v56 = vsel %vm2214_vm7, %v2215_v46, %v2213_v9 }
 0xe52   : > { %v2217_v57 = vadd.f32 1e-07, %v2216_v56 }
 0xe54   : > { %2786 = vrcp.f32 %v2217_v57 }
 0xe5a   : > { %v2787_v58 = vpop.eup %2786 }
 0xe5b   : > { %v2219_v60 = vmul.f32 %v2787_v58, %v2199_v41 }
 0xe5d   : > { %v2222_v61 = vmul.f32 %v2782_v23, %v2219_v60 }
 0xe5f   : > { %v2225_v62 = vadd.f32 %v2783_v59, %v2222_v61 }
 0xe61   : > { %2226 = vst.msk [vmem:[%s826_s2] sm:$0xff] %vm908_vm1, %v2225_v62 }
 0xe62 PF: > { %s3771_s23 = sld [smem:[#allocation14_spill]]  ;;  %s2240_s18 = sshll.u32 %s826_s2, 4  ;;  %s2241_s18 = int_to_ptr.vmem [resolvable:$true] %s2240_s18 }
 0xe63   : > { %s3772_s27 = sld [smem:[#allocation11_spill]] }
 0xe64   : > { %s3774_s16 = sld [smem:[#allocation43_spill]] }
 0xe68   : > { %s2611_s17 = sshll.u32 %s3771_s23, 3 }
 0xe69   : > { %s3775_s0 = sand.u32 1, %s3772_s27  }
 0xe6a   : > { %s2238_s13 = scalar_lea.hbm %s3774_s16, %s2611_s17  ;;  %s2228_s20 = scalar_lea.sflag [#allocation8], %s3775_s0 }
 0xe6b   : > { %s2242_s5 = sshll.u32 %s2238_s13, 4  ;;  %s2808_s10 = scalar_lea.hbm %s3774_s16, 16  ;;  %s2243_s5 = int_to_ptr.hbm [resolvable:$true] %s2242_s5 }
 0xe6c   : > { %s2802_s19 = sshra.s32 %s2243_s5, 4  ;;  %s2803_s19 = int_to_ptr.hbm [resolvable:$true] %s2802_s19 }
 0xe6d   : > { %s2804_s28 = scalar_lea.hbm %s2803_s19, 8  ;;  %p2809_p6 = scmp.lt.s32.totalorder %s2803_s19, %s3774_s16 }
 0xe6e   : > { %p2805_p2 = scmp.ne.s32.totalorder %s2803_s19, %s2804_s28  ;;  %p2810_p7 = scmp.lt.s32.totalorder %s2808_s10, %s2804_s28 }
 0xe70   : > { %p2806_p4 = pnand %p2805_p2, %p3049_p3  ;;  %p2811_p8 = por %p2810_p7, %p2809_p6 }
 0xe72   : > { %p2807_p5 = pneg %p2806_p4 }
 0xe74   : > { %p2812_p10 = pnand %p2811_p8, %p2807_p5 }
 0xe76   : > { %2815 = shalt.err (!%p2812_p10)
}
 0xe77   : > { %2639 = dma.vmem_to_hbm [thread:$0]  (%p3049_p3), %s2241_s18, 128, %s2243_s5, %s2228_s20  }
 0xe78 PF: > { %s3776_s22 = sld [smem:[#allocation17_spill]] }
 0xe79   : > { %s3777_s2 = sld [smem:[#allocation10_spill]] }
 0xe7e   : > { %p2645_p11 = scmp.ge.s32.totalorder %s3776_s22, 2 }
 0xe7f   : > { %s2254_s12 = sand.u32 1, %s3777_s2  }
 0xe80   : > { %p2642_p12 = pnand %p2645_p11, %p3059_p9  ;;  %s2255_s8 = scalar_lea.sflag [#allocation8], %s2254_s12 }
 0xe82   : > { %p2643_p13 = pneg %p2642_p12 }
 0xe84   : > { %2849 = dma.done.wait (%p2643_p13), %s2255_s8, 128  }
 0xe85   : > { %2851 = vsyncadd (%p2643_p13), %s2255_s8, 4294967168  ;;  %s32_s23 = sadd.s32 1, %s3776_s22   ;;  %s3779_s0 = sld [smem:[#allocation11_spill]] }
 0xe86   : > { %p29_p0 = scmp.ge.s32.totalorder %s32_s23, 6   ;;  %s3780_s30 = sld [smem:[#allocation12_spill]] }
 0xe87   : > { %s3781_s20 = sld [smem:[#allocation22_spill]] }
 0xe88   : > { %s3782_s21 = sld [smem:[#allocation15_spill]]  ;;  %31 = sbr.rel (!%p29_p0) target bundleno = 24 (0x18), region = 190 }
 0xe89   : > { %s3783_s1 = sld [smem:[#allocation16_spill]] }
 0xe8a   : > { %s3784_s22 = sld [smem:[#allocation18_spill]] }
 0xe8b   : > { %s3785_s2 = sld [smem:[#allocation20_spill]] }
 0xe8d   :  { %2261 = vsyncpa [#allocation8], 1 }
 0xe8e   :  { %2263 = vsyncpa [#allocation8 + $0x1], 1 }

</bundles_post_ra>
